<compile_context>
chip_gen: v7x
topology: tpu7x:2x2x1
jax: 0.10.0
libtpu: 0.0.40
codegen_flags: <defaults>
</compile_context>

<pallas_src>
import functools

import jax
import jax.numpy as jnp
from jax.experimental import pallas as pl
from jax.experimental.pallas import tpu as pltpu

LANE = 128


# ------------------------------ fused kernel ------------------------------

def _bottleneck_kernel(x_ref, xrows_hbm, w1_ref, w33_ref, w3_ref, wsc_ref,
                       s0_ref, b0_ref, b1_ref, b2_ref,
                       o_ref,
                       a1k_ref, halo_ref, sem,
                       *, th, img_h, w, n_blocks, cdt):
    """One (image n, row-block i) step of the whole bottleneck block.

    x_ref      : (th, w, Cin) cdt    row block of x (auto-pipelined VMEM)
    xrows_hbm  : (N*H, w, Cin) cdt   same x, left in HBM (halo row DMA)
    w1_ref     : (Cin, P)            1x1 conv, BN1 scale folded in
    w33_ref    : (3, 3*P, P)         3x3 conv, kx folded into K, BN2 scale folded
    w3_ref     : (P, Cout)           final 1x1 conv
    wsc_ref    : (Cin, Cout)         1x1 shortcut conv
    s0/b0      : BN0 scale/shift (f32, (1, Cin)); b1/b2: BN1/BN2 shifts
    o_ref      : (th, w, Cout) f32   output row block
    a1k_ref    : (th+2, w, 3*P) cdt  kx-concatenated a1 tile (rows 0/th+1 = halo)
    halo_ref   : (2, w, Cin) cdt     the two halo x rows
    """
    n = pl.program_id(0)
    i = pl.program_id(1)
    cin = x_ref.shape[-1]
    p = w1_ref.shape[-1]
    cout = o_ref.shape[-1]

    s0 = s0_ref[...]
    b0 = b0_ref[...]
    b1 = b1_ref[...]

    # ---- kick off the halo-row DMAs (rows i*th-1 and (i+1)*th of image n);
    # they overlap with the main-row stage-1 compute below.
    if n_blocks > 1:
        n_imgs = pl.num_programs(0)
        row0 = n * img_h + i * th
        top = jnp.maximum(row0 - 1, 0)
        bot = jnp.minimum(row0 + th, n_imgs * img_h - 1)
        cp_top = pltpu.make_async_copy(xrows_hbm.at[top], halo_ref.at[0], sem.at[0])
        cp_bot = pltpu.make_async_copy(xrows_hbm.at[bot], halo_ref.at[1], sem.at[1])

        @pl.when(i > 0)
        def _():
            cp_top.start()

        @pl.when(i < n_blocks - 1)
        def _():
            cp_bot.start()

    def stage1(x_any):                       # (M, Cin) -> (M, P) cdt
        xf = x_any.astype(jnp.float32)
        xp = jnp.maximum(xf * s0 + b0, 0.0)                       # BN0 + ReLU (f32)
        h = jnp.dot(xp.astype(cdt), w1_ref[...],
                    preferred_element_type=jnp.float32)           # 1x1 conv (s1 folded)
        return jnp.maximum(h + b1, 0.0).astype(cdt)               # BN1 + ReLU

    # ---- stage 1 on the th main rows.
    x_main = x_ref[...].reshape(th * w, cin)
    a1c = stage1(x_main).reshape(th, w, p)

    # Build the kx-concatenated a1 buffer: lane slot kx holds a1 shifted by
    # (kx - 1) columns, zero at the image border.  Rows 1..th = this block.
    a1k_ref[1:th + 1, :, p:2 * p] = a1c                           # kx = 1 (center)
    a1k_ref[1:th + 1, 1:, 0:p] = a1c[:, :w - 1, :]                # kx = 0
    a1k_ref[1:th + 1, :w - 1, 2 * p:3 * p] = a1c[:, 1:, :]        # kx = 2
    # zero the conv W-padding columns of the two shifted slots (all rows).
    zcol = jnp.zeros((th + 2, 1, p), cdt)
    a1k_ref[:, 0:1, 0:p] = zcol
    a1k_ref[:, w - 1:w, 2 * p:3 * p] = zcol

    # ---- stage 1 recomputed on the halo rows (zero outside the image).
    if n_blocks > 1:
        @pl.when(i > 0)
        def _():
            cp_top.wait()
            a1t = stage1(halo_ref[0])                             # (w, P)
            a1k_ref[0, :, p:2 * p] = a1t
            a1k_ref[0, 1:, 0:p] = a1t[:w - 1]
            a1k_ref[0, :w - 1, 2 * p:3 * p] = a1t[1:]

        @pl.when(i < n_blocks - 1)
        def _():
            cp_bot.wait()
            a1b = stage1(halo_ref[1])
            a1k_ref[th + 1, :, p:2 * p] = a1b
            a1k_ref[th + 1, 1:, 0:p] = a1b[:w - 1]
            a1k_ref[th + 1, :w - 1, 2 * p:3 * p] = a1b[1:]

    @pl.when(i == 0)                          # out-of-image top halo -> zero
    def _():
        a1k_ref[0:1, :, :] = jnp.zeros((1, w, 3 * p), cdt)

    @pl.when(i == n_blocks - 1)               # out-of-image bottom halo -> zero
    def _():
        a1k_ref[th + 1:th + 2, :, :] = jnp.zeros((1, w, 3 * p), cdt)

    # ---- stage 2: 3x3 conv as 3 matmuls with K = 3*P (kx folded into K);
    # the ky shift is a cheap leading-axis slice of the a1 buffer.
    h2 = jnp.dot(a1k_ref[0:th, :, :].reshape(th * w, 3 * p), w33_ref[0],
                 preferred_element_type=jnp.float32)
    h2 = h2 + jnp.dot(a1k_ref[1:th + 1, :, :].reshape(th * w, 3 * p), w33_ref[1],
                      preferred_element_type=jnp.float32)
    h2 = h2 + jnp.dot(a1k_ref[2:th + 2, :, :].reshape(th * w, 3 * p), w33_ref[2],
                      preferred_element_type=jnp.float32)
    a2 = jnp.maximum(h2 + b2_ref[...], 0.0).astype(cdt)           # BN2 (s2 folded) + ReLU

    # ---- stage 3: final 1x1 conv + 1x1 shortcut conv (original x) + residual.
    out = jnp.dot(a2, w3_ref[...], preferred_element_type=jnp.float32)
    out = out + jnp.dot(x_main, wsc_ref[...], preferred_element_type=jnp.float32)
    o_ref[...] = out.reshape(th, w, cout).astype(o_ref.dtype)


# ------------------------------ wrapper ------------------------------

def _fold_bn(gamma, beta, mean, var, eps=1e-5):
    scale = gamma / jnp.sqrt(var + eps)
    shift = beta - mean * scale
    return scale.astype(jnp.float32), shift.astype(jnp.float32)


def _pad_to(a, shape):
    pads = [(0, t - s) for s, t in zip(a.shape, shape)]
    if all(pp == (0, 0) for pp in pads):
        return a
    return jnp.pad(a, pads)


def _round_up(v, m):
    return (v + m - 1) // m * m


def bottleneck_forward(x_nchw, params, *, tile_h=32, compute_dtype=jnp.bfloat16):
    """Forward of bottleneck(inplanes != outplanes, stride=1, ptype='preact')."""
    n_img, cin, height, width = x_nchw.shape
    planes = params['w1'].shape[1]
    cout = params['w3'].shape[1]
    assert width % 8 == 0, "W must be a multiple of 8 (TPU sublane tiling)"

    th = min(tile_h, height)
    while height % th:
        th -= 1
    n_blocks = height // th

    # lane-align channel dims (no-op for production channel counts)
    cin_p = _round_up(cin, LANE)
    pln_p = _round_up(planes, LANE)
    cout_p = _round_up(cout, LANE)
    cdt = compute_dtype

    # x lives in HBM in the compute dtype (bf16 fast path halves HBM reads and
    # the double-buffered x VMEM block; f32 gives the exact path).
    x = jnp.transpose(x_nchw, (0, 2, 3, 1))                       # NHWC
    x = _pad_to(x, (n_img, height, width, cin_p)).astype(cdt)
    x_rows = x.reshape(n_img * height, width, cin_p)

    s0, b0 = _fold_bn(params['bn0_g'], params['bn0_b'], params['bn0_m'], params['bn0_v'])
    s1, b1 = _fold_bn(params['bn1_g'], params['bn1_b'], params['bn1_m'], params['bn1_v'])
    s2, b2 = _fold_bn(params['bn2_g'], params['bn2_b'], params['bn2_m'], params['bn2_v'])

    # fold BN1/BN2 scales into the conv weights -> in-kernel BN1/BN2 = add+ReLU.
    w1 = params['w1'].astype(jnp.float32) * s1[None, :]
    w33 = params['w3x3'].astype(jnp.float32) * s2[None, None, None, :]

    s0 = _pad_to(s0[None, :], (1, cin_p))
    b0 = _pad_to(b0[None, :], (1, cin_p))
    b1 = _pad_to(b1[None, :], (1, pln_p))
    b2 = _pad_to(b2[None, :], (1, pln_p))

    w1 = _pad_to(w1, (cin_p, pln_p)).astype(cdt)
    # (ky, kx, Cin, Cout) -> (ky, kx*Cin, Cout): kx folded into the K dim.
    w33 = _pad_to(w33, (3, 3, pln_p, pln_p)).reshape(3, 3 * pln_p, pln_p).astype(cdt)
    w3 = _pad_to(params['w3'], (pln_p, cout_p)).astype(cdt)
    wsc = _pad_to(params['wsc'], (cin_p, cout_p)).astype(cdt)

    rowmap = lambda n, i: (n * n_blocks + i, 0, 0)
    c2 = lambda n, i: (0, 0)
    c3 = lambda n, i: (0, 0, 0)

    kernel = functools.partial(_bottleneck_kernel, th=th, img_h=height, w=width,
                               n_blocks=n_blocks, cdt=cdt)

    # rough VMEM footprint (double-buffered x/out blocks + weights + scratch);
    # keep a 32 MiB floor (>= default scoped limit on every generation).
    isz = jnp.dtype(cdt).itemsize
    est = (2 * th * width * cin_p * isz                 # x block (x2 buffers)
           + 2 * th * width * cout_p * 4                # out block f32 (x2 buffers)
           + 2 * (cin_p * pln_p + 9 * pln_p * pln_p
                  + pln_p * cout_p + cin_p * cout_p) * isz
           + (th + 2) * width * 3 * pln_p * isz         # a1 concat scratch
           + 2 * width * cin_p * isz)                   # halo scratch
    vmem_limit = int(min(max(2 * est, 32 * 1024 * 1024), 96 * 1024 * 1024))

    out_rows = pl.pallas_call(
        kernel,
        out_shape=jax.ShapeDtypeStruct((n_img * height, width, cout_p), jnp.float32),
        grid_spec=pltpu.PrefetchScalarGridSpec(
            num_scalar_prefetch=0,
            grid=(n_img, n_blocks),
            in_specs=[
                pl.BlockSpec((th, width, cin_p), rowmap),    # x row block (pipelined)
                pl.BlockSpec(memory_space=pl.ANY),           # x rows in HBM (halo DMA)
                pl.BlockSpec((cin_p, pln_p), c2),            # w1 (s1 folded)
                pl.BlockSpec((3, 3 * pln_p, pln_p), c3),     # w3x3 (kx-fused, s2 folded)
                pl.BlockSpec((pln_p, cout_p), c2),           # w3
                pl.BlockSpec((cin_p, cout_p), c2),           # wsc
                pl.BlockSpec((1, cin_p), c2), pl.BlockSpec((1, cin_p), c2),  # s0, b0
                pl.BlockSpec((1, pln_p), c2), pl.BlockSpec((1, pln_p), c2),  # b1, b2
            ],
            out_specs=pl.BlockSpec((th, width, cout_p), rowmap),
            scratch_shapes=[
                pltpu.VMEM((th + 2, width, 3 * pln_p), cdt),  # kx-concat a1 tile
                pltpu.VMEM((2, width, cin_p), cdt),           # halo x rows
                pltpu.SemaphoreType.DMA((2,)),
            ]),
        compiler_params=pltpu.CompilerParams(
            dimension_semantics=("parallel", "parallel"),
            vmem_limit_bytes=vmem_limit),
    )(x_rows, x_rows, w1, w33, w3, wsc, s0, b0, b1, b2)

    out = out_rows.reshape(n_img, height, width, cout_p)[..., :cout]
    return jnp.transpose(out, (0, 3, 1, 2))                       # back to NCHW


# ------------------------- params / reference -------------------------

def init_params(key, inplanes, outplanes):
    planes = outplanes // 2
    ks = jax.random.split(key, 20)

    def nrm(k, shape, scale=0.1):
        return scale * jax.random.normal(k, shape, jnp.float32)

    return dict(
        # conv weights in matmul-ready layouts:
        # 1x1 convs -> (Cin, Cout); 3x3 conv -> (ky, kx, Cin, Cout) (HWIO)
        w1=nrm(ks[0], (inplanes, planes)),
        w3x3=nrm(ks[1], (3, 3, planes, planes)),
        w3=nrm(ks[2], (planes, outplanes)),
        wsc=nrm(ks[3], (inplanes, outplanes)),
        # BatchNorm params (inference / running stats)
        bn0_g=1.0 + nrm(ks[4], (inplanes,)), bn0_b=nrm(ks[5], (inplanes,)),
        bn0_m=nrm(ks[6], (inplanes,)),
        bn0_v=0.5 + jnp.abs(nrm(ks[7], (inplanes,), 0.5)),
        bn1_g=1.0 + nrm(ks[8], (planes,)), bn1_b=nrm(ks[9], (planes,)),
        bn1_m=nrm(ks[10], (planes,)),
        bn1_v=0.5 + jnp.abs(nrm(ks[11], (planes,), 0.5)),
        bn2_g=1.0 + nrm(ks[12], (planes,)), bn2_b=nrm(ks[13], (planes,)),
        bn2_m=nrm(ks[14], (planes,)),
        bn2_v=0.5 + jnp.abs(nrm(ks[15], (planes,), 0.5)),
    )


def reference_forward(x_nchw, p, eps=1e-5):
    # pure-JAX reference of the same semantics (ptype='preact', stride=1).
    x = jnp.transpose(x_nchw, (0, 2, 3, 1)).astype(jnp.float32)

    def bn(v, g, b, m, var):
        return (v - m) / jnp.sqrt(var + eps) * g + b

    xp = jax.nn.relu(bn(x, p['bn0_g'], p['bn0_b'], p['bn0_m'], p['bn0_v']))
    h1 = jnp.einsum('nhwc,cd->nhwd', xp, p['w1'])
    h1 = jax.nn.relu(bn(h1, p['bn1_g'], p['bn1_b'], p['bn1_m'], p['bn1_v']))
    h2 = jax.lax.conv_general_dilated(
        h1, p['w3x3'], window_strides=(1, 1), padding='SAME',
        dimension_numbers=('NHWC', 'HWIO', 'NHWC'))
    h2 = jax.nn.relu(bn(h2, p['bn2_g'], p['bn2_b'], p['bn2_m'], p['bn2_v']))
    out = jnp.einsum('nhwc,cd->nhwd', h2, p['w3']) \
        + jnp.einsum('nhwc,cd->nhwd', x, p['wsc'])
    return jnp.transpose(out, (0, 3, 1, 2))


if __name__ == "__main__":
    key = jax.random.PRNGKey(0)
    k_x, k_p = jax.random.split(key)

    N, inplanes, outplanes, H, W = 2, 4, 8, 16, 16
    x = jax.random.normal(k_x, (N, inplanes, H, W), jnp.float32)
    params = init_params(k_p, inplanes, outplanes)

    ref = reference_forward(x, params)

    # exact-math path (f32 operands), full-height tile -> tight tolerance
    out_f32 = jax.block_until_ready(
        bottleneck_forward(x, params, compute_dtype=jnp.float32))
    assert out_f32.shape == (N, outplanes, H, W)
    assert jnp.allclose(out_f32, ref, rtol=1e-4, atol=1e-4), "f32 mismatch vs reference"

    # exact-math path with small row blocks -> exercises the halo DMA / boundary logic
    out_tiled = jax.block_until_ready(
        bottleneck_forward(x, params, tile_h=8, compute_dtype=jnp.float32))
    assert jnp.allclose(out_tiled, ref, rtol=1e-4, atol=1e-4), "tiled f32 mismatch"

    # fast path (bf16 operands / bf16 HBM x, f32 accumulation) -> looser tolerance
    out_bf16 = jax.block_until_ready(
        bottleneck_forward(x, params, compute_dtype=jnp.bfloat16))
    assert out_bf16.shape == (N, outplanes, H, W)
    assert jnp.allclose(out_bf16, ref, rtol=5e-2, atol=3e-2), "bf16 mismatch vs reference"

    print("KERNEL_OK")
</pallas_src>

<mosaic_0001>
module attributes {stable_mosaic.version = 11 : i64} {
  func.func @_bottleneck_kernel(%arg0: i32, %arg1: i32, %arg2: memref<16x16x128xf32, #tpu.memory_space<vmem>>, %arg3: memref<32x16x128xf32, #tpu.memory_space<any>>, %arg4: memref<128x128xf32, #tpu.memory_space<vmem>>, %arg5: memref<3x384x128xf32, #tpu.memory_space<vmem>>, %arg6: memref<128x128xf32, #tpu.memory_space<vmem>>, %arg7: memref<128x128xf32, #tpu.memory_space<vmem>>, %arg8: memref<1x128xf32, #tpu.memory_space<vmem>>, %arg9: memref<1x128xf32, #tpu.memory_space<vmem>>, %arg10: memref<1x128xf32, #tpu.memory_space<vmem>>, %arg11: memref<1x128xf32, #tpu.memory_space<vmem>>, %arg12: memref<16x16x128xf32, #tpu.memory_space<vmem>>, %arg13: memref<18x16x384xf32, #tpu.memory_space<vmem>>, %arg14: memref<2x16x128xf32, #tpu.memory_space<vmem>>, %arg15: memref<2x!tpu.dma_semaphore, #tpu.memory_space<semaphore_mem>>) attributes {dimension_semantics = [#tpu.dimension_semantics<parallel>, #tpu.dimension_semantics<parallel>], iteration_bounds = array<i64: 2, 1>, scalar_prefetch = 0 : i64, scratch_operands = 3 : i64, tpu.core_type = #tpu.core_type<tc>, window_params = [{transform_indices = @transform_0, window_bounds = array<i64: 16, 16, 128>}, {}, {pipeline_mode = #tpu.pipeline_mode<synchronous>, transform_indices = @transform_2, window_bounds = array<i64: 128, 128>}, {pipeline_mode = #tpu.pipeline_mode<synchronous>, transform_indices = @transform_3, window_bounds = array<i64: 3, 384, 128>}, {pipeline_mode = #tpu.pipeline_mode<synchronous>, transform_indices = @transform_4, window_bounds = array<i64: 128, 128>}, {pipeline_mode = #tpu.pipeline_mode<synchronous>, transform_indices = @transform_5, window_bounds = array<i64: 128, 128>}, {pipeline_mode = #tpu.pipeline_mode<synchronous>, transform_indices = @transform_6, window_bounds = array<i64: 1, 128>}, {pipeline_mode = #tpu.pipeline_mode<synchronous>, transform_indices = @transform_7, window_bounds = array<i64: 1, 128>}, {pipeline_mode = #tpu.pipeline_mode<synchronous>, transform_indices = @transform_8, window_bounds = array<i64: 1, 128>}, {pipeline_mode = #tpu.pipeline_mode<synchronous>, transform_indices = @transform_9, window_bounds = array<i64: 1, 128>}, {transform_indices = @transform_10, window_bounds = array<i64: 16, 16, 128>}]} {
    %c0 = arith.constant 0 : index
    %c0_0 = arith.constant 0 : index
    %0 = vector.load %arg8[%c0, %c0_0] : memref<1x128xf32, #tpu.memory_space<vmem>>, vector<1x128xf32>
    %c0_1 = arith.constant 0 : index
    %c0_2 = arith.constant 0 : index
    %1 = vector.load %arg9[%c0_1, %c0_2] : memref<1x128xf32, #tpu.memory_space<vmem>>, vector<1x128xf32>
    %c0_3 = arith.constant 0 : index
    %c0_4 = arith.constant 0 : index
    %2 = vector.load %arg10[%c0_3, %c0_4] : memref<1x128xf32, #tpu.memory_space<vmem>>, vector<1x128xf32>
    %c0_5 = arith.constant 0 : index
    %c0_6 = arith.constant 0 : index
    %c0_7 = arith.constant 0 : index
    %3 = vector.load %arg2[%c0_5, %c0_6, %c0_7] : memref<16x16x128xf32, #tpu.memory_space<vmem>>, vector<16x16x128xf32>
    %4 = vector.shape_cast %3 : vector<16x16x128xf32> to vector<256x128xf32>
    %5 = vector.broadcast %0 : vector<1x128xf32> to vector<256x128xf32>
    %6 = arith.mulf %4, %5 : vector<256x128xf32>
    %7 = vector.broadcast %1 : vector<1x128xf32> to vector<256x128xf32>
    %8 = arith.addf %6, %7 : vector<256x128xf32>
    %cst = arith.constant 0.000000e+00 : f32
    %9 = vector.broadcast %cst : f32 to vector<256x128xf32>
    %10 = arith.maximumf %8, %9 : vector<256x128xf32>
    %c0_8 = arith.constant 0 : index
    %c0_9 = arith.constant 0 : index
    %11 = vector.load %arg4[%c0_8, %c0_9] : memref<128x128xf32, #tpu.memory_space<vmem>>, vector<128x128xf32>
    %cst_10 = arith.constant dense<0.000000e+00> : vector<256x128xf32>
    %12 = tpu.matmul %10, %11, %cst_10 {dimension_numbers = #tpu.dot_dimension_numbers<[1], [0], [0], [1], [0, 0, 1, 1], [], []>} : vector<256x128xf32>, vector<128x128xf32>, vector<256x128xf32> -> vector<256x128xf32>
    %13 = vector.broadcast %2 : vector<1x128xf32> to vector<256x128xf32>
    %14 = arith.addf %12, %13 : vector<256x128xf32>
    %cst_11 = arith.constant 0.000000e+00 : f32
    %15 = vector.broadcast %cst_11 : f32 to vector<256x128xf32>
    %16 = arith.maximumf %14, %15 : vector<256x128xf32>
    %17 = vector.shape_cast %16 : vector<256x128xf32> to vector<16x16x128xf32>
    %c1 = arith.constant 1 : index
    %c0_12 = arith.constant 0 : index
    %c128 = arith.constant 128 : index
    %18 = vector.load %arg13[%c1, %c0_12, %c128] : memref<18x16x384xf32, #tpu.memory_space<vmem>>, vector<16x16x128xf32>
    tpu.vector_store %arg13[%c1, %c0_12, %c128], %17 {strides = array<i32>} : memref<18x16x384xf32, #tpu.memory_space<vmem>>, vector<16x16x128xf32>,
    %19 = vector.extract_strided_slice %17 {offsets = [0, 0, 0], sizes = [16, 15, 128], strides = [1, 1, 1]} : vector<16x16x128xf32> to vector<16x15x128xf32>
    %c1_13 = arith.constant 1 : index
    %c1_14 = arith.constant 1 : index
    %c0_15 = arith.constant 0 : index
    %20 = vector.load %arg13[%c1_13, %c1_14, %c0_15] : memref<18x16x384xf32, #tpu.memory_space<vmem>>, vector<16x15x128xf32>
    tpu.vector_store %arg13[%c1_13, %c1_14, %c0_15], %19 {strides = array<i32>} : memref<18x16x384xf32, #tpu.memory_space<vmem>>, vector<16x15x128xf32>,
    %21 = vector.extract_strided_slice %17 {offsets = [0, 1, 0], sizes = [16, 15, 128], strides = [1, 1, 1]} : vector<16x16x128xf32> to vector<16x15x128xf32>
    %c1_16 = arith.constant 1 : index
    %c0_17 = arith.constant 0 : index
    %c256 = arith.constant 256 : index
    %22 = vector.load %arg13[%c1_16, %c0_17, %c256] : memref<18x16x384xf32, #tpu.memory_space<vmem>>, vector<16x15x128xf32>
    tpu.vector_store %arg13[%c1_16, %c0_17, %c256], %21 {strides = array<i32>} : memref<18x16x384xf32, #tpu.memory_space<vmem>>, vector<16x15x128xf32>,
    %cst_18 = arith.constant 0.000000e+00 : f32
    %23 = vector.broadcast %cst_18 : f32 to vector<18x1x128xf32>
    %c0_19 = arith.constant 0 : index
    %c0_20 = arith.constant 0 : index
    %c0_21 = arith.constant 0 : index
    %24 = vector.load %arg13[%c0_19, %c0_20, %c0_21] : memref<18x16x384xf32, #tpu.memory_space<vmem>>, vector<18x1x128xf32>
    tpu.vector_store %arg13[%c0_19, %c0_20, %c0_21], %23 {strides = array<i32>} : memref<18x16x384xf32, #tpu.memory_space<vmem>>, vector<18x1x128xf32>,
    %c0_22 = arith.constant 0 : index
    %c15 = arith.constant 15 : index
    %c256_23 = arith.constant 256 : index
    %25 = vector.load %arg13[%c0_22, %c15, %c256_23] : memref<18x16x384xf32, #tpu.memory_space<vmem>>, vector<18x1x128xf32>
    tpu.vector_store %arg13[%c0_22, %c15, %c256_23], %23 {strides = array<i32>} : memref<18x16x384xf32, #tpu.memory_space<vmem>>, vector<18x1x128xf32>,
    %c0_i32 = arith.constant 0 : i32
    %26 = arith.cmpi eq, %arg1, %c0_i32 : i32
    %27 = arith.extui %26 : i1 to i32
    %c0_i32_24 = arith.constant 0 : i32
    %28 = arith.cmpi ne, %27, %c0_i32_24 : i32
    scf.if %28 {
      %cst_59 = arith.constant 0.000000e+00 : f32
      %61 = vector.broadcast %cst_59 : f32 to vector<1x16x384xf32>
      %c0_60 = arith.constant 0 : index
      %c0_61 = arith.constant 0 : index
      %c0_62 = arith.constant 0 : index
      %62 = vector.load %arg13[%c0_60, %c0_61, %c0_62] : memref<18x16x384xf32, #tpu.memory_space<vmem>>, vector<1x16x384xf32>
      tpu.vector_store %arg13[%c0_60, %c0_61, %c0_62], %61 {strides = array<i32>} : memref<18x16x384xf32, #tpu.memory_space<vmem>>, vector<1x16x384xf32>,
    } else {
    }
    %c0_i32_25 = arith.constant 0 : i32
    %29 = arith.cmpi eq, %arg1, %c0_i32_25 : i32
    %30 = arith.extui %29 : i1 to i32
    %c0_i32_26 = arith.constant 0 : i32
    %31 = arith.cmpi ne, %30, %c0_i32_26 : i32
    scf.if %31 {
      %cst_59 = arith.constant 0.000000e+00 : f32
      %61 = vector.broadcast %cst_59 : f32 to vector<1x16x384xf32>
      %c17 = arith.constant 17 : index
      %c0_60 = arith.constant 0 : index
      %c0_61 = arith.constant 0 : index
      %62 = vector.load %arg13[%c17, %c0_60, %c0_61] : memref<18x16x384xf32, #tpu.memory_space<vmem>>, vector<1x16x384xf32>
      tpu.vector_store %arg13[%c17, %c0_60, %c0_61], %61 {strides = array<i32>} : memref<18x16x384xf32, #tpu.memory_space<vmem>>, vector<1x16x384xf32>,
    } else {
    }
    %c0_27 = arith.constant 0 : index
    %c0_28 = arith.constant 0 : index
    %c0_29 = arith.constant 0 : index
    %32 = vector.load %arg13[%c0_27, %c0_28, %c0_29] : memref<18x16x384xf32, #tpu.memory_space<vmem>>, vector<16x16x384xf32>
    %33 = vector.shape_cast %32 : vector<16x16x384xf32> to vector<256x384xf32>
    %c0_30 = arith.constant 0 : index
    %c0_31 = arith.constant 0 : index
    %c0_32 = arith.constant 0 : index
    %34 = vector.load %arg5[%c0_30, %c0_31, %c0_32] : memref<3x384x128xf32, #tpu.memory_space<vmem>>, vector<1x384x128xf32>
    %35 = vector.shape_cast %34 : vector<1x384x128xf32> to vector<384x128xf32>
    %cst_33 = arith.constant dense<0.000000e+00> : vector<256x128xf32>
    %36 = tpu.matmul %33, %35, %cst_33 {dimension_numbers = #tpu.dot_dimension_numbers<[1], [0], [0], [1], [0, 0, 1, 1], [], []>} : vector<256x384xf32>, vector<384x128xf32>, vector<256x128xf32> -> vector<256x128xf32>
    %c1_34 = arith.constant 1 : index
    %c0_35 = arith.constant 0 : index
    %c0_36 = arith.constant 0 : index
    %37 = vector.load %arg13[%c1_34, %c0_35, %c0_36] : memref<18x16x384xf32, #tpu.memory_space<vmem>>, vector<16x16x384xf32>
    %38 = vector.shape_cast %37 : vector<16x16x384xf32> to vector<256x384xf32>
    %c1_37 = arith.constant 1 : index
    %c0_38 = arith.constant 0 : index
    %c0_39 = arith.constant 0 : index
    %39 = vector.load %arg5[%c1_37, %c0_38, %c0_39] : memref<3x384x128xf32, #tpu.memory_space<vmem>>, vector<1x384x128xf32>
    %40 = vector.shape_cast %39 : vector<1x384x128xf32> to vector<384x128xf32>
    %cst_40 = arith.constant dense<0.000000e+00> : vector<256x128xf32>
    %41 = tpu.matmul %38, %40, %cst_40 {dimension_numbers = #tpu.dot_dimension_numbers<[1], [0], [0], [1], [0, 0, 1, 1], [], []>} : vector<256x384xf32>, vector<384x128xf32>, vector<256x128xf32> -> vector<256x128xf32>
    %42 = arith.addf %36, %41 : vector<256x128xf32>
    %c2 = arith.constant 2 : index
    %c0_41 = arith.constant 0 : index
    %c0_42 = arith.constant 0 : index
    %43 = vector.load %arg13[%c2, %c0_41, %c0_42] : memref<18x16x384xf32, #tpu.memory_space<vmem>>, vector<16x16x384xf32>
    %44 = vector.shape_cast %43 : vector<16x16x384xf32> to vector<256x384xf32>
    %c2_43 = arith.constant 2 : index
    %c0_44 = arith.constant 0 : index
    %c0_45 = arith.constant 0 : index
    %45 = vector.load %arg5[%c2_43, %c0_44, %c0_45] : memref<3x384x128xf32, #tpu.memory_space<vmem>>, vector<1x384x128xf32>
    %46 = vector.shape_cast %45 : vector<1x384x128xf32> to vector<384x128xf32>
    %cst_46 = arith.constant dense<0.000000e+00> : vector<256x128xf32>
    %47 = tpu.matmul %44, %46, %cst_46 {dimension_numbers = #tpu.dot_dimension_numbers<[1], [0], [0], [1], [0, 0, 1, 1], [], []>} : vector<256x384xf32>, vector<384x128xf32>, vector<256x128xf32> -> vector<256x128xf32>
    %48 = arith.addf %42, %47 : vector<256x128xf32>
    %c0_47 = arith.constant 0 : index
    %c0_48 = arith.constant 0 : index
    %49 = vector.load %arg11[%c0_47, %c0_48] : memref<1x128xf32, #tpu.memory_space<vmem>>, vector<1x128xf32>
    %50 = vector.broadcast %49 : vector<1x128xf32> to vector<256x128xf32>
    %51 = arith.addf %48, %50 : vector<256x128xf32>
    %cst_49 = arith.constant 0.000000e+00 : f32
    %52 = vector.broadcast %cst_49 : f32 to vector<256x128xf32>
    %53 = arith.maximumf %51, %52 : vector<256x128xf32>
    %c0_50 = arith.constant 0 : index
    %c0_51 = arith.constant 0 : index
    %54 = vector.load %arg6[%c0_50, %c0_51] : memref<128x128xf32, #tpu.memory_space<vmem>>, vector<128x128xf32>
    %cst_52 = arith.constant dense<0.000000e+00> : vector<256x128xf32>
    %55 = tpu.matmul %53, %54, %cst_52 {dimension_numbers = #tpu.dot_dimension_numbers<[1], [0], [0], [1], [0, 0, 1, 1], [], []>} : vector<256x128xf32>, vector<128x128xf32>, vector<256x128xf32> -> vector<256x128xf32>
    %c0_53 = arith.constant 0 : index
    %c0_54 = arith.constant 0 : index
    %56 = vector.load %arg7[%c0_53, %c0_54] : memref<128x128xf32, #tpu.memory_space<vmem>>, vector<128x128xf32>
    %cst_55 = arith.constant dense<0.000000e+00> : vector<256x128xf32>
    %57 = tpu.matmul %4, %56, %cst_55 {dimension_numbers = #tpu.dot_dimension_numbers<[1], [0], [0], [1], [0, 0, 1, 1], [], []>} : vector<256x128xf32>, vector<128x128xf32>, vector<256x128xf32> -> vector<256x128xf32>
    %58 = arith.addf %55, %57 : vector<256x128xf32>
    %59 = vector.shape_cast %58 : vector<256x128xf32> to vector<16x16x128xf32>
    %c0_56 = arith.constant 0 : index
    %c0_57 = arith.constant 0 : index
    %c0_58 = arith.constant 0 : index
    %60 = vector.load %arg12[%c0_56, %c0_57, %c0_58] : memref<16x16x128xf32, #tpu.memory_space<vmem>>, vector<16x16x128xf32>
    tpu.vector_store %arg12[%c0_56, %c0_57, %c0_58], %59 {strides = array<i32>} : memref<16x16x128xf32, #tpu.memory_space<vmem>>, vector<16x16x128xf32>,
    return
  }
  func.func @transform_0(%arg0: i32, %arg1: i32) -> (i32, i32, i32) {
    %c1_i32 = arith.constant 1 : i32
    %0 = arith.muli %arg0, %c1_i32 : i32
    %1 = arith.addi %0, %arg1 : i32
    %c0_i32 = arith.constant 0 : i32
    %c0_i32_0 = arith.constant 0 : i32
    %c0_i32_1 = arith.constant 0 : i32
    return %1, %c0_i32, %c0_i32_0 : i32, i32, i32
  }
  func.func @transform_2(%arg0: i32, %arg1: i32) -> (i32, i32) {
    %c0_i32 = arith.constant 0 : i32
    %c0_i32_0 = arith.constant 0 : i32
    %c0_i32_1 = arith.constant 0 : i32
    return %c0_i32, %c0_i32_0 : i32, i32
  }
  func.func @transform_3(%arg0: i32, %arg1: i32) -> (i32, i32, i32) {
    %c0_i32 = arith.constant 0 : i32
    %c0_i32_0 = arith.constant 0 : i32
    %c0_i32_1 = arith.constant 0 : i32
    %c0_i32_2 = arith.constant 0 : i32
    return %c0_i32, %c0_i32_0, %c0_i32_1 : i32, i32, i32
  }
  func.func @transform_4(%arg0: i32, %arg1: i32) -> (i32, i32) {
    %c0_i32 = arith.constant 0 : i32
    %c0_i32_0 = arith.constant 0 : i32
    %c0_i32_1 = arith.constant 0 : i32
    return %c0_i32, %c0_i32_0 : i32, i32
  }
  func.func @transform_5(%arg0: i32, %arg1: i32) -> (i32, i32) {
    %c0_i32 = arith.constant 0 : i32
    %c0_i32_0 = arith.constant 0 : i32
    %c0_i32_1 = arith.constant 0 : i32
    return %c0_i32, %c0_i32_0 : i32, i32
  }
  func.func @transform_6(%arg0: i32, %arg1: i32) -> (i32, i32) {
    %c0_i32 = arith.constant 0 : i32
    %c0_i32_0 = arith.constant 0 : i32
    %c0_i32_1 = arith.constant 0 : i32
    return %c0_i32, %c0_i32_0 : i32, i32
  }
  func.func @transform_7(%arg0: i32, %arg1: i32) -> (i32, i32) {
    %c0_i32 = arith.constant 0 : i32
    %c0_i32_0 = arith.constant 0 : i32
    %c0_i32_1 = arith.constant 0 : i32
    return %c0_i32, %c0_i32_0 : i32, i32
  }
  func.func @transform_8(%arg0: i32, %arg1: i32) -> (i32, i32) {
    %c0_i32 = arith.constant 0 : i32
    %c0_i32_0 = arith.constant 0 : i32
    %c0_i32_1 = arith.constant 0 : i32
    return %c0_i32, %c0_i32_0 : i32, i32
  }
  func.func @transform_9(%arg0: i32, %arg1: i32) -> (i32, i32) {
    %c0_i32 = arith.constant 0 : i32
    %c0_i32_0 = arith.constant 0 : i32
    %c0_i32_1 = arith.constant 0 : i32
    return %c0_i32, %c0_i32_0 : i32, i32
  }
  func.func @transform_10(%arg0: i32, %arg1: i32) -> (i32, i32, i32) {
    %c1_i32 = arith.constant 1 : i32
    %0 = arith.muli %arg0, %c1_i32 : i32
    %1 = arith.addi %0, %arg1 : i32
    %c0_i32 = arith.constant 0 : i32
    %c0_i32_0 = arith.constant 0 : i32
    %c0_i32_1 = arith.constant 0 : i32
    return %1, %c0_i32, %c0_i32_0 : i32, i32, i32
  }
}

</mosaic_0001>

<bundles_post_ra>
// kernel: tpu_custom_call.1
= control target key start
LH: loop header
LB: loop body
LE: loop exit
PB: predicated region body
PF: predicated region fallthrough
CT: control target
= control target key end

     0   :  { %s6921_s0 = inlined_call_operand.hbm [shape: f32[32,16,128], index: 0, kind: input, shape index: {}]   ;;  %s6922_s1 = inlined_call_operand.hbm [shape: f32[32,16,128], index: 1, kind: input, shape index: {}]   ;;  %s6923_s2 = inlined_call_operand.hbm [shape: f32[128,128], index: 2, kind: input, shape index: {}]   ;;  %s6924_s3 = inlined_call_operand.hbm [shape: f32[3,384,128], index: 3, kind: input, shape index: {}]   ;;  %s6925_s4 = inlined_call_operand.hbm [shape: f32[128,128], index: 4, kind: input, shape index: {}]   ;;  %s6926_s5 = inlined_call_operand.hbm [shape: f32[128,128], index: 5, kind: input, shape index: {}]   ;;  %s6927_s6 = inlined_call_operand.vmem [shape: f32[1,128], index: 6, kind: input, shape index: {}]   ;;  %s6928_s7 = inlined_call_operand.vmem [shape: f32[1,128], index: 7, kind: input, shape index: {}]   ;;  %s6929_s8 = inlined_call_operand.vmem [shape: f32[1,128], index: 8, kind: input, shape index: {}]   ;;  %s6930_s9 = inlined_call_operand.vmem [shape: f32[1,128], index: 9, kind: input, shape index: {}]   ;;  %s6931_s10 = inlined_call_operand.hbm [shape: f32[32,16,128], index: 10, kind: output, shape index: {}]  }
   0x1   :  { %6949 = sst [smem:[#allocation30_spill]] %s6929_s8 }
   0x2   :  { %6950 = sst [smem:[#allocation31_spill]] %s6930_s9 }
   0x3   :  { %6951 = sst [smem:[#allocation32_spill]] %s6931_s10 }
   0x4   :  { %15 = vsyncpa [#allocation6], 0 }
   0x5   :  { %17 = vsyncpa [#allocation6 + $0x1], 0 }
   0x6   :  { %18 = vsyncpa [#allocation9], 0 }
   0x7   :  { %19 = vsyncpa [#allocation12], 0 }
   0x8   :  { %20 = vsyncpa [#allocation7], 0 }
   0x9   :  { %22 = vsyncpa [#allocation7 + $0x1], 0  ;;  %s5365_s12 = smov 0   ;;  %s5367_s13 = smov 0  }
   0xa   :  { %s5369_s14 = smov 0   ;;  %s5371_s15 = smov 0  }
   0xb   :  { %s5373_s16 = smov 0   ;;  %s5375_s17 = smov 0  }
   0xc LB: > { %6952 = sst [smem:[#allocation19_spill]] %s5276_s12  ;;  %s3750_s18 = sadd.s32 4294967295, %s5296_s17   ;;  %s5296_s17 = sphi %s5375_s17, %s28_s17   ;;  %s5292_s16 = sphi %s5373_s16, %s6998_s16   ;;  %s5288_s15 = sphi %s5371_s15, %s6997_s15   ;;  %s5284_s14 = sphi %s5369_s14, %s6996_s14   ;;  %s5280_s13 = sphi %s5367_s13, %s6995_s13   ;;  %s5276_s12 = sphi %s5365_s12, %s6994_s12  }
   0xd   : > { %6953 = sst [smem:[#allocation20_spill]] %s5288_s15  ;;  %s3751_s19 = sadd.s32 4294967294, %s5296_s17  }
   0xe   : > { %p62_p0 = scmp.ne.s32.totalorder %s5280_s13, %s5276_s12  ;;  %p5399_p1 = scmp.eq.s32.totalorder %s3750_s18, 0 }
   0xf   : > { %p5403_p2 = scmp.eq.s32.totalorder %s3750_s18, 1  ;;  %p262_p3 = scmp.eq.s32.totalorder %s3751_s19, 1 }
  0x10   : > { %s6954_s20 = scalar_select %p5399_p1, 1, 0 }
  0x11   : > { %s6955_s21 = scalar_select %p5403_p2, 1, 0 }
  0x12   : > { %p5409_p4 = por %p5399_p1, %p62_p0  ;;  %p3752_p5 = scmp.ge.s32.totalorder %s5296_s17, 1 }
  0x13   : > { %p5414_p6 = por %p262_p3, %p62_p0  ;;  %p269_p7 = scmp.lt.s32.totalorder %s5296_s17, 3 }
  0x14   : > { %s6956_s22 = scalar_select %p5409_p4, 1, 0 }
  0x15   : > { %s6957_s23 = scalar_select %p5414_p6, 1, 0 }
  0x16   : > { %p5419_p8 = pnand %p3752_p5, %p269_p7  ;;  %s5298_s25 = smov [#allocation8]  }
  0x17   : > { %6958 = sst [smem:[#allocation21_spill]] %s6957_s23  ;;  %s281_s26 = sshll.u32 %s5298_s25, 4  ;;  %s5423_s26 = int_to_ptr.vmem [resolvable:$true] %s281_s26 }
  0x18   : > { %s6959_s24 = scalar_select %p5419_p8, 1, 0 }
  0x19   : > { %p4941_p9 = pneg %p5419_p8  ;;  %s5299_s1 = smov [#allocation11]  }
  0x1a   : > { %s307_s28 = sshll.u32 %s5299_s1, 4  ;;  %s5300_s29 = smov [#allocation10]   ;;  %s5434_s28 = int_to_ptr.vmem [resolvable:$true] %s307_s28 }
  0x1b   : > { %p5430_p11 = pnand %p4941_p9, %p5399_p1  ;;  %s5436_s30 = sshll.u32 %s5300_s29, 4  ;;  %s295_s30 = int_to_ptr.vmem [resolvable:$true] %s5436_s30 }
  0x1c   : > { %s5064_s19 = scalar_lea.hbm %s6923_s2, 2048 }
  0x1d   : > { %p5065_p12 = scmp.ne.s32.totalorder %s6923_s2, %s5064_s19  ;;  %p5446_p13 = pneg %p5430_p11 }
  0x1e   : > { %p5071_p5 = scmp.lt.u32.totalorder %s5064_s19, %s6923_s2 }
  0x1f   : > { %p5067_p0 = pnand %p5446_p13, %p5065_p12 }
  0x21   : > { %p5068_p3 = pneg %p5067_p0 }
  0x23   : > { %p5073_p7 = pnand %p5071_p5, %p5068_p3 }
  0x25   : > { %5076 = shalt.err (!%p5073_p7)
}
  0x26   : > { %s5077_s23 = scalar_lea.vmem %s5423_s26, 2048  ;;  %p5085_p1 = scmp.lt.s32.totalorder %s5423_s26, %s5423_s26 }
  0x27   : > { %p5078_p9 = scmp.ne.s32.totalorder %s5423_s26, %s5077_s23  ;;  %p5086_p4 = scmp.lt.s32.totalorder %s5077_s23, %s5077_s23 }
  0x29   : > { %p5080_p10 = pnand %p5078_p9, %p5446_p13  ;;  %p5087_p12 = por %p5086_p4, %p5085_p1 }
  0x2b   : > { %p5081_p6 = pneg %p5080_p10 }
  0x2d   : > { %p5088_p0 = pnand %p5087_p12, %p5081_p6 }
  0x2f   : > { %5091 = shalt.err (!%p5088_p0)
}
  0x30   : > { %s5301_s11 = smov 128   ;;  %s5302_s18 = smov 8  }
  0x31   : > { %4944 = dma.hbm_to_vmem [thread:$0]  (!%p5430_p11), %s6923_s2, 2048, %s5423_s26, [#allocation9], %s5301_s11, %s5301_s11, %s5302_s18  }
  0x32   : > { %s5092_s23 = scalar_lea.hbm %s6925_s4, 2048 }
  0x33   : > { %p5093_p1 = scmp.ne.s32.totalorder %s6925_s4, %s5092_s23  ;;  %p5099_p10 = scmp.lt.u32.totalorder %s5092_s23, %s6925_s4 }
  0x35   : > { %p5095_p4 = pnand %p5093_p1, %p5446_p13 }
  0x37   : > { %p5096_p6 = pneg %p5095_p4 }
  0x39   : > { %p5101_p3 = pnand %p5099_p10, %p5096_p6 }
  0x3b   : > { %5104 = shalt.err (!%p5101_p3)
}
  0x3c   : > { %s5105_s26 = scalar_lea.vmem %s5434_s28, 2048  ;;  %p5113_p12 = scmp.lt.s32.totalorder %s5434_s28, %s5434_s28 }
  0x3d   : > { %p5106_p5 = scmp.ne.s32.totalorder %s5434_s28, %s5105_s26  ;;  %p5114_p0 = scmp.lt.s32.totalorder %s5105_s26, %s5105_s26 }
  0x3f   : > { %p5108_p7 = pnand %p5106_p5, %p5446_p13  ;;  %p5115_p1 = por %p5114_p0, %p5113_p12 }
  0x41   : > { %p5109_p9 = pneg %p5108_p7 }
  0x43   : > { %p5116_p4 = pnand %p5115_p1, %p5109_p9 }
  0x45   : > { %5119 = shalt.err (!%p5116_p4)
}
  0x46   : > { %4950 = dma.hbm_to_vmem [thread:$0]  (!%p5430_p11), %s6925_s4, 2048, %s5434_s28, [#allocation12], %s5301_s11, %s5301_s11, %s5302_s18  }
  0x47   : > { %s5120_s19 = scalar_lea.hbm %s6924_s3, 18432 }
  0x48   : > { %p5121_p6 = scmp.ne.s32.totalorder %s6924_s3, %s5120_s19  ;;  %p5127_p5 = scmp.lt.u32.totalorder %s5120_s19, %s6924_s3 }
  0x4a   : > { %p5123_p10 = pnand %p5121_p6, %p5446_p13 }
  0x4c   : > { %p5124_p3 = pneg %p5123_p10 }
  0x4e   : > { %p5129_p7 = pnand %p5127_p5, %p5124_p3 }
  0x50   : > { %5132 = shalt.err (!%p5129_p7)
}
  0x51   : > { %s5133_s26 = scalar_lea.vmem %s295_s30, 18432  ;;  %p5141_p1 = scmp.lt.s32.totalorder %s295_s30, %s295_s30 }
  0x52   : > { %p5134_p9 = scmp.ne.s32.totalorder %s295_s30, %s5133_s26  ;;  %p5142_p4 = scmp.lt.s32.totalorder %s5133_s26, %s5133_s26 }
  0x54   : > { %p5136_p12 = pnand %p5134_p9, %p5446_p13  ;;  %p5143_p8 = por %p5142_p4, %p5141_p1 }
  0x56   : > { %p5137_p0 = pneg %p5136_p12 }
  0x58   : > { %p5144_p2 = pnand %p5143_p8, %p5137_p0 }
  0x5a   : > { %5147 = shalt.err (!%p5144_p2)
}
  0x5b   : > { %4947 = dma.hbm_to_vmem [thread:$0]  (!%p5430_p11), %s6924_s3, 18432, %s295_s30, [#allocation9], %s5301_s11, %s5301_s11, %s5302_s18  }
  0x5c   : > { %s5303_s9 = smov [#allocation13]   ;;  %s5148_s25 = scalar_lea.hbm %s6926_s5, 2048 }
  0x5d   : > { %s320_s10 = sshll.u32 %s5303_s9, 4  ;;  %p5149_p2 = scmp.ne.s32.totalorder %s6926_s5, %s5148_s25  ;;  %s321_s10 = int_to_ptr.vmem [resolvable:$true] %s320_s10 }
  0x5e   : > { %p5155_p10 = scmp.lt.u32.totalorder %s5148_s25, %s6926_s5 }
  0x5f   : > { %p5151_p8 = pnand %p5149_p2, %p5446_p13 }
  0x61   : > { %p5152_p6 = pneg %p5151_p8 }
  0x63   : > { %p5157_p3 = pnand %p5155_p10, %p5152_p6 }
  0x65   : > { %5160 = shalt.err (!%p5157_p3)
}
  0x66   : > { %s5161_s30 = scalar_lea.vmem %s321_s10, 2048  ;;  %p5169_p12 = scmp.lt.s32.totalorder %s321_s10, %s321_s10 }
  0x67   : > { %p5162_p5 = scmp.ne.s32.totalorder %s321_s10, %s5161_s30  ;;  %p5170_p0 = scmp.lt.s32.totalorder %s5161_s30, %s5161_s30 }
  0x69   : > { %p5164_p7 = pnand %p5162_p5, %p5446_p13  ;;  %p5171_p1 = por %p5170_p0, %p5169_p12 }
  0x6b   : > { %p5165_p9 = pneg %p5164_p7 }
  0x6d   : > { %p5172_p4 = pnand %p5171_p1, %p5165_p9 }
  0x6f   : > { %5175 = shalt.err (!%p5172_p4)
}
  0x70   : > { %4953 = dma.hbm_to_vmem [thread:$0]  (!%p5430_p11), %s6926_s5, 2048, %s321_s10, [#allocation12], %s5301_s11, %s5301_s11, %s5302_s18  }
  0x71   : > { %s40_s12 = sadd.s32 1, %s5292_s16  ;;  %s49_s27 = sadd.s32 1, %s5284_s14 }
  0x72   : > { %p42_p13 = scmp.ge.s32.totalorder %s40_s12, 2  ;;  %p56_p2 = scmp.ne.s32.totalorder %s5284_s14, %s5280_s13 }
  0x73   : > { %p57_p8 = scmp.eq.s32.totalorder %s5296_s17, 0  ;;  %p4966_p6 = scmp.lt.s32.totalorder %s5296_s17, 2 }
  0x74   : > { %s7000_s12 = smov (%p42_p13, %s40_s12), 0  ;;  %p6962_p3 = scmp.ne.s32.totalorder %s6955_s21, 0 }
  0x75   : > { %p58_p10 = por %p57_p8, %p56_p2  ;;  %s46_s15 = ssub.s32 %s5292_s16, %s7000_s12 }
  0x76   : > { %p5549_p5 = por %p6962_p3, %p56_p2  ;;  %s346_s19 = sand.u32 1, %s5284_s14  }
  0x77   : > { %p47_p7 = scmp.eq.s32.totalorder %s46_s15, 0  ;;  %s3758_s10 = sshll.u32 %s346_s19, 8 }
  0x78   : > { %s3782_s25 = sshll.u32 %s5292_s16, 12  ;;  %s350_s21 = scalar_lea.vmem [#allocation5], %s3758_s10 }
  0x79   : > { %s5558_s1 = scalar_select %p47_p7, %s5284_s14, %s49_s27  }
  0x7a   : > { %s5563_s26 = scalar_lea.hbm %s6921_s0, %s3782_s25  ;;  %s359_s30 = sshll.u32 %s350_s21, 4  ;;  %s5571_s30 = int_to_ptr.vmem [resolvable:$true] %s359_s30 }
  0x7b   : > { %p5567_p11 = pnand %p4966_p6, %p58_p10  ;;  %s5573_s8 = scalar_lea.sflag [#allocation6], %s346_s19 }
  0x7c   : > { %s5176_s27 = scalar_lea.hbm %s5563_s26, 4096  ;;  %s5181_s25 = scalar_lea.hbm %s6921_s0, 8192 }
  0x7d   : > { %p5177_p9 = scmp.ne.s32.totalorder %s5563_s26, %s5176_s27  ;;  %p5178_p12 = pneg %p5567_p11 }
  0x7e   : > { %p5182_p4 = scmp.lt.u32.totalorder %s5563_s26, %s6921_s0  ;;  %p5183_p13 = scmp.lt.u32.totalorder %s5181_s25, %s5176_s27 }
  0x7f   : > { %p5179_p0 = pnand %p5178_p12, %p5177_p9  ;;  %p5185_p8 = scmp.lt.u32.totalorder %s5176_s27, %s5563_s26 }
  0x80   : > { %p5184_p2 = por %p5183_p13, %p5182_p4 }
  0x81   : > { %p5180_p1 = pneg %p5179_p0 }
  0x82   : > { %p5186_p6 = por %p5185_p8, %p5184_p2 }
  0x84   : > { %p5187_p10 = pnand %p5186_p6, %p5180_p1 }
  0x86   : > { %5190 = shalt.err (!%p5187_p10)
}
  0x87   : > { %s5191_s19 = scalar_lea.vmem %s5571_s30, 4096  ;;  %s5304_s21 = smov [#allocation5]  }
  0x88   : > { %p5192_p3 = scmp.ne.s32.totalorder %s5571_s30, %s5191_s19  ;;  %s5196_s15 = sshll.u32 %s5304_s21, 4  ;;  %s5197_s15 = int_to_ptr.vmem [resolvable:$false] %s5196_s15 }
  0x89   : > { %s5198_s10 = scalar_lea.vmem %s5197_s15, 8192  ;;  %p5199_p0 = scmp.lt.s32.totalorder %s5571_s30, %s5197_s15 }
  0x8a   : > { %p5194_p7 = pnand %p5192_p3, %p5178_p12  ;;  %p5200_p4 = scmp.lt.s32.totalorder %s5198_s10, %s5191_s19 }
  0x8c   : > { %p5195_p9 = pneg %p5194_p7  ;;  %p5201_p13 = por %p5200_p4, %p5199_p0 }
  0x8e   : > { %p5202_p2 = pnand %p5201_p13, %p5195_p9 }
  0x90   : > { %5205 = shalt.err (!%p5202_p2)
}
  0x91   : > { %4957 = dma.hbm_to_vmem [thread:$0]  (!%p5567_p11), %s5563_s26, 4096, %s5571_s30, %s5573_s8, %s5301_s11, %s5301_s11, %s5302_s18  }
  0x92   : > { %p6965_p12 = scmp.ne.s32.totalorder %s6959_s24, 0 }
  0x94   : > { %371 = sbr.rel (%p6965_p12) target bundleno = 1190 (0x4a6), region = 56 }
  0x9b   : > { %s5607_s27 = sand.u32 1, %s5280_s13   ;;  %p6966_p1 = scmp.ne.s32.totalorder %s6956_s22, 0 }
  0x9c   : > { %s3763_s25 = sshll.u32 %s5607_s27, 8  ;;  %s374_s29 = scalar_lea.sflag [#allocation6], %s5607_s27 }
  0x9d   : > { %s5613_s28 = scalar_lea.vmem [#allocation5], %s3763_s25 }
  0x9e   : > { %5259 = dma.done.wait (%p6966_p1), %s374_s29, 4096  }
  0x9f   : > { %5261 = vsyncadd (%p6966_p1), %s374_s29, 4294963200  ;;  %p6967_p11 = scmp.ne.s32.totalorder %s6954_s20, 0 }
  0xa1   : > { %5263 = dma.done.wait (%p6967_p11), [#allocation9], 20480  }
  0xa2   : > { %5265 = vsyncadd (%p6967_p11), [#allocation9], 4294946816 }
  0xa3   : > { %5267 = dma.done.wait (%p6967_p11), [#allocation12], 4096  }
  0xa4   : > { %5269 = vsyncadd (%p6967_p11), [#allocation12], 4294963200  ;;  %v575_v0 = vld [vmem:[#allocation8] sm:$0xff]  ;;  %v576_v1 = vld [vmem:[#allocation8 + $0x8] sm:$0xff]  ;;  %s6968_s30 = sld [smem:[#allocation30_spill]]  ;;  %vm919_vm0 = vcmask 1040384  }
  0xa5   : > { %v577_v2 = vld [vmem:[#allocation8 + $0x10] sm:$0xff]  ;;  %v4553_v3 = vpack.c.bf16 %v576_v1, %v575_v0  ;;  %v578_v4 = vld [vmem:[#allocation8 + $0x18] sm:$0xff]  ;;  %v579_v6 = vld [vmem:[#allocation8 + $0x20] sm:$0xff]  ;;  %vm1032_vm1 = vcmask 1046528   ;;  %s6986_s19 = sld [smem:[#allocation31_spill]]  ;;  %s6831_s21 = scalar_lea.vmem [#allocation14], %s3763_s25 }
  0xa6   : > { %v4557_v5 = vpack.c.bf16 %v578_v4, %v577_v2  ;;  %v580_v7 = vld [vmem:[#allocation8 + $0x28] sm:$0xff]  ;;  %v581_v9 = vld [vmem:[#allocation8 + $0x30] sm:$0xff]  ;;  %v5630_v10 = vld [vmem:[%s6927_s6] ss:$0 sm:$0xff]  ;;  %s6987_s15 = sld [smem:[#allocation20_spill]]  ;;  %s3616_s25 = sshll.u32 %s6831_s21, 4  ;;  %s6870_s25 = int_to_ptr.vmem [resolvable:$true] %s3616_s25 }
  0xa7   : > { %4554 = vmatprep.subr.bf16.mxu1 %v4553_v3  ;;  %v4561_v8 = vpack.c.bf16 %v580_v7, %v579_v6  ;;  %v582_v11 = vld [vmem:[#allocation8 + $0x38] sm:$0xff]  ;;  %v5635_v12 = vld [vmem:[%s6928_s7] ss:$0 sm:$0xff]  ;;  %v584_v18 = vld [vmem:[#allocation8 + $0x48] sm:$0xff]  ;;  %s6988_s22 = sld [smem:[#allocation32_spill]]  ;;  %s3601_s20 = scalar_lea.sflag [#allocation7], %s5607_s27 }
  0xa8   : > { %4556 = vmatpush3.bf16.msra.mxu1 %v4553_v3  ;;  %v435_v13 = vld [vmem:[%s5613_s28] sm:$0xff]  ;;  %v4565_v15 = vpack.c.bf16 %v582_v11, %v581_v9  ;;  %v585_v21 = vld [vmem:[#allocation8 + $0x50] sm:$0xff]  ;;  %v586_v22 = vld [vmem:[#allocation8 + $0x58] sm:$0xff]  ;;  %s5206_s11 = scalar_lea.vmem %s6870_s25, 4096  ;;  %s5307_s18 = smov [#allocation14]  }
  0xa9   : > { %4558 = vmatprep.subr.bf16.mxu1 %v4557_v5  ;;  %v473_v14 = vmul.f32 %v5630_v10, %v435_v13  ;;  %v583_v17 = vld [vmem:[#allocation8 + $0x40] sm:$0xff]  ;;  %v4573_v23 = vpack.c.bf16 %v586_v22, %v585_v21  ;;  %v588_v25 = vld [vmem:[#allocation8 + $0x68] sm:$0xff]  ;;  %v437_v27 = vld [vmem:[%s5613_s28 + $0x10] sm:$0xff]  ;;  %v6941_v22 = vmov 0.0|0.0   ;;  %p5207_p8 = scmp.ne.s32.totalorder %s6870_s25, %s5206_s11  ;;  %s5210_s26 = sshll.u32 %s5307_s18, 4  ;;  %s5211_s26 = int_to_ptr.vmem [resolvable:$false] %s5210_s26 }
  0xaa   : > { %v4569_v20 = vpack.c.bf16 %v584_v18, %v583_v17  ;;  %v587_v24 = vld [vmem:[#allocation8 + $0x60] sm:$0xff]  ;;  %v436_v26 = vld [vmem:[%s5613_s28 + $0x8] sm:$0xff]  ;;  %v458_v28 = vld [vmem:[%s5613_s28 + $0xb8] sm:$0xff]  ;;  %v475_v35 = vmul.f32 %v5630_v10, %v437_v27  ;;  %p5213_p3 = scmp.lt.s32.totalorder %s6870_s25, %s5211_s26 }
  0xab   : > { %v511_v16 = vadd.f32 %v5635_v12, %v473_v14  ;;  %v589_v29 = vld [vmem:[#allocation8 + $0x70] sm:$0xff]  ;;  %v4577_v30 = vpack.c.bf16 %v588_v25, %v587_v24  ;;  %v590_v31 = vld [vmem:[#allocation8 + $0x78] sm:$0xff]  ;;  %v474_v32 = vmul.f32 %v5630_v10, %v436_v26  ;;  %v439_v34 = vld [vmem:[%s5613_s28 + $0x20] sm:$0xff]  ;;  %v496_v36 = vmul.f32 %v5630_v10, %v458_v28  ;;  %p5208_p6 = pnand %p5207_p8, %p5549_p5 }
  0xac   : > { %4560 = vmatpush3.bf16.msra.mxu1 %v4557_v5  ;;  %v438_v33 = vld [vmem:[%s5613_s28 + $0x18] sm:$0xff]  ;;  %v459_v37 = vld [vmem:[%s5613_s28 + $0xc0] sm:$0xff]  ;;  %v460_v38 = vld [vmem:[%s5613_s28 + $0xc8] sm:$0xff]  ;;  %v4581_v43 = vpack.c.bf16 %v590_v31, %v589_v29  ;;  %v477_v45 = vmul.f32 %v5630_v10, %v439_v34  ;;  %v513_v53 = vadd.f32 %v5635_v12, %v475_v35  ;;  %s3784_s10 = sshll.u32 %s6987_s15, 12 }
  0xad   : > { %4562 = vmatprep.subr.bf16.mxu1 %v4561_v8  ;;  %v543_v19 = vmax.f32 %v511_v16, 0.0  ;;  %v461_v39 = vld [vmem:[%s5613_s28 + $0xd0] sm:$0xff]  ;;  %v462_v40 = vld [vmem:[%s5613_s28 + $0xd8] sm:$0xff]  ;;  %v463_v41 = vld [vmem:[%s5613_s28 + $0xe0] sm:$0xff]  ;;  %v476_v44 = vmul.f32 %v5630_v10, %v438_v33  ;;  %v5657_v46 = vadd.f32 %v5635_v12, %v496_v36  ;;  %v512_v48 = vadd.f32 %v5635_v12, %v474_v32  ;;  %s6868_s24 = scalar_lea.hbm %s6988_s22, %s3784_s10  ;;  %p5209_p10 = pneg %p5208_p6 }
  0xae   : > { %v464_v42 = vld [vmem:[%s5613_s28 + $0xe8] sm:$0xff]  ;;  %v465_v47 = vld [vmem:[%s5613_s28 + $0xf0] sm:$0xff]  ;;  %v497_v49 = vmul.f32 %v5630_v10, %v459_v37  ;;  %v498_v50 = vmul.f32 %v5630_v10, %v460_v38  ;;  %v499_v51 = vmul.f32 %v5630_v10, %v461_v39  ;;  %v466_v52 = vld [vmem:[%s5613_s28 + $0xf8] sm:$0xff]  ;;  %v500_v54 = vmul.f32 %v5630_v10, %v462_v40 }
  0xaf   : > { %4105 = vmatprep.mubr.f32.mxu1 %v543_v19  ;;  %v501_v55 = vmul.f32 %v5630_v10, %v463_v41  ;;  %v502_v56 = vmul.f32 %v5630_v10, %v464_v42  ;;  %v503_v60 = vmul.f32 %v5630_v10, %v465_v47  ;;  %v440_v61 = vld [vmem:[%s5613_s28 + $0x28] sm:$0xff]  ;;  %v504_v1 = vmul.f32 %v5630_v10, %v466_v52  ;;  %v441_v2 = vld [vmem:[%s5613_s28 + $0x30] sm:$0xff]  ;;  %v1439_v4 = vld [vmem:[#allocation10 + $0x180] sm:$0xff] }
  0xb0   : > { %4564 = vmatpush3.bf16.msra.mxu1 %v4561_v8  ;;  %v5670_v57 = vadd.f32 %v5635_v12, %v497_v49  ;;  %v5673_v58 = vadd.f32 %v5635_v12, %v498_v50  ;;  %v5676_v59 = vadd.f32 %v5635_v12, %v499_v51  ;;  %v5681_v62 = vadd.f32 %v5635_v12, %v500_v54  ;;  %v1440_v5 = vld [vmem:[#allocation10 + $0x188] sm:$0xff]  ;;  %v1471_v7 = vld [vmem:[#allocation10 + $0x280] sm:$0xff]  ;;  %v1473_v14 = vld [vmem:[#allocation10 + $0x290] sm:$0xff] }
  0xb1   : > { %4566 = vmatprep.subr.bf16.mxu1 %v4565_v15  ;;  %v5684_v63 = vadd.f32 %v5635_v12, %v501_v55  ;;  %v5687_v0 = vadd.f32 %v5635_v12, %v502_v56  ;;  %v5692_v3 = vadd.f32 %v5635_v12, %v503_v60  ;;  %v5695_v6 = vadd.f32 %v5635_v12, %v504_v1  ;;  %v1472_v8 = vld [vmem:[#allocation10 + $0x288] sm:$0xff]  ;;  %v442_v19 = vld [vmem:[%s5613_s28 + $0x38] sm:$0xff]  ;;  %v443_v21 = vld [vmem:[%s5613_s28 + $0x40] sm:$0xff] }
  0xb2   : > { %v544_v9 = vmax.f32 %v512_v48, 0.0  ;;  %v514_v11 = vadd.f32 %v5635_v12, %v476_v44  ;;  %v478_v13 = vmul.f32 %v5630_v10, %v440_v61  ;;  %v545_v16 = vmax.f32 %v513_v53, 0.0  ;;  %v1442_v24 = vld [vmem:[#allocation10 + $0x198] sm:$0xff]  ;;  %v1476_v31 = vld [vmem:[#allocation10 + $0x2a8] sm:$0xff]  ;;  %v445_v37 = vld [vmem:[%s5613_s28 + $0x50] sm:$0xff] }
  0xb3   : > { %v515_v17 = vadd.f32 %v5635_v12, %v477_v45  ;;  %v479_v18 = vmul.f32 %v5630_v10, %v441_v2  ;;  %v4633_v25 = vpack.c.bf16 %v1472_v8, %v1471_v7  ;;  %v480_v29 = vmul.f32 %v5630_v10, %v442_v19  ;;  %v444_v35 = vld [vmem:[%s5613_s28 + $0x48] sm:$0xff]  ;;  %v1443_v38 = vld [vmem:[#allocation10 + $0x1a0] sm:$0xff]  ;;  %v1477_v44 = vld [vmem:[#allocation10 + $0x2b0] sm:$0xff] }
  0xb4   : > { %4568 = vmatpush3.bf16.msra.mxu1 %v4565_v15  ;;  %v1474_v15 = vld [vmem:[#allocation10 + $0x298] sm:$0xff]  ;;  %v546_v27 = vmax.f32 %v514_v11, 0.0  ;;  %v516_v28 = vadd.f32 %v5635_v12, %v478_v13  ;;  %v481_v34 = vmul.f32 %v5630_v10, %v443_v21  ;;  %v1444_v39 = vld [vmem:[#allocation10 + $0x1a8] sm:$0xff]  ;;  %v483_v49 = vmul.f32 %v5630_v10, %v445_v37  ;;  %v447_v52 = vld [vmem:[%s5613_s28 + $0x60] sm:$0xff] }
  0xb5   : > { %4570 = vmatprep.subr.bf16.mxu1 %v4569_v20  ;;  %v4637_v26 = vpack.c.bf16 %v1474_v15, %v1473_v14  ;;  %4634 = vmatprep.subr.bf16.mxu0 %v4633_v25  ;;  %v547_v32 = vmax.f32 %v515_v17, 0.0  ;;  %v517_v33 = vadd.f32 %v5635_v12, %v479_v18  ;;  %v518_v42 = vadd.f32 %v5635_v12, %v480_v29  ;;  %v1478_v45 = vld [vmem:[#allocation10 + $0x2b8] sm:$0xff]  ;;  %v1445_v53 = vld [vmem:[#allocation10 + $0x1b0] sm:$0xff]  ;;  %v1448_v11 = vld [vmem:[#allocation10 + $0x1c8] sm:$0xff] }
  0xb6   : > { %4636 = vmatpush3.bf16.msra.mxu0 %v4633_v25  ;;  %v548_v41 = vmax.f32 %v516_v28, 0.0  ;;  %v519_v48 = vadd.f32 %v5635_v12, %v481_v34  ;;  %v446_v50 = vld [vmem:[%s5613_s28 + $0x58] sm:$0xff]  ;;  %v4592_v51 = vpack.c.bf16 %v1444_v39, %v1443_v38  ;;  %v4645_v55 = vpack.c.bf16 %v1478_v45, %v1477_v44  ;;  %v449_v8 = vld [vmem:[%s5613_s28 + $0x70] sm:$0xff]  ;;  %v451_v21 = vld [vmem:[%s5613_s28 + $0x80] sm:$0xff] }
  0xb7   : > { %4638 = vmatprep.subr.bf16.mxu0 %v4637_v26  ;;  %v549_v47 = vmax.f32 %v517_v33, 0.0  ;;  %v1446_v54 = vld [vmem:[#allocation10 + $0x1b8] sm:$0xff]  ;;  %v550_v56 = vmax.f32 %v518_v42, 0.0  ;;  %v484_v61 = vmul.f32 %v5630_v10, %v446_v50  ;;  %v521_v2 = vadd.f32 %v5635_v12, %v483_v49  ;;  %v453_v33 = vld [vmem:[%s5613_s28 + $0x90] sm:$0xff]  ;;  %v1451_v34 = vld [vmem:[#allocation10 + $0x1e0] sm:$0xff] }
  0xb8   : > { %4572 = vmatpush3.bf16.msra.mxu1 %v4569_v20  ;;  %v4586_v20 = vpack.c.bf16 %v1440_v5, %v1439_v4  ;;  %v551_v1 = vmax.f32 %v519_v48, 0.0  ;;  %v485_v4 = vmul.f32 %v5630_v10, %v447_v52  ;;  %v448_v5 = vld [vmem:[%s5613_s28 + $0x68] sm:$0xff]  ;;  %v4595_v7 = vpack.c.bf16 %v1446_v54, %v1445_v53  ;;  %v450_v19 = vld [vmem:[%s5613_s28 + $0x78] sm:$0xff]  ;;  %v455_v44 = vld [vmem:[%s5613_s28 + $0xa0] sm:$0xff] }
  0xb9   : > { %4574 = vmatprep.subr.bf16.mxu1 %v4573_v23  ;;  %v522_v14 = vadd.f32 %v5635_v12, %v484_v61  ;;  %v486_v15 = vmul.f32 %v5630_v10, %v448_v5  ;;  %v487_v18 = vmul.f32 %v5630_v10, %v449_v8  ;;  %v454_v42 = vld [vmem:[%s5613_s28 + $0x98] sm:$0xff]  ;;  %v1453_v45 = vld [vmem:[#allocation10 + $0x1f0] sm:$0xff]  ;;  %v493_v53 = vmul.f32 %v5630_v10, %v455_v44  ;;  %v456_v54 = vld [vmem:[%s5613_s28 + $0xa8] sm:$0xff] }
  0xba   : > { %4640 = vmatpush3.bf16.msra.mxu0 %v4637_v26  ;;  %v523_v17 = vadd.f32 %v5635_v12, %v485_v4  ;;  %v492_v50 = vmul.f32 %v5630_v10, %v454_v42  ;;  %v1456_v61 = vld [vmem:[#allocation10 + $0x208] sm:$0xff]  ;;  %v494_v4 = vmul.f32 %v5630_v10, %v456_v54  ;;  %v5306_v44 = vmov 0.0  }
  0xbb   : > { %v554_v25 = vmax.f32 %v522_v14, 0.0  ;;  %v524_v26 = vadd.f32 %v5635_v12, %v486_v15  ;;  %v525_v29 = vadd.f32 %v5635_v12, %v487_v18  ;;  %v1468_v42 = vld [vmem:[#allocation10 + $0x268] sm:$0xff]  ;;  %1146 = vst [vmem:[#allocation2 + $0x30] sm:$0x1] %v5306_v44  ;;  %1147 = vst [vmem:[#allocation2 + $0x60] sm:$0x1] %v5306_v44 }
  0xbc   : > { %4576 = vmatpush3.bf16.msra.mxu1 %v4573_v23  ;;  %v1441_v23 = vld [vmem:[#allocation10 + $0x190] sm:$0xff]  ;;  %v555_v28 = vmax.f32 %v523_v17, 0.0  ;;  %v532_v15 = vadd.f32 %v5635_v12, %v494_v4  ;;  %1148 = vst [vmem:[#allocation2 + $0x90] sm:$0x1] %v5306_v44  ;;  %1149 = vst [vmem:[#allocation2 + $0xc0] sm:$0x1] %v5306_v44 }
  0xbd   : > { %4578 = vmatprep.subr.bf16.mxu1 %v4577_v30  ;;  %v4589_v36 = vpack.c.bf16 %v1442_v24, %v1441_v23  ;;  %v1449_v23 = vld [vmem:[#allocation10 + $0x1d0] sm:$0xff]  ;;  %v1450_v24 = vld [vmem:[#allocation10 + $0x1d8] sm:$0xff]  ;;  %v557_v39 = vmax.f32 %v525_v29, 0.0  ;;  %v569_v29 = vmax.f32 %v5676_v59, 0.0  ;;  %v1479_v59 = vld [vmem:[#allocation10 + $0x2c0] sm:$0xff]  ;;  %1186 = vst [vmem:[#allocation2 + $0x8] sm:$0xff] %v5306_v44 }
  0xbe   : > { %1150 = vst [vmem:[#allocation2 + $0xf0] sm:$0x1] %v5306_v44  ;;  %1151 = vst [vmem:[#allocation2 + $0x120] sm:$0x1] %v5306_v44 }
  0xbf   : > { %1152 = vst [vmem:[#allocation2 + $0x150] sm:$0x1] %v5306_v44  ;;  %1153 = vst [vmem:[#allocation2 + $0x180] sm:$0x1] %v5306_v44 }
  0xc0   : > { %4580 = vmatpush3.bf16.msra.mxu1 %v4577_v30  ;;  %v1475_v30 = vld [vmem:[#allocation10 + $0x2a0] sm:$0xff]  ;;  %1154 = vst [vmem:[#allocation2 + $0x1b0] sm:$0x1] %v5306_v44  ;;  %1155 = vst [vmem:[#allocation2 + $0x1e0] sm:$0x1] %v5306_v44 }
  0xc1   : > { %4582 = vmatprep.subr.bf16.mxu1 %v4581_v43  ;;  %v4641_v40 = vpack.c.bf16 %v1476_v31, %v1475_v30  ;;  %v489_v30 = vmul.f32 %v5630_v10, %v451_v21  ;;  %v452_v31 = vld [vmem:[%s5613_s28 + $0x88] sm:$0xff]  ;;  %1156 = vst [vmem:[#allocation2 + $0x210] sm:$0x1] %v5306_v44  ;;  %1157 = vst [vmem:[#allocation2 + $0x240] sm:$0x1] %v5306_v44 }
  0xc2   : > { %v490_v38 = vmul.f32 %v5630_v10, %v452_v31  ;;  %v573_v31 = vmax.f32 %v5692_v3, 0.0  ;;  %v1465_v3 = vld [vmem:[#allocation10 + $0x250] sm:$0xff]  ;;  %1158 = vst [vmem:[#allocation2 + $0x270] sm:$0x1] %v5306_v44  ;;  %1159 = vst [vmem:[#allocation2 + $0x2a0] sm:$0x1] %v5306_v44 }
  0xc3   : > { %4642 = vmatprep.subr.bf16.mxu0 %v4641_v40  ;;  %1160 = vst [vmem:[#allocation2 + $0x2d0] sm:$0x1] %v5306_v44  ;;  %1161 = vst [vmem:[#allocation2 + $0x300] sm:$0x1] %v5306_v44 }
  0xc4   : > { %4584 = vmatpush3.bf16.msra.mxu1 %v4581_v43  ;;  %v482_v43 = vmul.f32 %v5630_v10, %v444_v35  ;;  %4644 = vmatpush3.bf16.msra.mxu0 %v4641_v40  ;;  %v1452_v35 = vld [vmem:[#allocation10 + $0x1e8] sm:$0xff]  ;;  %v527_v40 = vadd.f32 %v5635_v12, %v489_v30  ;;  %v528_v49 = vadd.f32 %v5635_v12, %v490_v38  ;;  %v570_v30 = vmax.f32 %v5681_v62, 0.0 }
  0xc5   : > { %4585 = vmatprep.subr.bf16.mxu1 %v6941_v22  ;;  %4646 = vmatprep.subr.bf16.mxu0 %v4645_v55  ;;  %1164 = vst [vmem:[#allocation2 + $0x5f] sm:$0x1] %v5306_v44  ;;  %1165 = vst [vmem:[#allocation2 + $0x8f] sm:$0x1] %v5306_v44 }
  0xc6   : > { %v520_v60 = vadd.f32 %v5635_v12, %v482_v43  ;;  %v4604_v43 = vpack.c.bf16 %v1452_v35, %v1451_v34  ;;  %v1463_v34 = vld [vmem:[#allocation10 + $0x240] sm:$0xff]  ;;  %v1464_v35 = vld [vmem:[#allocation10 + $0x248] sm:$0xff]  ;;  %1166 = vst [vmem:[#allocation2 + $0xbf] sm:$0x1] %v5306_v44  ;;  %1167 = vst [vmem:[#allocation2 + $0xef] sm:$0x1] %v5306_v44 }
  0xc7   : > { %4106 = vmatmul.mubr.f32.vlgmr.msra.gmra.mrb[0].mxu1 %v544_v9  ;;  %v1447_v9 = vld [vmem:[#allocation10 + $0x1c0] sm:$0xff]  ;;  %v4622_v62 = vpack.c.bf16 %v1464_v35, %v1463_v34  ;;  %1168 = vst [vmem:[#allocation2 + $0x11f] sm:$0x1] %v5306_v44  ;;  %1169 = vst [vmem:[#allocation2 + $0x14f] sm:$0x1] %v5306_v44 }
  0xc8   : > { %4108 = vmatprep.mubr.f32.mxu1 %v545_v16  ;;  %4587 = vmatpush1.bf16.msra.mxu1 %v4586_v20  ;;  %v552_v13 = vmax.f32 %v520_v60, 0.0  ;;  %v553_v16 = vmax.f32 %v521_v2, 0.0  ;;  %v4598_v20 = vpack.c.bf16 %v1448_v11, %v1447_v9  ;;  %v1455_v60 = vld [vmem:[#allocation10 + $0x200] sm:$0xff]  ;;  %v530_v2 = vadd.f32 %v5635_v12, %v492_v50  ;;  %v1457_v11 = vld [vmem:[#allocation10 + $0x210] sm:$0xff]  ;;  %1170 = vst [vmem:[#allocation2 + $0x17f] sm:$0x1] %v5306_v44 }
  0xc9   : > { %4588 = vmatprep.subr.bf16.mxu1 %v6941_v22  ;;  %4648 = vmatpush3.bf16.msra.mxu0 %v4645_v55  ;;  %v4610_v9 = vpack.c.bf16 %v1456_v61, %v1455_v60  ;;  %1171 = vst [vmem:[#allocation2 + $0x1af] sm:$0x1] %v5306_v44  ;;  %1172 = vst [vmem:[#allocation2 + $0x1df] sm:$0x1] %v5306_v44  ;;  %v1470_v50 = vld [vmem:[#allocation10 + $0x278] sm:$0xff] }
  0xca   : > { %v562_v14 = vmax.f32 %v530_v2, 0.0  ;;  %1173 = vst [vmem:[#allocation2 + $0x20f] sm:$0x1] %v5306_v44  ;;  %1174 = vst [vmem:[#allocation2 + $0x23f] sm:$0x1] %v5306_v44 }
  0xcb   : > { %4109 = vmatmul.mubr.f32.gmra.mrb[2].mxu1 %v546_v27  ;;  %v488_v27 = vmul.f32 %v5630_v10, %v450_v19  ;;  %v1459_v19 = vld [vmem:[#allocation10 + $0x220] sm:$0xff]  ;;  %1175 = vst [vmem:[#allocation2 + $0x26f] sm:$0x1] %v5306_v44  ;;  %1176 = vst [vmem:[#allocation2 + $0x29f] sm:$0x1] %v5306_v44 }
  0xcc   : > { %4111 = vmatprep.mubr.f32.mxu1 %v547_v32  ;;  %4590 = vmatpush1.bf16.msra.mxu1 %v4589_v36  ;;  %v4601_v32 = vpack.c.bf16 %v1450_v24, %v1449_v23  ;;  %v556_v36 = vmax.f32 %v524_v26, 0.0  ;;  %v1461_v24 = vld [vmem:[#allocation10 + $0x230] sm:$0xff]  ;;  %v566_v26 = vmax.f32 %v5657_v46, 0.0  ;;  %v571_v46 = vmax.f32 %v5684_v63, 0.0  ;;  %1177 = vst [vmem:[#allocation2 + $0x2cf] sm:$0x1] %v5306_v44 }
  0xcd   : > { %4591 = vmatprep.subr.bf16.mxu1 %v6941_v22  ;;  %v526_v37 = vadd.f32 %v5635_v12, %v488_v27  ;;  %v1481_v63 = vld [vmem:[#allocation10 + $0x2d0] sm:$0xff]  ;;  %1178 = vst [vmem:[#allocation2 + $0x2ff] sm:$0x1] %v5306_v44  ;;  %1179 = vst [vmem:[#allocation2 + $0x32f] sm:$0x1] %v5306_v44 }
  0xcf   : > { %4112 = vmatmul.mubr.f32.gmra.mrb[4].mxu1 %v548_v41  ;;  %v491_v41 = vmul.f32 %v5630_v10, %v453_v33  ;;  %v558_v48 = vmax.f32 %v526_v37, 0.0  ;;  %v1466_v37 = vld [vmem:[#allocation10 + $0x258] sm:$0xff] }
  0xd0   : > { %4114 = vmatprep.mubr.f32.mxu1 %v549_v47  ;;  %4593 = vmatpush1.bf16.msra.mxu1 %v4592_v51  ;;  %v1454_v47 = vld [vmem:[#allocation10 + $0x1f8] sm:$0xff]  ;;  %v559_v51 = vmax.f32 %v527_v40, 0.0  ;;  %v4625_v38 = vpack.c.bf16 %v1466_v37, %v1465_v3 }
  0xd1   : > { %4594 = vmatprep.subr.bf16.mxu1 %v6941_v22  ;;  %v529_v52 = vadd.f32 %v5635_v12, %v491_v41  ;;  %v4607_v55 = vpack.c.bf16 %v1454_v47, %v1453_v45  ;;  %v1467_v41 = vld [vmem:[#allocation10 + $0x260] sm:$0xff]  ;;  %v1485_v45 = vld [vmem:[#allocation10 + $0x2f0] sm:$0xff]  ;;  %v1486_v47 = vld [vmem:[#allocation10 + $0x2f8] sm:$0xff] }
  0xd3   : > { %4115 = vmatmul.mubr.f32.gmra.mrb[6].mxu1 %v550_v56  ;;  %v457_v56 = vld [vmem:[%s5613_s28 + $0xb0] sm:$0xff]  ;;  %v561_v5 = vmax.f32 %v529_v52, 0.0  ;;  %v1326_v52 = vld [vmem:[#allocation10 + $0x100] sm:$0xff] }
  0xd4   : > { %4117 = vmatprep.mubr.f32.mxu1 %v551_v1  ;;  %4596 = vmatpush1.bf16.msra.mxu1 %v4595_v7  ;;  %v560_v1 = vmax.f32 %v528_v49, 0.0  ;;  %v531_v7 = vadd.f32 %v5635_v12, %v493_v53  ;;  %v495_v8 = vmul.f32 %v5630_v10, %v457_v56  ;;  %v1460_v10 = vld [vmem:[#allocation10 + $0x228] sm:$0xff]  ;;  %v1469_v49 = vld [vmem:[#allocation10 + $0x270] sm:$0xff] }
  0xd5   : > { %4597 = vmatprep.subr.bf16.mxu1 %v6941_v22  ;;  %v4616_v23 = vpack.c.bf16 %v1460_v10, %v1459_v19  ;;  %v1327_v53 = vld [vmem:[#allocation10 + $0x108] sm:$0xff] }
  0xd6   : > { %v533_v17 = vadd.f32 %v5635_v12, %v495_v8  ;;  %v567_v12 = vmax.f32 %v5670_v57, 0.0  ;;  %v572_v57 = vmax.f32 %v5687_v0, 0.0  ;;  %v5777_v54 = vpack.c.bf16 %v1327_v53, %v1326_v52  ;;  %v1298_v53 = vld [vmem:[#allocation10 + $0x20] sm:$0xff] }
  0xd7   : > { %4118 = vmatmul.mubr.f32.gmra.mrb[8].mxu1 %v552_v13  ;;  %v1458_v13 = vld [vmem:[#allocation10 + $0x218] sm:$0xff] }
  0xd8   : > { %4120 = vmatprep.mubr.f32.mxu1 %v553_v16  ;;  %4599 = vmatpush1.bf16.msra.mxu1 %v4598_v20  ;;  %v563_v16 = vmax.f32 %v531_v7, 0.0  ;;  %v4613_v18 = vpack.c.bf16 %v1458_v13, %v1457_v11  ;;  %v564_v20 = vmax.f32 %v532_v15, 0.0  ;;  %v565_v21 = vmax.f32 %v533_v17, 0.0 }
  0xd9   : > { %4600 = vmatprep.subr.bf16.mxu1 %v6941_v22 }
  0xdb   : > { %4121 = vmatmul.mubr.f32.gmra.mrb[10].mxu1 %v554_v25  ;;  %v1462_v25 = vld [vmem:[#allocation10 + $0x238] sm:$0xff] }
  0xdc   : > { %4123 = vmatprep.mubr.f32.mxu1 %v555_v28  ;;  %4602 = vmatpush1.bf16.msra.mxu1 %v4601_v32  ;;  %v4619_v27 = vpack.c.bf16 %v1462_v25, %v1461_v24  ;;  %v568_v28 = vmax.f32 %v5673_v58, 0.0  ;;  %v574_v58 = vmax.f32 %v5695_v6, 0.0  ;;  %v1480_v32 = vld [vmem:[#allocation10 + $0x2c8] sm:$0xff]  ;;  %v1483_v6 = vld [vmem:[#allocation10 + $0x2e0] sm:$0xff] }
  0xdd   : > { %4603 = vmatprep.subr.bf16.mxu1 %v6941_v22  ;;  %v4649_v33 = vpack.c.bf16 %v1480_v32, %v1479_v59  ;;  %v1294_v25 = vld [vmem:[#allocation10] sm:$0xff]  ;;  %v1328_v59 = vld [vmem:[#allocation10 + $0x110] sm:$0xff]  ;;  %v1329_v32 = vld [vmem:[#allocation10 + $0x118] sm:$0xff] }
  0xdf   : > { %4124 = vmatmul.mubr.f32.gmra.mrb[12].mxu1 %v556_v36  ;;  %4650 = vmatprep.subr.bf16.mxu0 %v4649_v33  ;;  %v1482_v36 = vld [vmem:[#allocation10 + $0x2d8] sm:$0xff] }
  0xe0   : > { %4126 = vmatprep.mubr.f32.mxu1 %v557_v39  ;;  %4605 = vmatpush1.bf16.msra.mxu1 %v4604_v43  ;;  %v4653_v0 = vpack.c.bf16 %v1482_v36, %v1481_v63  ;;  %v1484_v39 = vld [vmem:[#allocation10 + $0x2e8] sm:$0xff]  ;;  %v4628_v43 = vpack.c.bf16 %v1468_v42, %v1467_v41  ;;  %v1296_v63 = vld [vmem:[#allocation10 + $0x10] sm:$0xff]  ;;  %v1297_v36 = vld [vmem:[#allocation10 + $0x18] sm:$0xff] }
  0xe1   : > { %4606 = vmatprep.subr.bf16.mxu1 %v6941_v22  ;;  %4652 = vmatpush3.bf16.msra.mxu0 %v4649_v33  ;;  %v4657_v40 = vpack.c.bf16 %v1484_v39, %v1483_v6 }
  0xe2   : > { %4654 = vmatprep.subr.bf16.mxu0 %v4653_v0 }
  0xe3   : > { %4127 = vmatmul.mubr.f32.gmra.mrb[14].mxu1 %v558_v48  ;;  %v4661_v48 = vpack.c.bf16 %v1486_v47, %v1485_v45  ;;  %v4669_v45 = vpack.c.bf16 %v1297_v36, %v1296_v63  ;;  %v1330_v47 = vld [vmem:[#allocation10 + $0x120] sm:$0xff] }
  0xe4   : > { %4129 = vmatprep.mubr.f32.mxu1 %v559_v51  ;;  %4608 = vmatpush1.bf16.msra.mxu1 %v4607_v55  ;;  %v4631_v51 = vpack.c.bf16 %v1470_v50, %v1469_v49  ;;  %v5783_v55 = vld [vmem:[%s6968_s30] ss:$0 sm:$0xff]  ;;  %s5212_s30 = scalar_lea.vmem %s5211_s26, 8192 }
  0xe5   : > { %4609 = vmatprep.subr.bf16.mxu1 %v6941_v22  ;;  %4656 = vmatpush3.bf16.msra.mxu0 %v4653_v0  ;;  %v1302_v36 = vld [vmem:[#allocation10 + $0x40] sm:$0xff]  ;;  %p5214_p7 = scmp.lt.s32.totalorder %s5212_s30, %s5206_s11 }
  0xe6   : > { %4658 = vmatprep.subr.bf16.mxu0 %v4657_v40 }
  0xe7   : > { %4130 = vmatmul.mubr.f32.gmra.mrb[16].mxu1 %v560_v1  ;;  %p5215_p9 = por %p5214_p7, %p5213_p3 }
  0xe8   : > { %4132 = vmatprep.mubr.f32.mxu1 %v561_v5  ;;  %4611 = vmatpush1.bf16.msra.mxu1 %v4610_v9 }
  0xe9   : > { %4612 = vmatprep.subr.bf16.mxu1 %v6941_v22  ;;  %4660 = vmatpush3.bf16.msra.mxu0 %v4657_v40  ;;  %v4717_v40 = vpack.c.bf16 %v1329_v32, %v1328_v59  ;;  %v1334_v32 = vld [vmem:[#allocation10 + $0x140] sm:$0xff]  ;;  %p5216_p0 = pnand %p5215_p9, %p5209_p10 }
  0xea   : > { %4662 = vmatprep.subr.bf16.mxu0 %v4661_v48 }
  0xeb   : > { %4133 = vmatmul.mubr.f32.gmra.mrb[18].mxu1 %v562_v14 }
  0xec   : > { %4135 = vmatprep.mubr.f32.mxu1 %v563_v16  ;;  %4614 = vmatpush1.bf16.msra.mxu1 %v4613_v18 }
  0xed   : > { %4615 = vmatprep.subr.bf16.mxu1 %v6941_v22  ;;  %4664 = vmatpush3.bf16.msra.mxu0 %v4661_v48  ;;  %v1331_v48 = vld [vmem:[#allocation10 + $0x128] sm:$0xff] }
  0xee   : > { %4665 = vmatprep.subr.bf16.mxu0 %v6941_v22 }
  0xef   : > { %4136 = vmatmul.mubr.f32.gmra.mrb[20].mxu1 %v564_v20 }
  0xf0   : > { %4138 = vmatprep.mubr.f32.mxu1 %v565_v21  ;;  %4617 = vmatpush1.bf16.msra.mxu1 %v4616_v23 }
  0xf1   : > { %4618 = vmatprep.subr.bf16.mxu1 %v6941_v22 }
  0xf3   : > { %4139 = vmatmul.mubr.f32.gmra.mrb[22].mxu1 %v566_v26  ;;  %v1295_v26 = vld [vmem:[#allocation10 + $0x8] sm:$0xff] }
  0xf4   : > { %4141 = vmatprep.mubr.f32.mxu1 %v567_v12  ;;  %4620 = vmatpush1.bf16.msra.mxu1 %v4619_v27 }
  0xf5   : > { %4621 = vmatprep.subr.bf16.mxu1 %v6941_v22 }
  0xf7   : > { %4142 = vmatmul.mubr.f32.gmra.mrb[24].mxu1 %v568_v28 }
  0xf8   : > { %4144 = vmatprep.mubr.f32.mxu1 %v569_v29  ;;  %4623 = vmatpush1.bf16.msra.mxu1 %v4622_v62 }
  0xf9   : > { %4624 = vmatprep.subr.bf16.mxu1 %v6941_v22 }
  0xfb   : > { %4145 = vmatmul.mubr.f32.gmra.mrb[26].mxu1 %v570_v30 }
  0xfc   : > { %4147 = vmatprep.mubr.f32.mxu1 %v571_v46  ;;  %4626 = vmatpush1.bf16.msra.mxu1 %v4625_v38 }
  0xfd   : > { %4627 = vmatprep.subr.bf16.mxu1 %v6941_v22 }
  0xff   : > { %4148 = vmatmul.mubr.f32.gmra.mrb[28].mxu1 %v572_v57 }
 0x100   : > { %4150 = vmatprep.mubr.f32.mxu1 %v573_v31  ;;  %4629 = vmatpush1.bf16.msra.mxu1 %v4628_v43 }
 0x101   : > { %4630 = vmatprep.subr.bf16.mxu1 %v6941_v22 }
 0x103   : > { %4151 = vmatmul.mubr.f32.gmra.mrb[30].mxu1 %v574_v58  ;;  %v4666_v58 = vpack.c.bf16 %v1295_v26, %v1294_v25 }
 0x104   : > { %4632 = vmatpush1.bf16.msra.mxu1 %v4631_v51 }
 0x105   : > { %4714 = vmatprep.subr.bf16.mxu1 %v5777_v54 }
 0x19a   : > { %v4107_v56 = vpop.f32.mrb[0].mxu1 }
 0x19b   : > { %v669_v60 = vadd.f32 %v4107_v56, %v5783_v55  ;;  %v663_v61 = vpop.f32.mrb[1].mxu1  ;;  %v1299_v56 = vld [vmem:[#allocation10 + $0x28] sm:$0xff] }
 0x19c   : > { %v664_v1 = vadd.f32 %v5783_v55, %v663_v61 }
 0x19d   : > { %v5787_v2 = vmax.f32 %v669_v60, 0.0 }
 0x19e   : > { %v822_v4 = vmax.f32 %v664_v1, 0.0  ;;  %v4110_v5 = vpop.f32.mrb[2].mxu1 }
 0x19f   : > { %856 = vst [vmem:[#allocation2 + $0x50] sm:$0xff] %v5787_v2  ;;  %v921_v7 = vrot.slane %v5787_v2, 7  ;;  %v1034_v8 = vrot.slane %v5787_v2, 1  ;;  %v679_v9 = vadd.f32 %v4110_v5, %v5783_v55  ;;  %v673_v11 = vpop.f32.mrb[3].mxu1 }
 0x1a0   : > { %855 = vst [vmem:[#allocation2 + $0x38] sm:$0xff] %v822_v4  ;;  %v920_v13 = vrot.slane %v822_v4, 7  ;;  %v1033_v14 = vrot.slane %v822_v4, 1  ;;  %v674_v15 = vadd.f32 %v5783_v55, %v673_v11  ;;  %1551 = vmatprep.mubr.f32.mxu1 %v822_v4  ;;  %v4672_v11 = vpack.c.bf16 %v1299_v56, %v1298_v53 }
 0x1a1   : > { %1114 = vst [vmem:[#allocation2 + $0x58] sm:$0x7f] %v1034_v8  ;;  %v5794_v16 = vmax.f32 %v679_v9, 0.0 }
 0x1a2   : > { %v5797_v17 = vsel %vm919_vm0, %v920_v13, %v921_v7  ;;  %1000 = vst [vmem:[#allocation2 + $0x30] sm:$0xfe] %v920_v13  ;;  %v1035_v18 = vsel %vm1032_vm1, %v1033_v14, %v1034_v8  ;;  %v5800_v19 = vmax.f32 %v674_v15, 0.0  ;;  %v4113_v10 = vpop.f32.mrb[4].mxu1  ;;  %v1332_v13 = vld [vmem:[#allocation10 + $0x130] sm:$0xff]  ;;  %v1333_v14 = vld [vmem:[#allocation10 + $0x138] sm:$0xff] }
 0x1a3   : > { %1001 = vst [vmem:[#allocation2 + $0x48] sm:$0xff] %v5797_v17  ;;  %1113 = vst [vmem:[#allocation2 + $0x40] sm:$0xff] %v1035_v18  ;;  %v924_v20 = vrot.slane %v5794_v16, 7  ;;  %v1037_v21 = vrot.slane %v5794_v16, 1  ;;  %v689_v23 = vadd.f32 %v4113_v10, %v5783_v55  ;;  %v683_v24 = vpop.f32.mrb[5].mxu1  ;;  %4185 = vmatprep.mubr.f32.mxu0 %v1035_v18 }
 0x1a4   : > { %858 = vst [vmem:[#allocation2 + $0x80] sm:$0xff] %v5794_v16  ;;  %857 = vst [vmem:[#allocation2 + $0x68] sm:$0xff] %v5800_v19  ;;  %v923_v12 = vrot.slane %v5800_v19, 7  ;;  %v1036_v27 = vrot.slane %v5800_v19, 1  ;;  %v684_v28 = vadd.f32 %v5783_v55, %v683_v24 }
 0x1a5   : > { %1116 = vst [vmem:[#allocation2 + $0x88] sm:$0x7f] %v1037_v21  ;;  %v5811_v29 = vmax.f32 %v689_v23, 0.0  ;;  %v1301_v23 = vld [vmem:[#allocation10 + $0x38] sm:$0xff] }
 0x1a6   : > { %v5814_v30 = vsel %vm919_vm0, %v923_v12, %v924_v20  ;;  %1002 = vst [vmem:[#allocation2 + $0x60] sm:$0xfe] %v923_v12  ;;  %v1038_v46 = vsel %vm1032_vm1, %v1036_v27, %v1037_v21  ;;  %v5817_v57 = vmax.f32 %v684_v28, 0.0  ;;  %v4116_v31 = vpop.f32.mrb[6].mxu1 }
 0x1a7   : > { %1003 = vst [vmem:[#allocation2 + $0x78] sm:$0xff] %v5814_v30  ;;  %1115 = vst [vmem:[#allocation2 + $0x70] sm:$0xff] %v1038_v46  ;;  %v927_v33 = vrot.slane %v5811_v29, 7  ;;  %v1040_v34 = vrot.slane %v5811_v29, 1  ;;  %v699_v35 = vadd.f32 %v4116_v31, %v5783_v55  ;;  %v693_v62 = vpop.f32.mrb[7].mxu1 }
 0x1a8   : > { %860 = vst [vmem:[#allocation2 + $0xb0] sm:$0xff] %v5811_v29  ;;  %859 = vst [vmem:[#allocation2 + $0x98] sm:$0xff] %v5817_v57  ;;  %v926_v0 = vrot.slane %v5817_v57, 7  ;;  %v1039_v3 = vrot.slane %v5817_v57, 1  ;;  %v694_v37 = vadd.f32 %v5783_v55, %v693_v62  ;;  %v1347_v38 = vld [vmem:[#allocation2 + $0x58] sm:$0xff] }
 0x1a9   : > { %1118 = vst [vmem:[#allocation2 + $0xb8] sm:$0x7f] %v1040_v34  ;;  %v5828_v6 = vmax.f32 %v699_v35, 0.0  ;;  %v5830_v39 = vld [vmem:[#allocation2 + $0x30] sm:$0xff]  ;;  %4186 = vmatmul.mubr.f32.vlgmr.msra.gmra.mrb[0].mxu0 %v1347_v38 }
 0x1aa   : > { %v5833_v41 = vsel %vm919_vm0, %v926_v0, %v927_v33  ;;  %1004 = vst [vmem:[#allocation2 + $0x90] sm:$0xfe] %v926_v0  ;;  %v1041_v42 = vsel %vm1032_vm1, %v1039_v3, %v1040_v34  ;;  %v5836_v43 = vmax.f32 %v694_v37, 0.0  ;;  %v4119_v44 = vpop.f32.mrb[8].mxu1  ;;  %1552 = vmatmul.mubr.f32.vlgmr.msra.gmra.mrb[32].mxu1 %v5830_v39  ;;  %4667 = vmatpush1.bf16.msra.mxu0 %v4666_v58  ;;  %v1335_v33 = vld [vmem:[#allocation10 + $0x148] sm:$0xff] }
 0x1ab   : > { %1005 = vst [vmem:[#allocation2 + $0xa8] sm:$0xff] %v5833_v41  ;;  %1117 = vst [vmem:[#allocation2 + $0xa0] sm:$0xff] %v1041_v42  ;;  %v930_v49 = vrot.slane %v5828_v6, 7  ;;  %v1043_v50 = vrot.slane %v5828_v6, 1  ;;  %v709_v51 = vadd.f32 %v4119_v44, %v5783_v55  ;;  %4716 = vmatpush3.bf16.msra.mxu1 %v5777_v54  ;;  %v703_v52 = vpop.f32.mrb[9].mxu1  ;;  %1556 = vmatprep.mubr.f32.mxu1 %v5787_v2  ;;  %v1303_v0 = vld [vmem:[#allocation10 + $0x48] sm:$0xff] }
 0x1ac   : > { %862 = vst [vmem:[#allocation2 + $0xe0] sm:$0xff] %v5828_v6  ;;  %861 = vst [vmem:[#allocation2 + $0xc8] sm:$0xff] %v5836_v43  ;;  %v929_v60 = vrot.slane %v5836_v43, 7  ;;  %v1042_v61 = vrot.slane %v5836_v43, 1  ;;  %v704_v1 = vadd.f32 %v5783_v55, %v703_v52  ;;  %4188 = vmatprep.mubr.f32.mxu0 %v1038_v46  ;;  %v1353_v4 = vld [vmem:[#allocation2 + $0x88] sm:$0xff]  ;;  %4668 = vmatprep.subr.bf16.mxu0 %v6941_v22 }
 0x1ad   : > { %1120 = vst [vmem:[#allocation2 + $0xe8] sm:$0x7f] %v1043_v50  ;;  %v5851_v5 = vmax.f32 %v709_v51, 0.0  ;;  %4189 = vmatmul.mubr.f32.gmra.mrb[2].mxu0 %v1353_v4  ;;  %4718 = vmatprep.subr.bf16.mxu1 %v4717_v40  ;;  %v4721_v54 = vpack.c.bf16 %v1331_v48, %v1330_v47  ;;  %v5866_v21 = vld [vmem:[#allocation2 + $0x60] sm:$0xff]  ;;  %v1337_v51 = vld [vmem:[#allocation10 + $0x158] sm:$0xff] }
 0x1ae   : > { %v5854_v2 = vsel %vm919_vm0, %v929_v60, %v930_v49  ;;  %1006 = vst [vmem:[#allocation2 + $0xc0] sm:$0xfe] %v929_v60  ;;  %v1044_v7 = vsel %vm1032_vm1, %v1042_v61, %v1043_v50  ;;  %v5857_v8 = vmax.f32 %v704_v1, 0.0  ;;  %v4122_v9 = vpop.f32.mrb[10].mxu1  ;;  %1557 = vmatmul.mubr.f32.gmra.mrb[34].mxu1 %v5797_v17  ;;  %4670 = vmatpush1.bf16.msra.mxu0 %v4669_v45  ;;  %v1300_v17 = vld [vmem:[#allocation10 + $0x30] sm:$0xff]  ;;  %v1305_v1 = vld [vmem:[#allocation10 + $0x58] sm:$0xff] }
 0x1af   : > { %1007 = vst [vmem:[#allocation2 + $0xd8] sm:$0xff] %v5854_v2  ;;  %1119 = vst [vmem:[#allocation2 + $0xd0] sm:$0xff] %v1044_v7  ;;  %v933_v15 = vrot.slane %v5851_v5, 7  ;;  %v1046_v18 = vrot.slane %v5851_v5, 1  ;;  %v719_v10 = vadd.f32 %v4122_v9, %v5783_v55  ;;  %v713_v20 = vpop.f32.mrb[11].mxu1  ;;  %1561 = vmatprep.mubr.f32.mxu1 %v5800_v19  ;;  %4191 = vmatprep.mubr.f32.mxu0 %v1041_v42  ;;  %v1336_v50 = vld [vmem:[#allocation10 + $0x150] sm:$0xff] }
 0x1b0   : > { %864 = vst [vmem:[#allocation2 + $0x110] sm:$0xff] %v5851_v5  ;;  %863 = vst [vmem:[#allocation2 + $0xf8] sm:$0xff] %v5857_v8  ;;  %v932_v24 = vrot.slane %v5857_v8, 7  ;;  %v1045_v25 = vrot.slane %v5857_v8, 1  ;;  %v714_v26 = vadd.f32 %v5783_v55, %v713_v20  ;;  %v1359_v12 = vld [vmem:[#allocation2 + $0xb8] sm:$0xff]  ;;  %4671 = vmatprep.subr.bf16.mxu0 %v6941_v22  ;;  %4720 = vmatpush3.bf16.msra.mxu1 %v4717_v40  ;;  %v1338_v20 = vld [vmem:[#allocation10 + $0x160] sm:$0xff] }
 0x1b1   : > { %1122 = vst [vmem:[#allocation2 + $0x118] sm:$0x7f] %v1046_v18  ;;  %v5873_v27 = vmax.f32 %v719_v10, 0.0  ;;  %4192 = vmatmul.mubr.f32.gmra.mrb[4].mxu0 %v1359_v12  ;;  %4722 = vmatprep.subr.bf16.mxu1 %v4721_v54  ;;  %v4725_v19 = vpack.c.bf16 %v1333_v14, %v1332_v13  ;;  %v4675_v59 = vpack.c.bf16 %v1301_v23, %v1300_v17  ;;  %v5908_v61 = vld [vmem:[#allocation2 + $0x90] sm:$0xff]  ;;  %v1339_v17 = vld [vmem:[#allocation10 + $0x168] sm:$0xff]  ;;  %v1306_v12 = vld [vmem:[#allocation10 + $0x60] sm:$0xff] }
 0x1b2   : > { %v5876_v28 = vsel %vm919_vm0, %v932_v24, %v933_v15  ;;  %1008 = vst [vmem:[#allocation2 + $0xf0] sm:$0xfe] %v932_v24  ;;  %v1047_v46 = vsel %vm1032_vm1, %v1045_v25, %v1046_v18  ;;  %v5879_v31 = vmax.f32 %v714_v26, 0.0  ;;  %v4125_v58 = vpop.f32.mrb[12].mxu1  ;;  %1562 = vmatmul.mubr.f32.gmra.mrb[36].mxu1 %v5866_v21  ;;  %4673 = vmatpush1.bf16.msra.mxu0 %v4672_v11 }
 0x1b3   : > { %1009 = vst [vmem:[#allocation2 + $0x108] sm:$0xff] %v5876_v28  ;;  %1121 = vst [vmem:[#allocation2 + $0x100] sm:$0xff] %v1047_v46  ;;  %v936_v34 = vrot.slane %v5873_v27, 7  ;;  %v1049_v35 = vrot.slane %v5873_v27, 1  ;;  %v729_v62 = vadd.f32 %v4125_v58, %v5783_v55  ;;  %v723_v63 = vpop.f32.mrb[13].mxu1  ;;  %1566 = vmatprep.mubr.f32.mxu1 %v5794_v16  ;;  %4194 = vmatprep.mubr.f32.mxu0 %v1044_v7 }
 0x1b4   : > { %866 = vst [vmem:[#allocation2 + $0x140] sm:$0xff] %v5873_v27  ;;  %865 = vst [vmem:[#allocation2 + $0x128] sm:$0xff] %v5879_v31  ;;  %v935_v3 = vrot.slane %v5879_v31, 7  ;;  %v1048_v37 = vrot.slane %v5879_v31, 1  ;;  %v724_v38 = vadd.f32 %v5783_v55, %v723_v63  ;;  %v1365_v40 = vld [vmem:[#allocation2 + $0xe8] sm:$0xff]  ;;  %4674 = vmatprep.subr.bf16.mxu0 %v6941_v22  ;;  %4724 = vmatpush3.bf16.msra.mxu1 %v4721_v54 }
 0x1b5   : > { %1124 = vst [vmem:[#allocation2 + $0x148] sm:$0x7f] %v1049_v35  ;;  %v5893_v42 = vmax.f32 %v729_v62, 0.0  ;;  %4195 = vmatmul.mubr.f32.gmra.mrb[6].mxu0 %v1365_v40  ;;  %4726 = vmatprep.subr.bf16.mxu1 %v4725_v19  ;;  %v4729_v16 = vpack.c.bf16 %v1335_v33, %v1334_v32  ;;  %v4678_v49 = vpack.c.bf16 %v1303_v0, %v1302_v36  ;;  %v1340_v0 = vld [vmem:[#allocation10 + $0x170] sm:$0xff] }
 0x1b6   : > { %v5896_v44 = vsel %vm919_vm0, %v935_v3, %v936_v34  ;;  %1010 = vst [vmem:[#allocation2 + $0x120] sm:$0xfe] %v935_v3  ;;  %v1050_v45 = vsel %vm1032_vm1, %v1048_v37, %v1049_v35  ;;  %v5899_v47 = vmax.f32 %v724_v38, 0.0  ;;  %v4128_v48 = vpop.f32.mrb[14].mxu1  ;;  %1567 = vmatmul.mubr.f32.gmra.mrb[38].mxu1 %v5814_v30  ;;  %4676 = vmatpush1.bf16.msra.mxu0 %v4675_v59  ;;  %v1304_v30 = vld [vmem:[#allocation10 + $0x50] sm:$0xff]  ;;  %v1341_v3 = vld [vmem:[#allocation10 + $0x178] sm:$0xff] }
 0x1b7   : > { %1011 = vst [vmem:[#allocation2 + $0x138] sm:$0xff] %v5896_v44  ;;  %1123 = vst [vmem:[#allocation2 + $0x130] sm:$0xff] %v1050_v45  ;;  %v939_v52 = vrot.slane %v5893_v42, 7  ;;  %v1052_v53 = vrot.slane %v5893_v42, 1  ;;  %v739_v56 = vadd.f32 %v4128_v48, %v5783_v55  ;;  %v733_v60 = vpop.f32.mrb[15].mxu1  ;;  %1571 = vmatprep.mubr.f32.mxu1 %v5817_v57  ;;  %4197 = vmatprep.mubr.f32.mxu0 %v1047_v46  ;;  %v1309_v48 = vld [vmem:[#allocation10 + $0x78] sm:$0xff] }
 0x1b8   : > { %868 = vst [vmem:[#allocation2 + $0x170] sm:$0xff] %v5893_v42  ;;  %867 = vst [vmem:[#allocation2 + $0x158] sm:$0xff] %v5899_v47  ;;  %v938_v4 = vrot.slane %v5899_v47, 7  ;;  %v1051_v54 = vrot.slane %v5899_v47, 1  ;;  %v734_v7 = vadd.f32 %v5783_v55, %v733_v60  ;;  %v5914_v9 = vld [vmem:[#allocation2 + $0x118] sm:$0xff]  ;;  %4677 = vmatprep.subr.bf16.mxu0 %v6941_v22  ;;  %4728 = vmatpush3.bf16.msra.mxu1 %v4725_v19  ;;  %v1307_v19 = vld [vmem:[#allocation10 + $0x68] sm:$0xff] }
 0x1b9   : > { %1126 = vst [vmem:[#allocation2 + $0x178] sm:$0x7f] %v1052_v53  ;;  %v5917_v57 = vmax.f32 %v739_v56, 0.0  ;;  %4198 = vmatmul.mubr.f32.gmra.mrb[8].mxu0 %v5914_v9  ;;  %4730 = vmatprep.subr.bf16.mxu1 %v4729_v16  ;;  %v4733_v11 = vpack.c.bf16 %v1337_v51, %v1336_v50  ;;  %v4681_v10 = vpack.c.bf16 %v1305_v1, %v1304_v30 }
 0x1ba   : > { %v5921_v13 = vsel %vm919_vm0, %v938_v4, %v939_v52  ;;  %1012 = vst [vmem:[#allocation2 + $0x150] sm:$0xfe] %v938_v4  ;;  %v1053_v14 = vsel %vm1032_vm1, %v1051_v54, %v1052_v53  ;;  %v5924_v15 = vmax.f32 %v734_v7, 0.0  ;;  %v4131_v18 = vpop.f32.mrb[16].mxu1  ;;  %1572 = vmatmul.mubr.f32.gmra.mrb[40].mxu1 %v5908_v61  ;;  %4679 = vmatpush1.bf16.msra.mxu0 %v4678_v49 }
 0x1bb   : > { %1013 = vst [vmem:[#allocation2 + $0x168] sm:$0xff] %v5921_v13  ;;  %1125 = vst [vmem:[#allocation2 + $0x160] sm:$0xff] %v1053_v14  ;;  %v942_v23 = vrot.slane %v5917_v57, 7  ;;  %v1055_v24 = vrot.slane %v5917_v57, 1  ;;  %v749_v25 = vadd.f32 %v4131_v18, %v5783_v55  ;;  %v743_v26 = vpop.f32.mrb[17].mxu1  ;;  %1576 = vmatprep.mubr.f32.mxu1 %v5811_v29  ;;  %4200 = vmatprep.mubr.f32.mxu0 %v1050_v45  ;;  %v5956_v45 = vld [vmem:[#allocation2 + $0xc0] sm:$0xff] }
 0x1bc   : > { %870 = vst [vmem:[#allocation2 + $0x1a0] sm:$0xff] %v5917_v57  ;;  %869 = vst [vmem:[#allocation2 + $0x188] sm:$0xff] %v5924_v15  ;;  %v941_v46 = vrot.slane %v5924_v15, 7  ;;  %v1054_v58 = vrot.slane %v5924_v15, 1  ;;  %v744_v59 = vadd.f32 %v5783_v55, %v743_v26  ;;  %v5937_v32 = vld [vmem:[#allocation2 + $0x148] sm:$0xff]  ;;  %4680 = vmatprep.subr.bf16.mxu0 %v6941_v22  ;;  %4732 = vmatpush3.bf16.msra.mxu1 %v4729_v16  ;;  %v1310_v18 = vld [vmem:[#allocation10 + $0x80] sm:$0xff] }
 0x1bd   : > { %1128 = vst [vmem:[#allocation2 + $0x1a8] sm:$0x7f] %v1055_v24  ;;  %v5940_v33 = vmax.f32 %v749_v25, 0.0  ;;  %4201 = vmatmul.mubr.f32.gmra.mrb[10].mxu0 %v5937_v32  ;;  %4734 = vmatprep.subr.bf16.mxu1 %v4733_v11  ;;  %v4737_v29 = vpack.c.bf16 %v1339_v17, %v1338_v20  ;;  %v4684_v36 = vpack.c.bf16 %v1307_v19, %v1306_v12 }
 0x1be   : > { %v5944_v34 = vsel %vm919_vm0, %v941_v46, %v942_v23  ;;  %1014 = vst [vmem:[#allocation2 + $0x180] sm:$0xfe] %v941_v46  ;;  %v1056_v35 = vsel %vm1032_vm1, %v1054_v58, %v1055_v24  ;;  %v5947_v62 = vmax.f32 %v744_v59, 0.0  ;;  %v4134_v63 = vpop.f32.mrb[18].mxu1  ;;  %1577 = vmatmul.mubr.f32.gmra.mrb[42].mxu1 %v5833_v41  ;;  %4682 = vmatpush1.bf16.msra.mxu0 %v4681_v10  ;;  %v1308_v41 = vld [vmem:[#allocation10 + $0x70] sm:$0xff]  ;;  %v1311_v10 = vld [vmem:[#allocation10 + $0x88] sm:$0xff] }
 0x1bf   : > { %1015 = vst [vmem:[#allocation2 + $0x198] sm:$0xff] %v5944_v34  ;;  %1127 = vst [vmem:[#allocation2 + $0x190] sm:$0xff] %v1056_v35  ;;  %v945_v37 = vrot.slane %v5940_v33, 7  ;;  %v1058_v38 = vrot.slane %v5940_v33, 1  ;;  %v759_v40 = vadd.f32 %v4134_v63, %v5783_v55  ;;  %v753_v16 = vpop.f32.mrb[19].mxu1  ;;  %1581 = vmatprep.mubr.f32.mxu1 %v5836_v43  ;;  %4203 = vmatprep.mubr.f32.mxu0 %v1053_v14  ;;  %v6004_v63 = vld [vmem:[#allocation2 + $0xf0] sm:$0xff] }
 0x1c0   : > { %872 = vst [vmem:[#allocation2 + $0x1d0] sm:$0xff] %v5940_v33  ;;  %871 = vst [vmem:[#allocation2 + $0x1b8] sm:$0xff] %v5947_v62  ;;  %v944_v49 = vrot.slane %v5947_v62, 7  ;;  %v1057_v50 = vrot.slane %v5947_v62, 1  ;;  %v754_v51 = vadd.f32 %v5783_v55, %v753_v16  ;;  %v5962_v52 = vld [vmem:[#allocation2 + $0x178] sm:$0xff]  ;;  %4683 = vmatprep.subr.bf16.mxu0 %v6941_v22  ;;  %4736 = vmatpush3.bf16.msra.mxu1 %v4733_v11 }
 0x1c1   : > { %1130 = vst [vmem:[#allocation2 + $0x1d8] sm:$0x7f] %v1058_v38  ;;  %v5965_v43 = vmax.f32 %v759_v40, 0.0  ;;  %4204 = vmatmul.mubr.f32.gmra.mrb[12].mxu0 %v5962_v52  ;;  %4738 = vmatprep.subr.bf16.mxu1 %v4737_v29  ;;  %v4741_v53 = vpack.c.bf16 %v1341_v3, %v1340_v0  ;;  %v4687_v4 = vpack.c.bf16 %v1309_v48, %v1308_v41 }
 0x1c2   : > { %v5969_v56 = vsel %vm919_vm0, %v944_v49, %v945_v37  ;;  %1016 = vst [vmem:[#allocation2 + $0x1b0] sm:$0xfe] %v944_v49  ;;  %v1059_v60 = vsel %vm1032_vm1, %v1057_v50, %v1058_v38  ;;  %v5972_v30 = vmax.f32 %v754_v51, 0.0  ;;  %v4137_v1 = vpop.f32.mrb[20].mxu1  ;;  %1582 = vmatmul.mubr.f32.gmra.mrb[44].mxu1 %v5956_v45  ;;  %4685 = vmatpush1.bf16.msra.mxu0 %v4684_v36  ;;  %v1313_v36 = vld [vmem:[#allocation10 + $0x98] sm:$0xff] }
 0x1c3   : > { %1017 = vst [vmem:[#allocation2 + $0x1c8] sm:$0xff] %v5969_v56  ;;  %1129 = vst [vmem:[#allocation2 + $0x1c0] sm:$0xff] %v1059_v60  ;;  %v948_v54 = vrot.slane %v5965_v43, 7  ;;  %v1061_v7 = vrot.slane %v5965_v43, 1  ;;  %v769_v11 = vadd.f32 %v4137_v1, %v5783_v55  ;;  %v763_v14 = vpop.f32.mrb[21].mxu1  ;;  %1586 = vmatprep.mubr.f32.mxu1 %v5828_v6  ;;  %4206 = vmatprep.mubr.f32.mxu0 %v1056_v35  ;;  %v1314_v1 = vld [vmem:[#allocation10 + $0xa0] sm:$0xff] }
 0x1c4   : > { %874 = vst [vmem:[#allocation2 + $0x200] sm:$0xff] %v5965_v43  ;;  %873 = vst [vmem:[#allocation2 + $0x1e8] sm:$0xff] %v5972_v30  ;;  %v947_v20 = vrot.slane %v5972_v30, 7  ;;  %v1060_v17 = vrot.slane %v5972_v30, 1  ;;  %v764_v23 = vadd.f32 %v5783_v55, %v763_v14  ;;  %v5985_v24 = vld [vmem:[#allocation2 + $0x1a8] sm:$0xff]  ;;  %4686 = vmatprep.subr.bf16.mxu0 %v6941_v22  ;;  %4740 = vmatpush3.bf16.msra.mxu1 %v4737_v29 }
 0x1c5   : > { %1132 = vst [vmem:[#allocation2 + $0x208] sm:$0x7f] %v1061_v7  ;;  %v5988_v25 = vmax.f32 %v769_v11, 0.0  ;;  %4207 = vmatmul.mubr.f32.gmra.mrb[14].mxu0 %v5985_v24  ;;  %4742 = vmatprep.subr.bf16.mxu1 %v4741_v53  ;;  %v4690_v46 = vpack.c.bf16 %v1311_v10, %v1310_v18 }
 0x1c6   : > { %v5992_v6 = vsel %vm919_vm0, %v947_v20, %v948_v54  ;;  %1018 = vst [vmem:[#allocation2 + $0x1e0] sm:$0xfe] %v947_v20  ;;  %v1062_v26 = vsel %vm1032_vm1, %v1060_v17, %v1061_v7  ;;  %v5995_v12 = vmax.f32 %v764_v23, 0.0  ;;  %v4140_v19 = vpop.f32.mrb[22].mxu1  ;;  %1587 = vmatmul.mubr.f32.gmra.mrb[46].mxu1 %v5854_v2  ;;  %4688 = vmatpush1.bf16.msra.mxu0 %v4687_v4  ;;  %v1312_v2 = vld [vmem:[#allocation10 + $0x90] sm:$0xff]  ;;  %v1315_v4 = vld [vmem:[#allocation10 + $0xa8] sm:$0xff] }
 0x1c7   : > { %1019 = vst [vmem:[#allocation2 + $0x1f8] sm:$0xff] %v5992_v6  ;;  %1131 = vst [vmem:[#allocation2 + $0x1f0] sm:$0xff] %v1062_v26  ;;  %v951_v58 = vrot.slane %v5988_v25, 7  ;;  %v1064_v59 = vrot.slane %v5988_v25, 1  ;;  %v779_v29 = vadd.f32 %v4140_v19, %v5783_v55  ;;  %v773_v35 = vpop.f32.mrb[23].mxu1  ;;  %1591 = vmatprep.mubr.f32.mxu1 %v5857_v8  ;;  %4209 = vmatprep.mubr.f32.mxu0 %v1059_v60 }
 0x1c8   : > { %876 = vst [vmem:[#allocation2 + $0x230] sm:$0xff] %v5988_v25  ;;  %875 = vst [vmem:[#allocation2 + $0x218] sm:$0xff] %v5995_v12  ;;  %v950_v0 = vrot.slane %v5995_v12, 7  ;;  %v1063_v3 = vrot.slane %v5995_v12, 1  ;;  %v774_v37 = vadd.f32 %v5783_v55, %v773_v35  ;;  %v6010_v38 = vld [vmem:[#allocation2 + $0x1d8] sm:$0xff]  ;;  %4689 = vmatprep.subr.bf16.mxu0 %v6941_v22  ;;  %4744 = vmatpush3.bf16.msra.mxu1 %v4741_v53 }
 0x1c9   : > { %1134 = vst [vmem:[#allocation2 + $0x238] sm:$0x7f] %v1064_v59  ;;  %v6013_v8 = vmax.f32 %v779_v29, 0.0  ;;  %4210 = vmatmul.mubr.f32.gmra.mrb[16].mxu0 %v6010_v38  ;;  %4745 = vmatprep.subr.bf16.mxu1 %v6941_v22  ;;  %v4693_v49 = vpack.c.bf16 %v1313_v36, %v1312_v2  ;;  %v4696_v23 = vpack.c.bf16 %v1315_v4, %v1314_v1  ;;  %v1317_v29 = vld [vmem:[#allocation10 + $0xb8] sm:$0xff]  ;;  %v1318_v4 = vld [vmem:[#allocation10 + $0xc0] sm:$0xff] }
 0x1ca   : > { %v6018_v40 = vsel %vm919_vm0, %v950_v0, %v951_v58  ;;  %1020 = vst [vmem:[#allocation2 + $0x210] sm:$0xfe] %v950_v0  ;;  %v1065_v16 = vsel %vm1032_vm1, %v1063_v3, %v1064_v59  ;;  %v6021_v41 = vmax.f32 %v774_v37, 0.0  ;;  %v4143_v48 = vpop.f32.mrb[24].mxu1  ;;  %1592 = vmatmul.mubr.f32.gmra.mrb[48].mxu1 %v6004_v63  ;;  %4691 = vmatpush1.bf16.msra.mxu0 %v4690_v46  ;;  %v6053_v59 = vld [vmem:[#allocation2 + $0x120] sm:$0xff] }
 0x1cb   : > { %1021 = vst [vmem:[#allocation2 + $0x228] sm:$0xff] %v6018_v40  ;;  %1133 = vst [vmem:[#allocation2 + $0x220] sm:$0xff] %v1065_v16  ;;  %v954_v50 = vrot.slane %v6013_v8, 7  ;;  %v1067_v51 = vrot.slane %v6013_v8, 1  ;;  %v789_v53 = vadd.f32 %v4143_v48, %v5783_v55  ;;  %v783_v60 = vpop.f32.mrb[25].mxu1  ;;  %1596 = vmatprep.mubr.f32.mxu1 %v5851_v5  ;;  %4212 = vmatprep.mubr.f32.mxu0 %v1062_v26 }
 0x1cc   : > { %878 = vst [vmem:[#allocation2 + $0x260] sm:$0xff] %v6013_v8  ;;  %877 = vst [vmem:[#allocation2 + $0x248] sm:$0xff] %v6021_v41  ;;  %v953_v54 = vrot.slane %v6021_v41, 7  ;;  %v1066_v7 = vrot.slane %v6021_v41, 1  ;;  %v784_v11 = vadd.f32 %v5783_v55, %v783_v60  ;;  %v6034_v14 = vld [vmem:[#allocation2 + $0x208] sm:$0xff]  ;;  %4692 = vmatprep.subr.bf16.mxu0 %v6941_v22 }
 0x1cd   : > { %1136 = vst [vmem:[#allocation2 + $0x268] sm:$0x7f] %v1067_v51  ;;  %v6037_v18 = vmax.f32 %v789_v53, 0.0  ;;  %4213 = vmatmul.mubr.f32.gmra.mrb[18].mxu0 %v6034_v14 }
 0x1ce   : > { %v6041_v5 = vsel %vm919_vm0, %v953_v54, %v954_v50  ;;  %1022 = vst [vmem:[#allocation2 + $0x240] sm:$0xfe] %v953_v54  ;;  %v1068_v10 = vsel %vm1032_vm1, %v1066_v7, %v1067_v51  ;;  %v6044_v20 = vmax.f32 %v784_v11, 0.0  ;;  %v4146_v17 = vpop.f32.mrb[26].mxu1  ;;  %1597 = vmatmul.mubr.f32.gmra.mrb[50].mxu1 %v5876_v28  ;;  %4694 = vmatpush1.bf16.msra.mxu0 %v4693_v49  ;;  %v1316_v28 = vld [vmem:[#allocation10 + $0xb0] sm:$0xff]  ;;  %v1319_v54 = vld [vmem:[#allocation10 + $0xc8] sm:$0xff] }
 0x1cf   : > { %1023 = vst [vmem:[#allocation2 + $0x258] sm:$0xff] %v6041_v5  ;;  %1135 = vst [vmem:[#allocation2 + $0x250] sm:$0xff] %v1068_v10  ;;  %v957_v26 = vrot.slane %v6037_v18, 7  ;;  %v1070_v19 = vrot.slane %v6037_v18, 1  ;;  %v799_v46 = vadd.f32 %v4146_v17, %v5783_v55  ;;  %v793_v58 = vpop.f32.mrb[27].mxu1  ;;  %1601 = vmatprep.mubr.f32.mxu1 %v5879_v31  ;;  %4215 = vmatprep.mubr.f32.mxu0 %v1065_v16 }
 0x1d0   : > { %880 = vst [vmem:[#allocation2 + $0x290] sm:$0xff] %v6037_v18  ;;  %879 = vst [vmem:[#allocation2 + $0x278] sm:$0xff] %v6044_v20  ;;  %v956_v35 = vrot.slane %v6044_v20, 7  ;;  %v1069_v2 = vrot.slane %v6044_v20, 1  ;;  %v794_v36 = vadd.f32 %v5783_v55, %v793_v58  ;;  %v6059_v0 = vld [vmem:[#allocation2 + $0x238] sm:$0xff]  ;;  %4695 = vmatprep.subr.bf16.mxu0 %v6941_v22  ;;  %v4699_v50 = vpack.c.bf16 %v1317_v29, %v1316_v28 }
 0x1d1   : > { %1138 = vst [vmem:[#allocation2 + $0x298] sm:$0x7f] %v1070_v19  ;;  %v6062_v3 = vmax.f32 %v799_v46, 0.0  ;;  %4216 = vmatmul.mubr.f32.gmra.mrb[20].mxu0 %v6059_v0  ;;  %v4702_v58 = vpack.c.bf16 %v1319_v54, %v1318_v4 }
 0x1d2   : > { %v6066_v37 = vsel %vm919_vm0, %v956_v35, %v957_v26  ;;  %1024 = vst [vmem:[#allocation2 + $0x270] sm:$0xfe] %v956_v35  ;;  %v6069_v16 = vsel %vm1032_vm1, %v1069_v2, %v1070_v19  ;;  %v6071_v48 = vmax.f32 %v794_v36, 0.0  ;;  %v4149_v49 = vpop.f32.mrb[28].mxu1  ;;  %1602 = vmatmul.mubr.f32.gmra.mrb[52].mxu1 %v6053_v59  ;;  %4697 = vmatpush1.bf16.msra.mxu0 %v4696_v23  ;;  %v6107_v36 = vld [vmem:[#allocation2 + $0x150] sm:$0xff] }
 0x1d3   : > { %1025 = vst [vmem:[#allocation2 + $0x288] sm:$0xff] %v6066_v37  ;;  %1137 = vst [vmem:[#allocation2 + $0x280] sm:$0xff] %v6069_v16  ;;  %v960_v51 = vrot.slane %v6062_v3, 7  ;;  %v1073_v53 = vrot.slane %v6062_v3, 1  ;;  %v809_v60 = vadd.f32 %v4149_v49, %v5783_v55  ;;  %v803_v1 = vpop.f32.mrb[29].mxu1  ;;  %1606 = vmatprep.mubr.f32.mxu1 %v5873_v27  ;;  %4218 = vmatprep.mubr.f32.mxu0 %v1068_v10  ;;  %v1321_v49 = vld [vmem:[#allocation10 + $0xd8] sm:$0xff] }
 0x1d4   : > { %882 = vst [vmem:[#allocation2 + $0x2c0] sm:$0xff] %v6062_v3  ;;  %881 = vst [vmem:[#allocation2 + $0x2a8] sm:$0xff] %v6071_v48  ;;  %v959_v7 = vrot.slane %v6071_v48, 7  ;;  %v1072_v11 = vrot.slane %v6071_v48, 1  ;;  %v804_v17 = vadd.f32 %v5783_v55, %v803_v1  ;;  %v6085_v23 = vld [vmem:[#allocation2 + $0x268] sm:$0xff]  ;;  %4698 = vmatprep.subr.bf16.mxu0 %v6941_v22 }
 0x1d5   : > { %1140 = vst [vmem:[#allocation2 + $0x2c8] sm:$0x7f] %v1073_v53  ;;  %v6088_v26 = vmax.f32 %v809_v60, 0.0  ;;  %4219 = vmatmul.mubr.f32.gmra.mrb[22].mxu0 %v6085_v23 }
 0x1d6   : > { %v6092_v27 = vsel %vm919_vm0, %v959_v7, %v960_v51  ;;  %1026 = vst [vmem:[#allocation2 + $0x2a0] sm:$0xfe] %v959_v7  ;;  %v6095_v10 = vsel %vm1032_vm1, %v1072_v11, %v1073_v53  ;;  %v6097_v19 = vmax.f32 %v804_v17, 0.0  ;;  %v4152_v46 = vpop.f32.mrb[30].mxu1  ;;  %1607 = vmatmul.mubr.f32.gmra.mrb[54].mxu1 %v5896_v44  ;;  %4700 = vmatpush1.bf16.msra.mxu0 %v4699_v50  ;;  %v1320_v44 = vld [vmem:[#allocation10 + $0xd0] sm:$0xff] }
 0x1d7   : > { %1027 = vst [vmem:[#allocation2 + $0x2b8] sm:$0xff] %v6092_v27  ;;  %1139 = vst [vmem:[#allocation2 + $0x2b0] sm:$0xff] %v6095_v10  ;;  %v963_v28 = vrot.slane %v6088_v26, 7  ;;  %v1076_v29 = vrot.slane %v6088_v26, 1  ;;  %v819_v35 = vadd.f32 %v4152_v46, %v5783_v55  ;;  %v813_v2 = vpop.f32.mrb[31].mxu1  ;;  %1611 = vmatprep.mubr.f32.mxu1 %v5899_v47  ;;  %4221 = vmatprep.mubr.f32.mxu0 %v6069_v16  ;;  %v1322_v46 = vld [vmem:[#allocation10 + $0xe0] sm:$0xff] }
 0x1d8   : > { %884 = vst [vmem:[#allocation2 + $0x2f0] sm:$0xff] %v6088_v26  ;;  %883 = vst [vmem:[#allocation2 + $0x2d8] sm:$0xff] %v6097_v19  ;;  %v962_v50 = vrot.slane %v6097_v19, 7  ;;  %v1075_v51 = vrot.slane %v6097_v19, 1  ;;  %v814_v53 = vadd.f32 %v5783_v55, %v813_v2  ;;  %v6114_v60 = vld [vmem:[#allocation2 + $0x298] sm:$0xff]  ;;  %4701 = vmatprep.subr.bf16.mxu0 %v6941_v22  ;;  %v4705_v55 = vpack.c.bf16 %v1321_v49, %v1320_v44  ;;  %v6150_v49 = vld [vmem:[#allocation2 + $0x180] sm:$0xff] }
 0x1d9   : > { %1142 = vst [vmem:[#allocation2 + $0x2f8] sm:$0x7f] %v1076_v29  ;;  %v6117_v1 = vmax.f32 %v819_v35, 0.0  ;;  %4222 = vmatmul.mubr.f32.gmra.mrb[24].mxu0 %v6114_v60 }
 0x1da   : > { %v6121_v4 = vsel %vm919_vm0, %v962_v50, %v963_v28  ;;  %1028 = vst [vmem:[#allocation2 + $0x2d0] sm:$0xfe] %v962_v50  ;;  %v6124_v54 = vsel %vm1032_vm1, %v1075_v51, %v1076_v29  ;;  %v6126_v7 = vmax.f32 %v814_v53, 0.0  ;;  %1612 = vmatmul.mubr.f32.gmra.mrb[56].mxu1 %v6107_v36  ;;  %4703 = vmatpush1.bf16.msra.mxu0 %v4702_v58  ;;  %v1323_v28 = vld [vmem:[#allocation10 + $0xe8] sm:$0xff]  ;;  %v1324_v50 = vld [vmem:[#allocation10 + $0xf0] sm:$0xff]  ;;  %v1325_v51 = vld [vmem:[#allocation10 + $0xf8] sm:$0xff] }
 0x1db   : > { %6969 = vst [vmem:[#allocation22_spill] sm:$0xff] %v6124_v54  ;;  %1029 = vst [vmem:[#allocation2 + $0x2e8] sm:$0xff] %v6121_v4  ;;  %v966_v11 = vrot.slane %v6117_v1, 7  ;;  %v1079_v17 = vrot.slane %v6117_v1, 1  ;;  %1616 = vmatprep.mubr.f32.mxu1 %v5893_v42  ;;  %4224 = vmatprep.mubr.f32.mxu0 %v6095_v10  ;;  %v4708_v44 = vpack.c.bf16 %v1323_v28, %v1322_v46 }
 0x1dc   : > { %1141 = vst [vmem:[#allocation2 + $0x2e0] sm:$0xff] %v6124_v54  ;;  %886 = vst [vmem:[#allocation2 + $0x320] sm:$0xff] %v6117_v1  ;;  %v965_v58 = vrot.slane %v6126_v7, 7  ;;  %v1078_v29 = vrot.slane %v6126_v7, 1  ;;  %v6139_v35 = vld [vmem:[#allocation2 + $0x2c8] sm:$0xff]  ;;  %4704 = vmatprep.subr.bf16.mxu0 %v6941_v22 }
 0x1dd   : > { %885 = vst [vmem:[#allocation2 + $0x308] sm:$0xff] %v6126_v7  ;;  %6970 = vst [vmem:[#allocation23_spill] sm:$0xff] %v6139_v35  ;;  %4225 = vmatmul.mubr.f32.gmra.mrb[26].mxu0 %v6139_v35  ;;  %v2528_v35 = vld [vmem:[#allocation10 + $0x458] sm:$0xff] }
 0x1de   : > { %1144 = vst [vmem:[#allocation2 + $0x328] sm:$0x7f] %v1079_v17  ;;  %v6144_v2 = vsel %vm919_vm0, %v965_v58, %v966_v11  ;;  %1030 = vst [vmem:[#allocation2 + $0x300] sm:$0xfe] %v965_v58  ;;  %v1080_v42 = vsel %vm1032_vm1, %v1078_v29, %v1079_v17  ;;  %1617 = vmatmul.mubr.f32.gmra.mrb[58].mxu1 %v5921_v13  ;;  %4706 = vmatpush1.bf16.msra.mxu0 %v4705_v55  ;;  %v2517_v11 = vld [vmem:[#allocation10 + $0x400] sm:$0xff]  ;;  %v2518_v55 = vld [vmem:[#allocation10 + $0x408] sm:$0xff] }
 0x1df   : > { %1031 = vst [vmem:[#allocation2 + $0x318] sm:$0xff] %v6144_v2  ;;  %1143 = vst [vmem:[#allocation2 + $0x310] sm:$0xff] %v1080_v42  ;;  %1621 = vmatprep.mubr.f32.mxu1 %v5924_v15  ;;  %4227 = vmatprep.mubr.f32.mxu0 %v6124_v54  ;;  %v4711_v17 = vpack.c.bf16 %v1325_v51, %v1324_v50  ;;  %v4793_v28 = vpack.c.bf16 %v2518_v55, %v2517_v11  ;;  %v2519_v58 = vld [vmem:[#allocation10 + $0x410] sm:$0xff]  ;;  %v2520_v29 = vld [vmem:[#allocation10 + $0x418] sm:$0xff] }
 0x1e0   : > { %v6153_v53 = vld [vmem:[#allocation2 + $0x2f8] sm:$0xff]  ;;  %4707 = vmatprep.subr.bf16.mxu0 %v6941_v22  ;;  %v6164_v54 = vld [vmem:[#allocation2 + $0x8] sm:$0xff]  ;;  %v2523_v55 = vld [vmem:[#allocation10 + $0x430] sm:$0xff] }
 0x1e1   : > { %6971 = vst [vmem:[#allocation24_spill] sm:$0xff] %v6153_v53  ;;  %4228 = vmatmul.mubr.f32.gmra.mrb[28].mxu0 %v6153_v53  ;;  %v6162_v53 = vld [vmem:[#allocation2 + $0x1b0] sm:$0xff]  ;;  %v2522_v50 = vld [vmem:[#allocation10 + $0x428] sm:$0xff]  ;;  %v1205_v11 = vld [vmem:[#allocation2 + $0x38] sm:$0xff] }
 0x1e2   : > { %1622 = vmatmul.mubr.f32.gmra.mrb[60].mxu1 %v6150_v49  ;;  %4709 = vmatpush1.bf16.msra.mxu0 %v4708_v44  ;;  %v2521_v44 = vld [vmem:[#allocation10 + $0x420] sm:$0xff] }
 0x1e3   : > { %1626 = vmatprep.mubr.f32.mxu1 %v5917_v57  ;;  %4230 = vmatprep.mubr.f32.mxu0 %v1080_v42  ;;  %v4797_v42 = vpack.c.bf16 %v2520_v29, %v2519_v58  ;;  %v4801_v51 = vpack.c.bf16 %v2522_v50, %v2521_v44  ;;  %v2525_v29 = vld [vmem:[#allocation10 + $0x440] sm:$0xff]  ;;  %v2526_v44 = vld [vmem:[#allocation10 + $0x448] sm:$0xff] }
 0x1e4   : > { %4710 = vmatprep.subr.bf16.mxu0 %v6941_v22  ;;  %v1207_v50 = vld [vmem:[#allocation2 + $0x48] sm:$0xff] }
 0x1e5   : > { %v1437_v46 = vld [vmem:[#allocation2 + $0x328] sm:$0xff] }
 0x1e6   : > { %4231 = vmatmul.mubr.f32.gmra.mrb[30].mxu0 %v1437_v46  ;;  %1627 = vmatmul.mubr.f32.gmra.mrb[62].mxu1 %v5944_v34  ;;  %v6174_v46 = vld [vmem:[#allocation2 + $0x1e0] sm:$0xff]  ;;  %v6179_v22 = vld [vmem:[#allocation2 + $0x68] sm:$0xff] }
 0x1e7   : > { %4712 = vmatpush1.bf16.msra.mxu0 %v4711_v17  ;;  %1631 = vmatprep.mubr.f32.mxu1 %v5947_v62  ;;  %v2524_v17 = vld [vmem:[#allocation10 + $0x438] sm:$0xff] }
 0x1e8   : > { %2001 = vmatprep.mubr.f32.mxu0 %v6164_v54  ;;  %4794 = vmatprep.subr.bf16.mxu0 %v4793_v28  ;;  %v4805_v58 = vpack.c.bf16 %v2524_v17, %v2523_v55  ;;  %v2529_v17 = vld [vmem:[#allocation10 + $0x460] sm:$0xff] }
 0x1ea   : > { %2002 = vmatmul.mubr.f32.vlgmr.msra.gmra.mrb[32].mxu0 %v6164_v54  ;;  %1632 = vmatmul.mubr.f32.gmra.mrb[64].mxu1 %v6162_v53 }
 0x1eb   : > { %2006 = vmatprep.mubr.f32.mxu0 %v6164_v54  ;;  %1636 = vmatprep.mubr.f32.mxu1 %v5940_v33 }
 0x1ec   : > { %4796 = vmatpush3.bf16.msra.mxu0 %v4793_v28  ;;  %v1208_v28 = vld [vmem:[#allocation2 + $0x50] sm:$0xff] }
 0x1ed   : > { %4798 = vmatprep.subr.bf16.mxu0 %v4797_v42 }
 0x1ee   : > { %2007 = vmatmul.mubr.f32.gmra.mrb[34].mxu0 %v6164_v54  ;;  %1637 = vmatmul.mubr.f32.gmra.mrb[66].mxu1 %v5969_v56 }
 0x1ef   : > { %2011 = vmatprep.mubr.f32.mxu0 %v1205_v11  ;;  %1641 = vmatprep.mubr.f32.mxu1 %v5972_v30  ;;  %v4809_v11 = vpack.c.bf16 %v2526_v44, %v2525_v29  ;;  %v6192_v29 = vld [vmem:[#allocation2 + $0x78] sm:$0xff] }
 0x1f0   : > { %4800 = vmatpush3.bf16.msra.mxu0 %v4797_v42  ;;  %v2527_v42 = vld [vmem:[#allocation10 + $0x450] sm:$0xff] }
 0x1f1   : > { %4802 = vmatprep.subr.bf16.mxu0 %v4801_v51  ;;  %v4813_v55 = vpack.c.bf16 %v2528_v35, %v2527_v42  ;;  %v6195_v35 = vld [vmem:[#allocation2 + $0x98] sm:$0xff]  ;;  %v6203_v42 = vld [vmem:[#allocation2 + $0xb0] sm:$0xff] }
 0x1f2   : > { %2012 = vmatmul.mubr.f32.gmra.mrb[36].mxu0 %v5830_v39  ;;  %1642 = vmatmul.mubr.f32.gmra.mrb[68].mxu1 %v6174_v46  ;;  %v6184_v39 = vld [vmem:[#allocation2 + $0x210] sm:$0xff] }
 0x1f3   : > { %2016 = vmatprep.mubr.f32.mxu0 %v1208_v28  ;;  %1646 = vmatprep.mubr.f32.mxu1 %v5965_v43  ;;  %v2530_v28 = vld [vmem:[#allocation10 + $0x468] sm:$0xff] }
 0x1f4   : > { %4804 = vmatpush3.bf16.msra.mxu0 %v4801_v51  ;;  %v6187_v51 = vld [vmem:[#allocation2 + $0x80] sm:$0xff]  ;;  %v4817_v44 = vpack.c.bf16 %v2530_v28, %v2529_v17  ;;  %v6208_v17 = vld [vmem:[#allocation2 + $0xa8] sm:$0xff] }
 0x1f5   : > { %4806 = vmatprep.subr.bf16.mxu0 %v4805_v58  ;;  %v6211_v28 = vld [vmem:[#allocation2 + $0xc8] sm:$0xff] }
 0x1f6   : > { %2017 = vmatmul.mubr.f32.gmra.mrb[38].mxu0 %v1207_v50  ;;  %1647 = vmatmul.mubr.f32.gmra.mrb[70].mxu1 %v5992_v6  ;;  %v6200_v50 = vld [vmem:[#allocation2 + $0x240] sm:$0xff] }
 0x1f7   : > { %2021 = vmatprep.mubr.f32.mxu0 %v6179_v22  ;;  %1651 = vmatprep.mubr.f32.mxu1 %v5995_v12 }
 0x1f8   : > { %4808 = vmatpush3.bf16.msra.mxu0 %v4805_v58  ;;  %v2532_v58 = vld [vmem:[#allocation10 + $0x478] sm:$0xff] }
 0x1f9   : > { %4810 = vmatprep.subr.bf16.mxu0 %v4809_v11 }
 0x1fa   : > { %2022 = vmatmul.mubr.f32.gmra.mrb[40].mxu0 %v5866_v21  ;;  %1652 = vmatmul.mubr.f32.gmra.mrb[72].mxu1 %v6184_v39  ;;  %v2531_v21 = vld [vmem:[#allocation10 + $0x470] sm:$0xff] }
 0x1fb   : > { %2026 = vmatprep.mubr.f32.mxu0 %v6187_v51  ;;  %1656 = vmatprep.mubr.f32.mxu1 %v5988_v25 }
 0x1fc   : > { %4812 = vmatpush3.bf16.msra.mxu0 %v4809_v11  ;;  %v4821_v11 = vpack.c.bf16 %v2532_v58, %v2531_v21  ;;  %v6227_v21 = vld [vmem:[#allocation2 + $0xf8] sm:$0xff]  ;;  %v6235_v58 = vld [vmem:[#allocation2 + $0x110] sm:$0xff] }
 0x1fd   : > { %4814 = vmatprep.subr.bf16.mxu0 %v4813_v55  ;;  %6972 = vst [vmem:[#allocation25_spill] sm:$0xff] %v6227_v21  ;;  %6973 = vst [vmem:[#allocation26_spill] sm:$0xff] %v6235_v58 }
 0x1fe   : > { %2027 = vmatmul.mubr.f32.gmra.mrb[42].mxu0 %v6192_v29  ;;  %1657 = vmatmul.mubr.f32.gmra.mrb[74].mxu1 %v6018_v40 }
 0x1ff   : > { %2031 = vmatprep.mubr.f32.mxu0 %v6195_v35  ;;  %1661 = vmatprep.mubr.f32.mxu1 %v6021_v41 }
 0x200   : > { %4816 = vmatpush3.bf16.msra.mxu0 %v4813_v55  ;;  %v6219_v55 = vld [vmem:[#allocation2 + $0xe0] sm:$0xff] }
 0x201   : > { %4818 = vmatprep.subr.bf16.mxu0 %v4817_v44 }
 0x202   : > { %2032 = vmatmul.mubr.f32.gmra.mrb[44].mxu0 %v5908_v61  ;;  %1662 = vmatmul.mubr.f32.gmra.mrb[76].mxu1 %v6200_v50  ;;  %v6216_v61 = vld [vmem:[#allocation2 + $0x270] sm:$0xff] }
 0x203   : > { %2036 = vmatprep.mubr.f32.mxu0 %v6203_v42  ;;  %1666 = vmatprep.mubr.f32.mxu1 %v6013_v8 }
 0x204   : > { %4820 = vmatpush3.bf16.msra.mxu0 %v4817_v44  ;;  %v6224_v44 = vld [vmem:[#allocation2 + $0xd8] sm:$0xff] }
 0x205   : > { %4822 = vmatprep.subr.bf16.mxu0 %v4821_v11 }
 0x206   : > { %2037 = vmatmul.mubr.f32.gmra.mrb[46].mxu0 %v6208_v17  ;;  %1667 = vmatmul.mubr.f32.gmra.mrb[78].mxu1 %v6041_v5 }
 0x207   : > { %2041 = vmatprep.mubr.f32.mxu0 %v6211_v28  ;;  %1671 = vmatprep.mubr.f32.mxu1 %v6044_v20 }
 0x208   : > { %4824 = vmatpush3.bf16.msra.mxu0 %v4821_v11  ;;  %v6240_v11 = vld [vmem:[#allocation2 + $0x108] sm:$0xff] }
 0x209   : > { %6974 = vst [vmem:[#allocation27_spill] sm:$0xff] %v6240_v11 }
 0x20a   : > { %2042 = vmatmul.mubr.f32.gmra.mrb[48].mxu0 %v5956_v45  ;;  %1672 = vmatmul.mubr.f32.gmra.mrb[80].mxu1 %v6216_v61  ;;  %v6232_v45 = vld [vmem:[#allocation2 + $0x2a0] sm:$0xff] }
 0x20b   : > { %2046 = vmatprep.mubr.f32.mxu0 %v6219_v55  ;;  %1676 = vmatprep.mubr.f32.mxu1 %v6037_v18 }
 0x20e   : > { %2047 = vmatmul.mubr.f32.gmra.mrb[50].mxu0 %v6224_v44  ;;  %1677 = vmatmul.mubr.f32.gmra.mrb[82].mxu1 %v6066_v37 }
 0x20f   : > { %2051 = vmatprep.mubr.f32.mxu0 %v6227_v21  ;;  %1681 = vmatprep.mubr.f32.mxu1 %v6071_v48  ;;  %v6246_v21 = vld [vmem:[#allocation2 + $0x2d0] sm:$0xff] }
 0x212   : > { %2052 = vmatmul.mubr.f32.gmra.mrb[52].mxu0 %v6004_v63  ;;  %1682 = vmatmul.mubr.f32.gmra.mrb[84].mxu1 %v6232_v45  ;;  %v6249_v63 = vld [vmem:[#allocation2 + $0x140] sm:$0xff] }
 0x213   : > { %2056 = vmatprep.mubr.f32.mxu0 %v6235_v58  ;;  %1686 = vmatprep.mubr.f32.mxu1 %v6062_v3  ;;  %6975 = vst [vmem:[#allocation28_spill] sm:$0xff] %v6249_v63  ;;  %v6254_v58 = vld [vmem:[#allocation2 + $0x138] sm:$0xff] }
 0x216   : > { %2057 = vmatmul.mubr.f32.gmra.mrb[54].mxu0 %v6240_v11  ;;  %1687 = vmatmul.mubr.f32.gmra.mrb[86].mxu1 %v6092_v27  ;;  %v2486_v11 = vld [vmem:[#allocation10 + $0x308] sm:$0xff] }
 0x217   : > { %2061 = vmatprep.mubr.f32.mxu0 %v5879_v31  ;;  %1691 = vmatprep.mubr.f32.mxu1 %v6097_v19  ;;  %v1432_v31 = vld [vmem:[#allocation2 + $0x300] sm:$0xff] }
 0x21a   : > { %2062 = vmatmul.mubr.f32.gmra.mrb[56].mxu0 %v6053_v59  ;;  %1692 = vmatmul.mubr.f32.gmra.mrb[88].mxu1 %v6246_v21  ;;  %v6261_v59 = vld [vmem:[#allocation2 + $0x170] sm:$0xff] }
 0x21b   : > { %2066 = vmatprep.mubr.f32.mxu0 %v6249_v63  ;;  %1696 = vmatprep.mubr.f32.mxu1 %v6088_v26  ;;  %6976 = vst [vmem:[#allocation29_spill] sm:$0xff] %v6261_v59  ;;  %v2485_v63 = vld [vmem:[#allocation10 + $0x300] sm:$0xff] }
 0x21e   : > { %2067 = vmatmul.mubr.f32.gmra.mrb[58].mxu0 %v6254_v58  ;;  %1697 = vmatmul.mubr.f32.gmra.mrb[90].mxu1 %v6121_v4 }
 0x21f   : > { %2071 = vmatprep.mubr.f32.mxu0 %v5899_v47  ;;  %1701 = vmatprep.mubr.f32.mxu1 %v6126_v7  ;;  %v4746_v47 = vpack.c.bf16 %v2486_v11, %v2485_v63  ;;  %v2487_v7 = vld [vmem:[#allocation10 + $0x310] sm:$0xff]  ;;  %v2492_v63 = vld [vmem:[#allocation10 + $0x338] sm:$0xff] }
 0x220   : > { %v6274_v11 = vld [vmem:[#allocation2 + $0x70] sm:$0xff] }
 0x222   : > { %2072 = vmatmul.mubr.f32.gmra.mrb[60].mxu0 %v6107_v36  ;;  %1702 = vmatmul.mubr.f32.gmra.mrb[92].mxu1 %v1432_v31  ;;  %v2488_v36 = vld [vmem:[#allocation10 + $0x318] sm:$0xff]  ;;  %v1206_v31 = vld [vmem:[#allocation2 + $0x40] sm:$0xff] }
 0x223   : > { %2076 = vmatprep.mubr.f32.mxu0 %v6261_v59  ;;  %1706 = vmatprep.mubr.f32.mxu1 %v6117_v1  ;;  %v4749_v1 = vpack.c.bf16 %v2488_v36, %v2487_v7  ;;  %v2490_v59 = vld [vmem:[#allocation10 + $0x328] sm:$0xff]  ;;  %v6288_v36 = vld [vmem:[#allocation2 + $0xb8] sm:$0xff] }
 0x224   : > { %v2494_v7 = vld [vmem:[#allocation10 + $0x348] sm:$0xff] }
 0x226   : > { %2077 = vmatmul.mubr.f32.gmra.mrb[62].mxu0 %v5921_v13  ;;  %1707 = vmatmul.mubr.f32.gmra.mrb[94].mxu1 %v6144_v2  ;;  %v6977_v13 = vmov 0.0|0.0   ;;  %v2489_v2 = vld [vmem:[#allocation10 + $0x320] sm:$0xff] }
 0x227   : > { %2081 = vmatprep.mubr.f32.mxu0 %v5924_v15  ;;  %4265 = vmatprep.mubr.f32.mxu1 %v6164_v54  ;;  %v1209_v15 = vld [vmem:[#allocation2 + $0x58] sm:$0xff] }
 0x22a   : > { %2082 = vmatmul.mubr.f32.gmra.mrb[64].mxu0 %v6150_v49  ;;  %4266 = vmatmul.mubr.f32.vlgmr.msra.gmra.mrb[96].mxu1 %v6164_v54  ;;  %v4752_v49 = vpack.c.bf16 %v2490_v59, %v2489_v2  ;;  %v2493_v59 = vld [vmem:[#allocation10 + $0x340] sm:$0xff]  ;;  %v6297_v2 = vld [vmem:[#allocation2 + $0xe8] sm:$0xff] }
 0x22b   : > { %2086 = vmatprep.mubr.f32.mxu0 %v5917_v57  ;;  %4747 = vmatpush1.bf16.msra.mxu1 %v4746_v47  ;;  %v2491_v57 = vld [vmem:[#allocation10 + $0x330] sm:$0xff]  ;;  %v6279_v47 = vld [vmem:[#allocation2 + $0x88] sm:$0xff] }
 0x22c   : > { %4268 = vmatprep.mubr.f32.mxu1 %v1206_v31  ;;  %4748 = vmatprep.subr.bf16.mxu1 %v6977_v13  ;;  %v2495_v31 = vld [vmem:[#allocation10 + $0x350] sm:$0xff] }
 0x22e   : > { %2087 = vmatmul.mubr.f32.gmra.mrb[66].mxu0 %v5944_v34  ;;  %4269 = vmatmul.mubr.f32.gmra.mrb[98].mxu1 %v1209_v15  ;;  %v6283_v34 = vld [vmem:[#allocation2 + $0xa0] sm:$0xff] }
 0x22f   : > { %2091 = vmatprep.mubr.f32.mxu0 %v5947_v62  ;;  %4750 = vmatpush1.bf16.msra.mxu1 %v4749_v1  ;;  %v4755_v62 = vpack.c.bf16 %v2492_v63, %v2491_v57  ;;  %v2496_v1 = vld [vmem:[#allocation10 + $0x358] sm:$0xff]  ;;  %v2497_v15 = vld [vmem:[#allocation10 + $0x360] sm:$0xff]  ;;  %v6308_v57 = vld [vmem:[#allocation2 + $0x130] sm:$0xff] }
 0x230   : > { %4271 = vmatprep.mubr.f32.mxu1 %v6274_v11  ;;  %4751 = vmatprep.subr.bf16.mxu1 %v6977_v13  ;;  %v2500_v63 = vld [vmem:[#allocation10 + $0x378] sm:$0xff] }
 0x232   : > { %2092 = vmatmul.mubr.f32.gmra.mrb[68].mxu0 %v6162_v53  ;;  %4272 = vmatmul.mubr.f32.gmra.mrb[100].mxu1 %v6279_v47  ;;  %v6292_v53 = vld [vmem:[#allocation2 + $0xd0] sm:$0xff] }
 0x233   : > { %2096 = vmatprep.mubr.f32.mxu0 %v5940_v33  ;;  %4753 = vmatpush1.bf16.msra.mxu1 %v4752_v49  ;;  %v4758_v33 = vpack.c.bf16 %v2494_v7, %v2493_v59  ;;  %v2498_v49 = vld [vmem:[#allocation10 + $0x368] sm:$0xff]  ;;  %v6322_v59 = vld [vmem:[#allocation2 + $0x190] sm:$0xff]  ;;  %v6329_v7 = vld [vmem:[#allocation2 + $0x1c0] sm:$0xff] }
 0x234   : > { %4274 = vmatprep.mubr.f32.mxu1 %v6283_v34  ;;  %4754 = vmatprep.subr.bf16.mxu1 %v6977_v13 }
 0x236   : > { %2097 = vmatmul.mubr.f32.gmra.mrb[70].mxu0 %v5969_v56  ;;  %4275 = vmatmul.mubr.f32.gmra.mrb[102].mxu1 %v6288_v36  ;;  %v6301_v56 = vld [vmem:[#allocation2 + $0x100] sm:$0xff] }
 0x237   : > { %2101 = vmatprep.mubr.f32.mxu0 %v5972_v30  ;;  %4756 = vmatpush1.bf16.msra.mxu1 %v4755_v62  ;;  %v4761_v30 = vpack.c.bf16 %v2496_v1, %v2495_v31  ;;  %v6315_v62 = vld [vmem:[#allocation2 + $0x160] sm:$0xff]  ;;  %v6350_v1 = vld [vmem:[#allocation2 + $0x250] sm:$0xff] }
 0x238   : > { %4277 = vmatprep.mubr.f32.mxu1 %v6292_v53  ;;  %4757 = vmatprep.subr.bf16.mxu1 %v6977_v13  ;;  %v6343_v31 = vld [vmem:[#allocation2 + $0x220] sm:$0xff] }
 0x23a   : > { %2102 = vmatmul.mubr.f32.gmra.mrb[72].mxu0 %v6174_v46  ;;  %4278 = vmatmul.mubr.f32.gmra.mrb[104].mxu1 %v6297_v2  ;;  %v2499_v46 = vld [vmem:[#allocation10 + $0x370] sm:$0xff] }
 0x23b   : > { %2106 = vmatprep.mubr.f32.mxu0 %v5965_v43  ;;  %4759 = vmatpush1.bf16.msra.mxu1 %v4758_v33  ;;  %v4764_v43 = vpack.c.bf16 %v2498_v49, %v2497_v15  ;;  %v6336_v33 = vld [vmem:[#allocation2 + $0x1f0] sm:$0xff]  ;;  %v3110_v15 = vld [vmem:[#allocation13 + $0x40] sm:$0xff] }
 0x23c   : > { %4280 = vmatprep.mubr.f32.mxu1 %v6301_v56  ;;  %4760 = vmatprep.subr.bf16.mxu1 %v6977_v13  ;;  %v2400_v49 = vld [vmem:[#allocation2 + $0xc0] sm:$0xff] }
 0x23e   : > { %2107 = vmatmul.mubr.f32.gmra.mrb[74].mxu0 %v5992_v6  ;;  %4281 = vmatmul.mubr.f32.gmra.mrb[106].mxu1 %v5914_v9  ;;  %v4767_v9 = vpack.c.bf16 %v2500_v63, %v2499_v46  ;;  %v2501_v6 = vld [vmem:[#allocation10 + $0x380] sm:$0xff]  ;;  %v3113_v46 = vld [vmem:[#allocation13 + $0x58] sm:$0xff] }
 0x23f   : > { %2111 = vmatprep.mubr.f32.mxu0 %v5995_v12  ;;  %4762 = vmatpush1.bf16.msra.mxu1 %v4761_v30  ;;  %v2502_v12 = vld [vmem:[#allocation10 + $0x388] sm:$0xff]  ;;  %v2388_v30 = vld [vmem:[#allocation2 + $0x60] sm:$0xff] }
 0x240   : > { %4283 = vmatprep.mubr.f32.mxu1 %v6308_v57  ;;  %4763 = vmatprep.subr.bf16.mxu1 %v6977_v13 }
 0x242   : > { %2112 = vmatmul.mubr.f32.gmra.mrb[76].mxu0 %v6184_v39  ;;  %4284 = vmatmul.mubr.f32.gmra.mrb[108].mxu1 %v5937_v32  ;;  %v4770_v32 = vpack.c.bf16 %v2502_v12, %v2501_v6  ;;  %v2504_v39 = vld [vmem:[#allocation10 + $0x398] sm:$0xff] }
 0x243   : > { %2116 = vmatprep.mubr.f32.mxu0 %v5988_v25  ;;  %4765 = vmatpush1.bf16.msra.mxu1 %v4764_v43  ;;  %v2503_v25 = vld [vmem:[#allocation10 + $0x390] sm:$0xff] }
 0x244   : > { %4286 = vmatprep.mubr.f32.mxu1 %v6315_v62  ;;  %4766 = vmatprep.subr.bf16.mxu1 %v6977_v13 }
 0x246   : > { %2117 = vmatmul.mubr.f32.gmra.mrb[78].mxu0 %v6018_v40  ;;  %4287 = vmatmul.mubr.f32.gmra.mrb[110].mxu1 %v5962_v52  ;;  %v4773_v52 = vpack.c.bf16 %v2504_v39, %v2503_v25  ;;  %v2505_v40 = vld [vmem:[#allocation10 + $0x3a0] sm:$0xff]  ;;  %v3115_v39 = vld [vmem:[#allocation13 + $0x68] sm:$0xff] }
 0x247   : > { %2121 = vmatprep.mubr.f32.mxu0 %v6021_v41  ;;  %4768 = vmatpush1.bf16.msra.mxu1 %v4767_v9  ;;  %v2506_v41 = vld [vmem:[#allocation10 + $0x3a8] sm:$0xff]  ;;  %v3114_v25 = vld [vmem:[#allocation13 + $0x60] sm:$0xff] }
 0x248   : > { %4289 = vmatprep.mubr.f32.mxu1 %v6322_v59  ;;  %4769 = vmatprep.subr.bf16.mxu1 %v6977_v13 }
 0x24a   : > { %2122 = vmatmul.mubr.f32.gmra.mrb[80].mxu0 %v6200_v50  ;;  %4290 = vmatmul.mubr.f32.gmra.mrb[112].mxu1 %v5985_v24  ;;  %v4776_v24 = vpack.c.bf16 %v2506_v41, %v2505_v40  ;;  %v2508_v50 = vld [vmem:[#allocation10 + $0x3b8] sm:$0xff]  ;;  %v2406_v40 = vld [vmem:[#allocation2 + $0xf0] sm:$0xff] }
 0x24b   : > { %2126 = vmatprep.mubr.f32.mxu0 %v6013_v8  ;;  %4771 = vmatpush1.bf16.msra.mxu1 %v4770_v32  ;;  %v2507_v8 = vld [vmem:[#allocation10 + $0x3b0] sm:$0xff]  ;;  %v2429_v32 = vld [vmem:[#allocation2 + $0x1a8] sm:$0xff] }
 0x24c   : > { %4292 = vmatprep.mubr.f32.mxu1 %v6329_v7  ;;  %4772 = vmatprep.subr.bf16.mxu1 %v6977_v13 }
 0x24e   : > { %2127 = vmatmul.mubr.f32.gmra.mrb[82].mxu0 %v6041_v5  ;;  %4293 = vmatmul.mubr.f32.gmra.mrb[114].mxu1 %v6010_v38  ;;  %v4779_v38 = vpack.c.bf16 %v2508_v50, %v2507_v8  ;;  %v2509_v5 = vld [vmem:[#allocation10 + $0x3c0] sm:$0xff]  ;;  %v2435_v50 = vld [vmem:[#allocation2 + $0x1d8] sm:$0xff] }
 0x24f   : > { %2131 = vmatprep.mubr.f32.mxu0 %v6044_v20  ;;  %4774 = vmatpush1.bf16.msra.mxu1 %v4773_v52  ;;  %v2510_v20 = vld [vmem:[#allocation10 + $0x3c8] sm:$0xff] }
 0x250   : > { %4295 = vmatprep.mubr.f32.mxu1 %v6336_v33  ;;  %4775 = vmatprep.subr.bf16.mxu1 %v6977_v13 }
 0x252   : > { %2132 = vmatmul.mubr.f32.gmra.mrb[84].mxu0 %v6216_v61  ;;  %4296 = vmatmul.mubr.f32.gmra.mrb[116].mxu1 %v6034_v14  ;;  %v4782_v14 = vpack.c.bf16 %v2510_v20, %v2509_v5  ;;  %v2512_v61 = vld [vmem:[#allocation10 + $0x3d8] sm:$0xff]  ;;  %v3116_v5 = vld [vmem:[#allocation13 + $0x70] sm:$0xff] }
 0x253   : > { %2136 = vmatprep.mubr.f32.mxu0 %v6037_v18  ;;  %4777 = vmatpush1.bf16.msra.mxu1 %v4776_v24  ;;  %v2511_v18 = vld [vmem:[#allocation10 + $0x3d0] sm:$0xff]  ;;  %v4849_v24 = vpack.c.bf16 %v3115_v39, %v3114_v25  ;;  %v3117_v20 = vld [vmem:[#allocation13 + $0x78] sm:$0xff] }
 0x254   : > { %4298 = vmatprep.mubr.f32.mxu1 %v6343_v31  ;;  %4778 = vmatprep.subr.bf16.mxu1 %v6977_v13  ;;  %v2471_v25 = vld [vmem:[#allocation2 + $0x2f8] sm:$0xff] }
 0x256   : > { %2137 = vmatmul.mubr.f32.gmra.mrb[86].mxu0 %v6066_v37  ;;  %4299 = vmatmul.mubr.f32.gmra.mrb[118].mxu1 %v6059_v0  ;;  %v4785_v0 = vpack.c.bf16 %v2512_v61, %v2511_v18  ;;  %v2513_v37 = vld [vmem:[#allocation10 + $0x3e0] sm:$0xff]  ;;  %v4853_v61 = vpack.c.bf16 %v3117_v20, %v3116_v5 }
 0x257   : > { %2141 = vmatprep.mubr.f32.mxu0 %v6071_v48  ;;  %4780 = vmatpush1.bf16.msra.mxu1 %v4779_v38  ;;  %v2514_v48 = vld [vmem:[#allocation10 + $0x3e8] sm:$0xff] }
 0x258   : > { %4301 = vmatprep.mubr.f32.mxu1 %v6350_v1  ;;  %4781 = vmatprep.subr.bf16.mxu1 %v6977_v13 }
 0x25a   : > { %2142 = vmatmul.mubr.f32.gmra.mrb[88].mxu0 %v6232_v45  ;;  %4302 = vmatmul.mubr.f32.gmra.mrb[120].mxu1 %v6085_v23  ;;  %v4788_v23 = vpack.c.bf16 %v2514_v48, %v2513_v37  ;;  %v2516_v45 = vld [vmem:[#allocation10 + $0x3f8] sm:$0xff]  ;;  %v6983_v48 = vld [vmem:[#allocation27_spill] sm:$0xff] }
 0x25b   : > { %2146 = vmatprep.mubr.f32.mxu0 %v6062_v3  ;;  %4783 = vmatpush1.bf16.msra.mxu1 %v4782_v14  ;;  %v2515_v3 = vld [vmem:[#allocation10 + $0x3f0] sm:$0xff] }
 0x25c   : > { %4304 = vmatprep.mubr.f32.mxu1 %v6069_v16  ;;  %4784 = vmatprep.subr.bf16.mxu1 %v6977_v13  ;;  %v6978_v16 = vld [vmem:[#allocation23_spill] sm:$0xff] }
 0x25e   : > { %2147 = vmatmul.mubr.f32.gmra.mrb[90].mxu0 %v6092_v27  ;;  %4305 = vmatmul.mubr.f32.gmra.mrb[122].mxu1 %v6114_v60  ;;  %v6979_v27 = vld [vmem:[#allocation22_spill] sm:$0xff]  ;;  %v4791_v60 = vpack.c.bf16 %v2516_v45, %v2515_v3 }
 0x25f   : > { %2151 = vmatprep.mubr.f32.mxu0 %v6097_v19  ;;  %4786 = vmatpush1.bf16.msra.mxu1 %v4785_v0  ;;  %v3102_v19 = vld [vmem:[#allocation13] sm:$0xff] }
 0x260   : > { %4307 = vmatprep.mubr.f32.mxu1 %v6095_v10  ;;  %4787 = vmatprep.subr.bf16.mxu1 %v6977_v13  ;;  %v6980_v10 = vld [vmem:[#allocation24_spill] sm:$0xff] }
 0x262   : > { %2152 = vmatmul.mubr.f32.gmra.mrb[92].mxu0 %v6246_v21  ;;  %4308 = vmatmul.mubr.f32.gmra.mrb[124].mxu1 %v6978_v16  ;;  %v3103_v21 = vld [vmem:[#allocation13 + $0x8] sm:$0xff]  ;;  %v2412_v16 = vld [vmem:[#allocation2 + $0x120] sm:$0xff] }
 0x263   : > { %2156 = vmatprep.mubr.f32.mxu0 %v6088_v26  ;;  %4789 = vmatpush1.bf16.msra.mxu1 %v4788_v23  ;;  %v4825_v26 = vpack.c.bf16 %v3103_v21, %v3102_v19  ;;  %v2413_v23 = vld [vmem:[#allocation2 + $0x128] sm:$0xff]  ;;  %v6984_v19 = vld [vmem:[#allocation28_spill] sm:$0xff]  ;;  %v2447_v21 = vld [vmem:[#allocation2 + $0x238] sm:$0xff] }
 0x264   : > { %4310 = vmatprep.mubr.f32.mxu1 %v6979_v27  ;;  %4790 = vmatprep.subr.bf16.mxu1 %v6977_v13  ;;  %v3105_v13 = vld [vmem:[#allocation13 + $0x18] sm:$0xff] }
 0x265   : > { %4826 = vmatprep.subr.bf16.mxu0 %v4825_v26 }
 0x266   : > { %2157 = vmatmul.mubr.f32.gmra.mrb[94].mxu0 %v6121_v4  ;;  %4311 = vmatmul.mubr.f32.gmra.mrb[126].mxu1 %v6980_v10  ;;  %v3104_v4 = vld [vmem:[#allocation13 + $0x10] sm:$0xff] }
 0x267   : > { %4345 = vmatprep.mubr.f32.mxu0 %v6274_v11  ;;  %4792 = vmatpush1.bf16.msra.mxu1 %v4791_v60  ;;  %v4829_v11 = vpack.c.bf16 %v3105_v13, %v3104_v4 }
 0x268   : > { %2597 = vmatprep.mubr.f32.mxu1 %v6179_v22  ;;  %v3106_v22 = vld [vmem:[#allocation13 + $0x20] sm:$0xff] }
 0x26a   : > { %4346 = vmatmul.mubr.f32.vlgmr.msra.gmra.mrb[96].mxu0 %v6279_v47  ;;  %2598 = vmatmul.mubr.f32.vlgmr.msra.gmra.mrb[128].mxu1 %v2388_v30  ;;  %v3107_v47 = vld [vmem:[#allocation13 + $0x28] sm:$0xff] }
 0x26b   : > { %4348 = vmatprep.mubr.f32.mxu0 %v6283_v34  ;;  %2602 = vmatprep.mubr.f32.mxu1 %v6187_v51  ;;  %v2394_v34 = vld [vmem:[#allocation2 + $0x90] sm:$0xff]  ;;  %v4833_v51 = vpack.c.bf16 %v3107_v47, %v3106_v22  ;;  %v2453_v22 = vld [vmem:[#allocation2 + $0x268] sm:$0xff] }
 0x26c   : > { %4828 = vmatpush3.bf16.msra.mxu0 %v4825_v26 }
 0x26d   : > { %4830 = vmatprep.subr.bf16.mxu0 %v4829_v11 }
 0x26e   : > { %4349 = vmatmul.mubr.f32.gmra.mrb[98].mxu0 %v6288_v36  ;;  %2603 = vmatmul.mubr.f32.gmra.mrb[130].mxu1 %v6192_v29  ;;  %v2411_v36 = vld [vmem:[#allocation2 + $0x118] sm:$0xff]  ;;  %v3108_v29 = vld [vmem:[#allocation13 + $0x30] sm:$0xff] }
 0x26f   : > { %4351 = vmatprep.mubr.f32.mxu0 %v6292_v53  ;;  %2607 = vmatprep.mubr.f32.mxu1 %v6195_v35  ;;  %v3109_v53 = vld [vmem:[#allocation13 + $0x38] sm:$0xff] }
 0x270   : > { %4832 = vmatpush3.bf16.msra.mxu0 %v4829_v11  ;;  %v4837_v35 = vpack.c.bf16 %v3109_v53, %v3108_v29  ;;  %v2419_v11 = vld [vmem:[#allocation2 + $0x158] sm:$0xff] }
 0x271   : > { %4834 = vmatprep.subr.bf16.mxu0 %v4833_v51 }
 0x272   : > { %4352 = vmatmul.mubr.f32.gmra.mrb[100].mxu0 %v6297_v2  ;;  %2608 = vmatmul.mubr.f32.gmra.mrb[132].mxu1 %v2394_v34  ;;  %v2417_v2 = vld [vmem:[#allocation2 + $0x148] sm:$0xff]  ;;  %v2418_v34 = vld [vmem:[#allocation2 + $0x150] sm:$0xff] }
 0x273   : > { %4354 = vmatprep.mubr.f32.mxu0 %v6301_v56  ;;  %2612 = vmatprep.mubr.f32.mxu1 %v6203_v42  ;;  %v3111_v56 = vld [vmem:[#allocation13 + $0x48] sm:$0xff] }
 0x274   : > { %4836 = vmatpush3.bf16.msra.mxu0 %v4833_v51  ;;  %v4841_v42 = vpack.c.bf16 %v3111_v56, %v3110_v15  ;;  %v2456_v51 = vld [vmem:[#allocation2 + $0x280] sm:$0xff]  ;;  %v2421_v15 = vld [vmem:[#allocation2 + $0x168] sm:$0xff]  ;;  %v2462_v56 = vld [vmem:[#allocation2 + $0x2b0] sm:$0xff] }
 0x275   : > { %4838 = vmatprep.subr.bf16.mxu0 %v4837_v35 }
 0x276   : > { %4355 = vmatmul.mubr.f32.gmra.mrb[102].mxu0 %v2411_v36  ;;  %2613 = vmatmul.mubr.f32.gmra.mrb[134].mxu1 %v6208_v17  ;;  %v2423_v17 = vld [vmem:[#allocation2 + $0x178] sm:$0xff] }
 0x277   : > { %4357 = vmatprep.mubr.f32.mxu0 %v6308_v57  ;;  %2617 = vmatprep.mubr.f32.mxu1 %v6211_v28  ;;  %v3112_v57 = vld [vmem:[#allocation13 + $0x50] sm:$0xff] }
 0x278   : > { %4840 = vmatpush3.bf16.msra.mxu0 %v4837_v35  ;;  %v4845_v9 = vpack.c.bf16 %v3113_v46, %v3112_v57  ;;  %v6985_v35 = vld [vmem:[#allocation29_spill] sm:$0xff]  ;;  %v2465_v57 = vld [vmem:[#allocation2 + $0x2c8] sm:$0xff] }
 0x279   : > { %4842 = vmatprep.subr.bf16.mxu0 %v4841_v42 }
 0x27a   : > { %4358 = vmatmul.mubr.f32.gmra.mrb[104].mxu0 %v2417_v2  ;;  %2618 = vmatmul.mubr.f32.gmra.mrb[136].mxu1 %v2400_v49 }
 0x27b   : > { %4360 = vmatprep.mubr.f32.mxu0 %v6315_v62  ;;  %2622 = vmatprep.mubr.f32.mxu1 %v6219_v55  ;;  %v6981_v62 = vld [vmem:[#allocation25_spill] sm:$0xff] }
 0x27c   : > { %v4187_v43 = vpop.f32.mrb[0].mxu0  ;;  %4844 = vmatpush3.bf16.msra.mxu0 %v4841_v42 }
 0x27d   : > { %v1553_v28 = vpop.f32.mrb[32].mxu1  ;;  %v1778_v63 = vpop.f32.mrb[1].mxu0  ;;  %4846 = vmatprep.subr.bf16.mxu0 %v4845_v9 }
 0x27e   : > { %4361 = vmatmul.mubr.f32.gmra.mrb[106].mxu0 %v2423_v17  ;;  %v1555_v6 = vpop.f32.mrb[33].mxu1  ;;  %2623 = vmatmul.mubr.f32.gmra.mrb[138].mxu1 %v6224_v44  ;;  %v6390_v12 = vadd.f32 %v1778_v63, %v1553_v28  ;;  %v2425_v17 = vld [vmem:[#allocation2 + $0x188] sm:$0xff]  ;;  %v2424_v63 = vld [vmem:[#allocation2 + $0x180] sm:$0xff] }
 0x27f   : > { %4363 = vmatprep.mubr.f32.mxu0 %v6322_v59  ;;  %2627 = vmatprep.mubr.f32.mxu1 %v6981_v62  ;;  %v6982_v59 = vld [vmem:[#allocation26_spill] sm:$0xff] }
 0x280   : > { %v4190_v55 = vpop.f32.mrb[2].mxu0  ;;  %4848 = vmatpush3.bf16.msra.mxu0 %v4845_v9  ;;  %v2468_v9 = vld [vmem:[#allocation2 + $0x2e0] sm:$0xff] }
 0x281   : > { %v1558_v52 = vpop.f32.mrb[34].mxu1  ;;  %v1788_v41 = vpop.f32.mrb[3].mxu0  ;;  %4850 = vmatprep.subr.bf16.mxu0 %v4849_v24 }
 0x282   : > { %4364 = vmatmul.mubr.f32.gmra.mrb[108].mxu0 %v2429_v32  ;;  %v6394_v8 = vadd.f32 %v4187_v43, %v1558_v52  ;;  %v1560_v44 = vpop.f32.mrb[35].mxu1  ;;  %2628 = vmatmul.mubr.f32.gmra.mrb[140].mxu1 %v2406_v40  ;;  %v2428_v32 = vld [vmem:[#allocation2 + $0x1a0] sm:$0xff]  ;;  %v2427_v40 = vld [vmem:[#allocation2 + $0x198] sm:$0xff] }
 0x283   : > { %4366 = vmatprep.mubr.f32.mxu0 %v6329_v7  ;;  %2632 = vmatprep.mubr.f32.mxu1 %v6982_v59  ;;  %v2441_v7 = vld [vmem:[#allocation2 + $0x208] sm:$0xff] }
 0x284   : > { %v4193_v38 = vpop.f32.mrb[4].mxu0  ;;  %4852 = vmatpush3.bf16.msra.mxu0 %v4849_v24 }
 0x285   : > { %v1563_v14 = vpop.f32.mrb[36].mxu1  ;;  %v1798_v18 = vpop.f32.mrb[5].mxu0  ;;  %4854 = vmatprep.subr.bf16.mxu0 %v4853_v61 }
 0x286   : > { %4367 = vmatmul.mubr.f32.gmra.mrb[110].mxu0 %v2435_v50  ;;  %v6398_v0 = vadd.f32 %v1788_v41, %v1563_v14  ;;  %v1565_v37 = vpop.f32.mrb[37].mxu1  ;;  %2633 = vmatmul.mubr.f32.gmra.mrb[142].mxu1 %v6983_v48  ;;  %v2474_v41 = vld [vmem:[#allocation2 + $0x310] sm:$0xff]  ;;  %v2431_v50 = vld [vmem:[#allocation2 + $0x1b8] sm:$0xff] }
 0x287   : > { %4369 = vmatprep.mubr.f32.mxu0 %v6336_v33  ;;  %2637 = vmatprep.mubr.f32.mxu1 %v2413_v23  ;;  %v2430_v14 = vld [vmem:[#allocation2 + $0x1b0] sm:$0xff] }
 0x288   : > { %v4196_v3 = vpop.f32.mrb[6].mxu0  ;;  %4856 = vmatpush3.bf16.msra.mxu0 %v4853_v61  ;;  %v2434_v48 = vld [vmem:[#allocation2 + $0x1d0] sm:$0xff] }
 0x289   : > { %v1568_v45 = vpop.f32.mrb[38].mxu1  ;;  %v1808_v27 = vpop.f32.mrb[7].mxu0 }
 0x28a   : > { %4370 = vmatmul.mubr.f32.gmra.mrb[112].mxu0 %v2441_v7  ;;  %v6402_v60 = vadd.f32 %v4190_v55, %v1568_v45  ;;  %v1570_v10 = vpop.f32.mrb[39].mxu1  ;;  %2638 = vmatmul.mubr.f32.gmra.mrb[144].mxu1 %v2412_v16 }
 0x28b   : > { %4372 = vmatprep.mubr.f32.mxu0 %v6343_v31  ;;  %2642 = vmatprep.mubr.f32.mxu1 %v6984_v19  ;;  %v2437_v10 = vld [vmem:[#allocation2 + $0x1e8] sm:$0xff]  ;;  %v5031_v19 = vld [vmem:[%s5613_s28] sm:$0xff] }
 0x28c   : > { %v6406_v30 = vpop.f32.mrb[8].mxu0 }
 0x28d   : > { %v1573_v33 = vpop.f32.mrb[40].mxu1  ;;  %v1818_v26 = vpop.f32.mrb[9].mxu0 }
 0x28e   : > { %4373 = vmatmul.mubr.f32.gmra.mrb[114].mxu0 %v2447_v21  ;;  %v6408_v4 = vadd.f32 %v1798_v18, %v1573_v33  ;;  %v1575_v13 = vpop.f32.mrb[41].mxu1  ;;  %2643 = vmatmul.mubr.f32.gmra.mrb[146].mxu1 %v6254_v58  ;;  %v2459_v58 = vld [vmem:[#allocation2 + $0x298] sm:$0xff]  ;;  %v2436_v33 = vld [vmem:[#allocation2 + $0x1e0] sm:$0xff] }
 0x28f   : > { %4375 = vmatprep.mubr.f32.mxu0 %v6350_v1  ;;  %2647 = vmatprep.mubr.f32.mxu1 %v2419_v11  ;;  %v5032_v13 = vld [vmem:[%s5613_s28 + $0x8] sm:$0xff]  ;;  %v3086_v11 = vld [vmem:[#allocation11] sm:$0xff] }
 0x290   : > { %v6412_v47 = vpop.f32.mrb[10].mxu0 }
 0x291   : > { %v1578_v31 = vpop.f32.mrb[42].mxu1  ;;  %v1828_v36 = vpop.f32.mrb[11].mxu0 }
 0x292   : > { %4376 = vmatmul.mubr.f32.gmra.mrb[116].mxu0 %v2453_v22  ;;  %v6414_v29 = vadd.f32 %v4193_v38, %v1578_v31  ;;  %v1580_v53 = vpop.f32.mrb[43].mxu1  ;;  %2648 = vmatmul.mubr.f32.gmra.mrb[148].mxu1 %v2418_v34  ;;  %v2477_v38 = vld [vmem:[#allocation2 + $0x328] sm:$0xff]  ;;  %v2440_v34 = vld [vmem:[#allocation2 + $0x200] sm:$0xff] }
 0x293   : > { %4378 = vmatprep.mubr.f32.mxu0 %v2456_v51  ;;  %2652 = vmatprep.mubr.f32.mxu1 %v6985_v35  ;;  %v5033_v51 = vld [vmem:[%s5613_s28 + $0x10] sm:$0xff] }
 0x294   : > { %v6417_v2 = vpop.f32.mrb[12].mxu0 }
 0x295   : > { %v1583_v1 = vpop.f32.mrb[44].mxu1  ;;  %v6419_v49 = vpop.f32.mrb[13].mxu0 }
 0x296   : > { %4379 = vmatmul.mubr.f32.gmra.mrb[118].mxu0 %v2459_v58  ;;  %v6421_v42 = vadd.f32 %v1808_v27, %v1583_v1  ;;  %v1585_v43 = vpop.f32.mrb[45].mxu1  ;;  %2653 = vmatmul.mubr.f32.gmra.mrb[150].mxu1 %v2421_v15  ;;  %v2439_v58 = vld [vmem:[#allocation2 + $0x1f8] sm:$0xff] }
 0x297   : > { %4381 = vmatprep.mubr.f32.mxu0 %v2462_v56  ;;  %2657 = vmatprep.mubr.f32.mxu1 %v2425_v17  ;;  %v5034_v15 = vld [vmem:[%s5613_s28 + $0x18] sm:$0xff]  ;;  %v3088_v56 = vld [vmem:[#allocation11 + $0x10] sm:$0xff] }
 0x298   : > { %v6423_v46 = vpop.f32.mrb[14].mxu0 }
 0x299   : > { %v1588_v28 = vpop.f32.mrb[46].mxu1  ;;  %v6425_v6 = vpop.f32.mrb[15].mxu0 }
 0x29a   : > { %4382 = vmatmul.mubr.f32.gmra.mrb[120].mxu0 %v2465_v57  ;;  %v6427_v62 = vadd.f32 %v4196_v3, %v1588_v28  ;;  %v1590_v55 = vpop.f32.mrb[47].mxu1  ;;  %2658 = vmatmul.mubr.f32.gmra.mrb[152].mxu1 %v2424_v63  ;;  %v2433_v3 = vld [vmem:[#allocation2 + $0x1c8] sm:$0xff]  ;;  %v2443_v57 = vld [vmem:[#allocation2 + $0x218] sm:$0xff]  ;;  %v5035_v28 = vld [vmem:[%s5613_s28 + $0x20] sm:$0xff] }
 0x29b   : > { %4384 = vmatprep.mubr.f32.mxu0 %v2468_v9  ;;  %2662 = vmatprep.mubr.f32.mxu1 %v2428_v32  ;;  %v2442_v32 = vld [vmem:[#allocation2 + $0x210] sm:$0xff] }
 0x29c   : > { %v6429_v39 = vpop.f32.mrb[16].mxu0 }
 0x29d   : > { %v1593_v52 = vpop.f32.mrb[48].mxu1  ;;  %v6431_v24 = vpop.f32.mrb[17].mxu0 }
 0x29e   : > { %4385 = vmatmul.mubr.f32.gmra.mrb[122].mxu0 %v2471_v25  ;;  %v6433_v44 = vadd.f32 %v1818_v26, %v1593_v52  ;;  %v1595_v59 = vpop.f32.mrb[49].mxu1  ;;  %2663 = vmatmul.mubr.f32.gmra.mrb[154].mxu1 %v2427_v40  ;;  %v5036_v52 = vld [vmem:[%s5613_s28 + $0x28] sm:$0xff] }
 0x29f   : > { %4387 = vmatprep.mubr.f32.mxu0 %v2474_v41  ;;  %2667 = vmatprep.mubr.f32.mxu1 %v2431_v50  ;;  %v3091_v40 = vld [vmem:[#allocation11 + $0x28] sm:$0xff]  ;;  %v2446_v50 = vld [vmem:[#allocation2 + $0x230] sm:$0xff] }
 0x2a0   : > { %v6435_v5 = vpop.f32.mrb[18].mxu0 }
 0x2a1   : > { %v1598_v20 = vpop.f32.mrb[50].mxu1  ;;  %v6437_v18 = vpop.f32.mrb[19].mxu0 }
 0x2a2   : > { %4388 = vmatmul.mubr.f32.gmra.mrb[124].mxu0 %v2477_v38  ;;  %v6440_v61 = vadd.f32 %v6406_v30, %v1598_v20  ;;  %v1600_v37 = vpop.f32.mrb[51].mxu1  ;;  %2668 = vmatmul.mubr.f32.gmra.mrb[156].mxu1 %v2430_v14  ;;  %v5037_v38 = vld [vmem:[%s5613_s28 + $0x30] sm:$0xff] }
 0x2a3   : > { %4390 = vmatprep.mubr.f32.mxu0 %v6164_v54  ;;  %2672 = vmatprep.mubr.f32.mxu1 %v2434_v48  ;;  %v2445_v48 = vld [vmem:[#allocation2 + $0x228] sm:$0xff] }
 0x2a4   : > { %v6443_v23 = vpop.f32.mrb[20].mxu0 }
 0x2a5   : > { %v1603_v7 = vpop.f32.mrb[52].mxu1  ;;  %v6445_v45 = vpop.f32.mrb[21].mxu0 }
 0x2a6   : > { %4391 = vmatmul.mubr.f32.gmra.mrb[126].mxu0 %v6164_v54  ;;  %v6448_v16 = vadd.f32 %v1828_v36, %v1603_v7  ;;  %v1605_v27 = vpop.f32.mrb[53].mxu1  ;;  %2673 = vmatmul.mubr.f32.gmra.mrb[158].mxu1 %v2433_v3  ;;  %v3087_v54 = vld [vmem:[#allocation11 + $0x8] sm:$0xff]  ;;  %v5038_v3 = vld [vmem:[%s5613_s28 + $0x38] sm:$0xff] }
 0x2a7   : > { %4425 = vmatprep.mubr.f32.mxu0 %v5031_v19  ;;  %2677 = vmatprep.mubr.f32.mxu1 %v2437_v10  ;;  %v4857_v36 = vpack.c.bf16 %v3087_v54, %v3086_v11  ;;  %v3093_v27 = vld [vmem:[#allocation11 + $0x38] sm:$0xff] }
 0x2a8   : > { %v6451_v21 = vpop.f32.mrb[22].mxu0 }
 0x2a9   : > { %v1608_v30 = vpop.f32.mrb[54].mxu1  ;;  %v6453_v26 = vpop.f32.mrb[23].mxu0  ;;  %4858 = vmatprep.subr.bf16.mxu0 %v4857_v36 }
 0x2aa   : > { %4426 = vmatmul.mubr.f32.vlgmr.msra.gmra.mrb[128].mxu0 %v5032_v13  ;;  %v6457_v22 = vadd.f32 %v6412_v47, %v1608_v30  ;;  %v1610_v31 = vpop.f32.mrb[55].mxu1  ;;  %2678 = vmatmul.mubr.f32.gmra.mrb[160].mxu1 %v2436_v33  ;;  %v3089_v47 = vld [vmem:[#allocation11 + $0x18] sm:$0xff]  ;;  %v2449_v30 = vld [vmem:[#allocation2 + $0x248] sm:$0xff]  ;;  %v5039_v33 = vld [vmem:[%s5613_s28 + $0x40] sm:$0xff] }
 0x2ab   : > { %4428 = vmatprep.mubr.f32.mxu0 %v5033_v51  ;;  %2682 = vmatprep.mubr.f32.mxu1 %v2440_v34  ;;  %v4861_v63 = vpack.c.bf16 %v3089_v47, %v3088_v56  ;;  %v2448_v31 = vld [vmem:[#allocation2 + $0x240] sm:$0xff]  ;;  %v5040_v51 = vld [vmem:[%s5613_s28 + $0x48] sm:$0xff]  ;;  %v5041_v56 = vld [vmem:[%s5613_s28 + $0x50] sm:$0xff] }
 0x2ac   : > { %v6460_v53 = vpop.f32.mrb[24].mxu0  ;;  %4860 = vmatpush3.bf16.msra.mxu0 %v4857_v36  ;;  %v3095_v36 = vld [vmem:[#allocation11 + $0x48] sm:$0xff] }
 0x2ad   : > { %v1613_v35 = vpop.f32.mrb[56].mxu1  ;;  %v6462_v1 = vpop.f32.mrb[25].mxu0  ;;  %4862 = vmatprep.subr.bf16.mxu0 %v4861_v63 }
 0x2ae   : > { %4429 = vmatmul.mubr.f32.gmra.mrb[130].mxu0 %v5034_v15  ;;  %v6466_v43 = vadd.f32 %v6419_v49, %v1613_v35  ;;  %v1615_v17 = vpop.f32.mrb[57].mxu1  ;;  %2683 = vmatmul.mubr.f32.gmra.mrb[162].mxu1 %v2439_v58  ;;  %v3090_v49 = vld [vmem:[#allocation11 + $0x20] sm:$0xff] }
 0x2af   : > { %4431 = vmatprep.mubr.f32.mxu0 %v5035_v28  ;;  %2687 = vmatprep.mubr.f32.mxu1 %v2443_v57  ;;  %v4865_v20 = vpack.c.bf16 %v3091_v40, %v3090_v49  ;;  %v2452_v15 = vld [vmem:[#allocation2 + $0x260] sm:$0xff]  ;;  %v2451_v28 = vld [vmem:[#allocation2 + $0x258] sm:$0xff] }
 0x2b0   : > { %v6469_v9 = vpop.f32.mrb[26].mxu0  ;;  %4864 = vmatpush3.bf16.msra.mxu0 %v4861_v63 }
 0x2b1   : > { %v1618_v55 = vpop.f32.mrb[58].mxu1  ;;  %v6471_v25 = vpop.f32.mrb[27].mxu0  ;;  %4866 = vmatprep.subr.bf16.mxu0 %v4865_v20 }
 0x2b2   : > { %4432 = vmatmul.mubr.f32.gmra.mrb[132].mxu0 %v5036_v52  ;;  %v6475_v41 = vadd.f32 %v6417_v2, %v1618_v55  ;;  %v1620_v59 = vpop.f32.mrb[59].mxu1  ;;  %2688 = vmatmul.mubr.f32.gmra.mrb[164].mxu1 %v2442_v32  ;;  %v3092_v2 = vld [vmem:[#allocation11 + $0x30] sm:$0xff]  ;;  %v5042_v32 = vld [vmem:[%s5613_s28 + $0x58] sm:$0xff] }
 0x2b3   : > { %4434 = vmatprep.mubr.f32.mxu0 %v5037_v38  ;;  %2692 = vmatprep.mubr.f32.mxu1 %v2446_v50  ;;  %v4869_v13 = vpack.c.bf16 %v3093_v27, %v3092_v2  ;;  %v3097_v52 = vld [vmem:[#allocation11 + $0x58] sm:$0xff]  ;;  %v5043_v50 = vld [vmem:[%s5613_s28 + $0x60] sm:$0xff]  ;;  %v5044_v2 = vld [vmem:[%s5613_s28 + $0x68] sm:$0xff] }
 0x2b4   : > { %v6478_v14 = vpop.f32.mrb[28].mxu0  ;;  %4868 = vmatpush3.bf16.msra.mxu0 %v4865_v20  ;;  %v2455_v59 = vld [vmem:[#allocation2 + $0x278] sm:$0xff]  ;;  %v3099_v27 = vld [vmem:[#allocation11 + $0x68] sm:$0xff] }
 0x2b5   : > { %v1623_v37 = vpop.f32.mrb[60].mxu1  ;;  %v6480_v7 = vpop.f32.mrb[29].mxu0  ;;  %4870 = vmatprep.subr.bf16.mxu0 %v4869_v13 }
 0x2b6   : > { %4435 = vmatmul.mubr.f32.gmra.mrb[134].mxu0 %v5038_v3  ;;  %v6484_v10 = vadd.f32 %v6425_v6, %v1623_v37  ;;  %v1625_v19 = vpop.f32.mrb[61].mxu1  ;;  %2693 = vmatmul.mubr.f32.gmra.mrb[166].mxu1 %v2445_v48  ;;  %v3094_v6 = vld [vmem:[#allocation11 + $0x40] sm:$0xff]  ;;  %v2454_v37 = vld [vmem:[#allocation2 + $0x270] sm:$0xff] }
 0x2b7   : > { %4437 = vmatprep.mubr.f32.mxu0 %v5039_v33  ;;  %2697 = vmatprep.mubr.f32.mxu1 %v2449_v30  ;;  %v4873_v47 = vpack.c.bf16 %v3095_v36, %v3094_v6  ;;  %v2458_v33 = vld [vmem:[#allocation2 + $0x290] sm:$0xff] }
 0x2b8   : > { %4872 = vmatpush3.bf16.msra.mxu0 %v4869_v13  ;;  %v5045_v13 = vld [vmem:[%s5613_s28 + $0x70] sm:$0xff] }
 0x2b9   : > { %v6487_v11 = vpop.f32.mrb[30].mxu0  ;;  %v1628_v54 = vpop.f32.mrb[62].mxu1  ;;  %4874 = vmatprep.subr.bf16.mxu0 %v4873_v47 }
 0x2ba   : > { %v6489_v34 = vpop.f32.mrb[31].mxu0  ;;  %4438 = vmatmul.mubr.f32.gmra.mrb[136].mxu0 %v5040_v51  ;;  %v6493_v35 = vadd.f32 %v6423_v46, %v1628_v54  ;;  %v1630_v58 = vpop.f32.mrb[63].mxu1  ;;  %2698 = vmatmul.mubr.f32.gmra.mrb[168].mxu1 %v2448_v31  ;;  %v3096_v46 = vld [vmem:[#allocation11 + $0x50] sm:$0xff]  ;;  %v2457_v51 = vld [vmem:[#allocation2 + $0x288] sm:$0xff] }
 0x2bb   : > { %4440 = vmatprep.mubr.f32.mxu0 %v5041_v56  ;;  %2702 = vmatprep.mubr.f32.mxu1 %v2452_v15  ;;  %v4877_v38 = vpack.c.bf16 %v3097_v52, %v3096_v46  ;;  %v5046_v58 = vld [vmem:[%s5613_s28 + $0x78] sm:$0xff] }
 0x2bc   : > { %4876 = vmatpush3.bf16.msra.mxu0 %v4873_v47  ;;  %v3101_v15 = vld [vmem:[#allocation11 + $0x78] sm:$0xff] }
 0x2bd   : > { %v2003_v17 = vpop.f32.mrb[32].mxu0  ;;  %v1633_v57 = vpop.f32.mrb[64].mxu1  ;;  %4878 = vmatprep.subr.bf16.mxu0 %v4877_v38 }
 0x2be   : > { %v6497_v63 = vadd.f32 %v2003_v17, %v6390_v12  ;;  %v2005_v55 = vpop.f32.mrb[33].mxu0  ;;  %4441 = vmatmul.mubr.f32.gmra.mrb[138].mxu0 %v5042_v32  ;;  %v6501_v49 = vadd.f32 %v6431_v24, %v1633_v57  ;;  %v1635_v40 = vpop.f32.mrb[65].mxu1  ;;  %2703 = vmatmul.mubr.f32.gmra.mrb[170].mxu1 %v2451_v28  ;;  %v3098_v24 = vld [vmem:[#allocation11 + $0x60] sm:$0xff]  ;;  %v2461_v17 = vld [vmem:[#allocation2 + $0x2a8] sm:$0xff] }
 0x2bf   : > { %4443 = vmatprep.mubr.f32.mxu0 %v5043_v50  ;;  %2707 = vmatprep.mubr.f32.mxu1 %v2455_v59  ;;  %v4881_v54 = vpack.c.bf16 %v3099_v27, %v3098_v24  ;;  %v5047_v57 = vld [vmem:[%s5613_s28 + $0x80] sm:$0xff]  ;;  %v2467_v27 = vld [vmem:[#allocation2 + $0x2d8] sm:$0xff] }
 0x2c0   : > { %4880 = vmatpush3.bf16.msra.mxu0 %v4877_v38  ;;  %v2460_v32 = vld [vmem:[#allocation2 + $0x2a0] sm:$0xff]  ;;  %v5049_v38 = vld [vmem:[%s5613_s28 + $0x90] sm:$0xff] }
 0x2c1   : > { %v2008_v12 = vpop.f32.mrb[34].mxu0  ;;  %v1638_v20 = vpop.f32.mrb[66].mxu1  ;;  %4882 = vmatprep.subr.bf16.mxu0 %v4881_v54  ;;  %v2464_v50 = vld [vmem:[#allocation2 + $0x2c0] sm:$0xff] }
 0x2c2   : > { %v6505_v48 = vadd.f32 %v2008_v12, %v6394_v8  ;;  %v2010_v3 = vpop.f32.mrb[35].mxu0  ;;  %4444 = vmatmul.mubr.f32.gmra.mrb[140].mxu0 %v5044_v2  ;;  %v6509_v19 = vadd.f32 %v6429_v39, %v1638_v20  ;;  %v1640_v30 = vpop.f32.mrb[67].mxu1  ;;  %2708 = vmatmul.mubr.f32.gmra.mrb[172].mxu1 %v2454_v37  ;;  %v3100_v39 = vld [vmem:[#allocation11 + $0x70] sm:$0xff]  ;;  %v2463_v37 = vld [vmem:[#allocation2 + $0x2b8] sm:$0xff] }
 0x2c3   : > { %4446 = vmatprep.mubr.f32.mxu0 %v5045_v13  ;;  %2712 = vmatprep.mubr.f32.mxu1 %v2458_v33  ;;  %v4885_v28 = vpack.c.bf16 %v3101_v15, %v3100_v39  ;;  %v5050_v2 = vld [vmem:[%s5613_s28 + $0x98] sm:$0xff]  ;;  %v5051_v30 = vld [vmem:[%s5613_s28 + $0xa0] sm:$0xff] }
 0x2c4   : > { %4884 = vmatpush3.bf16.msra.mxu0 %v4881_v54  ;;  %v2466_v54 = vld [vmem:[#allocation2 + $0x2d0] sm:$0xff] }
 0x2c5   : > { %v2013_v8 = vpop.f32.mrb[36].mxu0  ;;  %v1643_v31 = vpop.f32.mrb[68].mxu1  ;;  %4886 = vmatprep.subr.bf16.mxu0 %v4885_v28 }
 0x2c6   : > { %v6513_v6 = vadd.f32 %v2013_v8, %v6398_v0  ;;  %v2015_v36 = vpop.f32.mrb[37].mxu0  ;;  %4447 = vmatmul.mubr.f32.gmra.mrb[142].mxu0 %v5046_v58  ;;  %v6517_v56 = vadd.f32 %v6437_v18, %v1643_v31  ;;  %v1645_v47 = vpop.f32.mrb[69].mxu1  ;;  %2713 = vmatmul.mubr.f32.gmra.mrb[174].mxu1 %v2457_v51  ;;  %v5048_v18 = vld [vmem:[%s5613_s28 + $0x88] sm:$0xff]  ;;  %v5053_v58 = vld [vmem:[%s5613_s28 + $0xb0] sm:$0xff] }
 0x2c7   : > { %4449 = vmatprep.mubr.f32.mxu0 %v5047_v57  ;;  %2717 = vmatprep.mubr.f32.mxu1 %v2461_v17  ;;  %v5052_v31 = vld [vmem:[%s5613_s28 + $0xa8] sm:$0xff]  ;;  %v2470_v36 = vld [vmem:[#allocation2 + $0x2f0] sm:$0xff]  ;;  %v5054_v57 = vld [vmem:[%s5613_s28 + $0xb8] sm:$0xff] }
 0x2c8   : > { %4888 = vmatpush3.bf16.msra.mxu0 %v4885_v28  ;;  %v2469_v47 = vld [vmem:[#allocation2 + $0x2e8] sm:$0xff] }
 0x2c9   : > { %v2018_v0 = vpop.f32.mrb[38].mxu0  ;;  %v1648_v55 = vpop.f32.mrb[70].mxu1 }
 0x2ca   : > { %v6521_v46 = vadd.f32 %v2018_v0, %v6402_v60  ;;  %v2020_v52 = vpop.f32.mrb[39].mxu0  ;;  %4450 = vmatmul.mubr.f32.gmra.mrb[144].mxu0 %v5048_v18  ;;  %v6525_v40 = vadd.f32 %v6435_v5, %v1648_v55  ;;  %v1650_v59 = vpop.f32.mrb[71].mxu1  ;;  %2718 = vmatmul.mubr.f32.gmra.mrb[176].mxu1 %v2460_v32  ;;  %v2473_v0 = vld [vmem:[#allocation2 + $0x308] sm:$0xff]  ;;  %v5055_v55 = vld [vmem:[%s5613_s28 + $0xc0] sm:$0xff] }
 0x2cb   : > { %4452 = vmatprep.mubr.f32.mxu0 %v5049_v38  ;;  %2722 = vmatprep.mubr.f32.mxu1 %v2464_v50  ;;  %v2472_v18 = vld [vmem:[#allocation2 + $0x300] sm:$0xff]  ;;  %v5056_v50 = vld [vmem:[%s5613_s28 + $0xc8] sm:$0xff] }
 0x2cd   : > { %v2023_v12 = vpop.f32.mrb[40].mxu0  ;;  %v1653_v20 = vpop.f32.mrb[72].mxu1 }
 0x2ce   : > { %v6529_v60 = vadd.f32 %v2023_v12, %v6408_v4  ;;  %v2025_v3 = vpop.f32.mrb[41].mxu0  ;;  %4453 = vmatmul.mubr.f32.gmra.mrb[146].mxu0 %v5050_v2  ;;  %v6533_v5 = vadd.f32 %v6445_v45, %v1653_v20  ;;  %v1655_v24 = vpop.f32.mrb[73].mxu1  ;;  %2723 = vmatmul.mubr.f32.gmra.mrb[178].mxu1 %v2463_v37  ;;  %v2476_v12 = vld [vmem:[#allocation2 + $0x320] sm:$0xff]  ;;  %v5057_v20 = vld [vmem:[%s5613_s28 + $0xd0] sm:$0xff]  ;;  %v2475_v2 = vld [vmem:[#allocation2 + $0x318] sm:$0xff] }
 0x2cf   : > { %4455 = vmatprep.mubr.f32.mxu0 %v5051_v30  ;;  %2727 = vmatprep.mubr.f32.mxu1 %v2467_v27  ;;  %v5058_v27 = vld [vmem:[%s5613_s28 + $0xd8] sm:$0xff] }
 0x2d1   : > { %v2028_v33 = vpop.f32.mrb[42].mxu0  ;;  %v1658_v13 = vpop.f32.mrb[74].mxu1 }
 0x2d2   : > { %v6537_v4 = vadd.f32 %v2028_v33, %v6414_v29  ;;  %v2030_v8 = vpop.f32.mrb[43].mxu0  ;;  %4456 = vmatmul.mubr.f32.gmra.mrb[148].mxu0 %v5052_v31  ;;  %v6541_v45 = vadd.f32 %v6443_v23, %v1658_v13  ;;  %v1660_v51 = vpop.f32.mrb[75].mxu1  ;;  %2728 = vmatmul.mubr.f32.gmra.mrb[180].mxu1 %v2466_v54  ;;  %v5059_v33 = vld [vmem:[%s5613_s28 + $0xe0] sm:$0xff]  ;;  %v5060_v13 = vld [vmem:[#allocation2 + $0x8] sm:$0xff] }
 0x2d3   : > { %4458 = vmatprep.mubr.f32.mxu0 %v5053_v58  ;;  %2732 = vmatprep.mubr.f32.mxu1 %v2470_v36  ;;  %v5061_v51 = vld [vmem:[%s5613_s28 + $0xe8] sm:$0xff]  ;;  %v5062_v58 = vld [vmem:[%s5613_s28 + $0xf0] sm:$0xff] }
 0x2d5   : > { %v2033_v39 = vpop.f32.mrb[44].mxu0  ;;  %v1663_v15 = vpop.f32.mrb[76].mxu1 }
 0x2d6   : > { %v6545_v29 = vadd.f32 %v2033_v39, %v6421_v42  ;;  %v2035_v17 = vpop.f32.mrb[45].mxu0  ;;  %4459 = vmatmul.mubr.f32.gmra.mrb[150].mxu0 %v5054_v57  ;;  %v6549_v23 = vadd.f32 %v6453_v26, %v1663_v15  ;;  %v1665_v28 = vpop.f32.mrb[77].mxu1  ;;  %2733 = vmatmul.mubr.f32.gmra.mrb[182].mxu1 %v2469_v47  ;;  %v5063_v57 = vld [vmem:[%s5613_s28 + $0xf8] sm:$0xff] }
 0x2d7   : > { %4461 = vmatprep.mubr.f32.mxu0 %v5055_v55  ;;  %2737 = vmatprep.mubr.f32.mxu1 %v2473_v0 }
 0x2d9   : > { %v2038_v32 = vpop.f32.mrb[46].mxu0  ;;  %v1668_v52 = vpop.f32.mrb[78].mxu1 }
 0x2da   : > { %v6553_v42 = vadd.f32 %v2038_v32, %v6427_v62  ;;  %v2040_v59 = vpop.f32.mrb[47].mxu0  ;;  %4462 = vmatmul.mubr.f32.gmra.mrb[152].mxu0 %v5056_v50  ;;  %v6557_v26 = vadd.f32 %v6451_v21, %v1668_v52  ;;  %v1670_v38 = vpop.f32.mrb[79].mxu1  ;;  %2738 = vmatmul.mubr.f32.gmra.mrb[184].mxu1 %v2472_v18 }
 0x2db   : > { %4464 = vmatprep.mubr.f32.mxu0 %v5057_v20  ;;  %2742 = vmatprep.mubr.f32.mxu1 %v2476_v12 }
 0x2dd   : > { %v2043_v37 = vpop.f32.mrb[48].mxu0  ;;  %v1673_v3 = vpop.f32.mrb[80].mxu1 }
 0x2de   : > { %v6561_v62 = vadd.f32 %v2043_v37, %v6433_v44  ;;  %v2045_v24 = vpop.f32.mrb[49].mxu0  ;;  %4465 = vmatmul.mubr.f32.gmra.mrb[154].mxu0 %v5058_v27  ;;  %v6565_v21 = vadd.f32 %v6462_v1, %v1673_v3  ;;  %v1675_v30 = vpop.f32.mrb[81].mxu1  ;;  %2743 = vmatmul.mubr.f32.gmra.mrb[186].mxu1 %v2475_v2 }
 0x2df   : > { %4467 = vmatprep.mubr.f32.mxu0 %v5059_v33  ;;  %2747 = vmatprep.mubr.f32.mxu1 %v5060_v13 }
 0x2e1   : > { %v2048_v54 = vpop.f32.mrb[50].mxu0  ;;  %v1678_v8 = vpop.f32.mrb[82].mxu1 }
 0x2e2   : > { %v6569_v31 = vadd.f32 %v2048_v54, %v6440_v61  ;;  %v2050_v44 = vpop.f32.mrb[51].mxu0  ;;  %4468 = vmatmul.mubr.f32.gmra.mrb[156].mxu0 %v5061_v51  ;;  %v6573_v36 = vadd.f32 %v6460_v53, %v1678_v8  ;;  %v1680_v1 = vpop.f32.mrb[83].mxu1  ;;  %2748 = vmatmul.mubr.f32.gmra.mrb[188].mxu1 %v5060_v13 }
 0x2e3   : > { %4470 = vmatprep.mubr.f32.mxu0 %v5062_v58  ;;  %2752 = vmatprep.mubr.f32.mxu1 %v5060_v13 }
 0x2e5   : > { %v2053_v39 = vpop.f32.mrb[52].mxu0  ;;  %v1683_v15 = vpop.f32.mrb[84].mxu1 }
 0x2e6   : > { %v6577_v47 = vadd.f32 %v2053_v39, %v6448_v16  ;;  %v2055_v17 = vpop.f32.mrb[53].mxu0  ;;  %4471 = vmatmul.mubr.f32.gmra.mrb[158].mxu0 %v5063_v57  ;;  %v6581_v61 = vadd.f32 %v6471_v25, %v1683_v15  ;;  %v1685_v28 = vpop.f32.mrb[85].mxu1  ;;  %2753 = vmatmul.mubr.f32.gmra.mrb[190].mxu1 %v5060_v13 }
 0x2e9   : > { %v2058_v53 = vpop.f32.mrb[54].mxu0  ;;  %v1688_v0 = vpop.f32.mrb[86].mxu1 }
 0x2ea   : > { %v6584_v55 = vadd.f32 %v2058_v53, %v6457_v22  ;;  %v2060_v32 = vpop.f32.mrb[55].mxu0  ;;  %v6587_v52 = vadd.f32 %v6469_v9, %v1688_v0  ;;  %v1690_v18 = vpop.f32.mrb[87].mxu1 }
 0x2ed   : > { %v2063_v16 = vpop.f32.mrb[56].mxu0  ;;  %v1693_v59 = vpop.f32.mrb[88].mxu1 }
 0x2ee   : > { %v6590_v50 = vadd.f32 %v2063_v16, %v6466_v43  ;;  %v2065_v38 = vpop.f32.mrb[57].mxu0  ;;  %v6593_v25 = vadd.f32 %v6480_v7, %v1693_v59  ;;  %v1695_v12 = vpop.f32.mrb[89].mxu1 }
 0x2f1   : > { %v2068_v20 = vpop.f32.mrb[58].mxu0  ;;  %v1698_v37 = vpop.f32.mrb[90].mxu1 }
 0x2f2   : > { %v2069_v22 = vadd.f32 %v2068_v20, %v6475_v41  ;;  %v2070_v3 = vpop.f32.mrb[59].mxu0  ;;  %v6597_v2 = vadd.f32 %v6478_v14, %v1698_v37  ;;  %v1700_v9 = vpop.f32.mrb[91].mxu1 }
 0x2f5   : > { %v2073_v24 = vpop.f32.mrb[60].mxu0  ;;  %v1703_v27 = vpop.f32.mrb[92].mxu1 }
 0x2f6   : > { %v6600_v30 = vadd.f32 %v2073_v24, %v6484_v10  ;;  %v2075_v43 = vpop.f32.mrb[61].mxu0  ;;  %v6603_v33 = vadd.f32 %v6489_v34, %v1703_v27  ;;  %v1705_v7 = vpop.f32.mrb[93].mxu1 }
 0x2f9   : > { %v2078_v13 = vpop.f32.mrb[62].mxu0  ;;  %v1708_v54 = vpop.f32.mrb[94].mxu1 }
 0x2fa   : > { %v2079_v8 = vadd.f32 %v2078_v13, %v6493_v35  ;;  %v2080_v41 = vpop.f32.mrb[63].mxu0  ;;  %v6607_v44 = vadd.f32 %v6487_v11, %v1708_v54  ;;  %v1710_v14 = vpop.f32.mrb[95].mxu1 }
 0x2fd   : > { %v2083_v51 = vpop.f32.mrb[64].mxu0  ;;  %v4267_v1 = vpop.f32.mrb[96].mxu1 }
 0x2fe   : > { %v2084_v58 = vadd.f32 %v2083_v51, %v6501_v49  ;;  %v2085_v10 = vpop.f32.mrb[65].mxu0  ;;  %v6611_v39 = vadd.f32 %v4267_v1, %v6505_v48  ;;  %v2228_v34 = vpop.f32.mrb[97].mxu1 }
 0x2ff   : > { %v6614_v15 = vadd.f32 %v2228_v34, %v6497_v63 }
 0x301   : > { %v2088_v17 = vpop.f32.mrb[66].mxu0  ;;  %v4270_v57 = vpop.f32.mrb[98].mxu1 }
 0x302   : > { %v2089_v35 = vadd.f32 %v2088_v17, %v6509_v19  ;;  %v2090_v28 = vpop.f32.mrb[67].mxu0  ;;  %v6618_v11 = vadd.f32 %v4270_v57, %v6521_v46  ;;  %v2238_v53 = vpop.f32.mrb[99].mxu1 }
 0x303   : > { %v6621_v0 = vadd.f32 %v2238_v53, %v6513_v6 }
 0x305   : > { %v2093_v49 = vpop.f32.mrb[68].mxu0  ;;  %v4273_v32 = vpop.f32.mrb[100].mxu1 }
 0x306   : > { %v2094_v48 = vadd.f32 %v2093_v49, %v6517_v56  ;;  %v2095_v18 = vpop.f32.mrb[69].mxu0  ;;  %v6625_v63 = vadd.f32 %v4273_v32, %v6537_v4  ;;  %v2248_v16 = vpop.f32.mrb[101].mxu1 }
 0x307   : > { %v6628_v59 = vadd.f32 %v2248_v16, %v6529_v60 }
 0x309   : > { %v2098_v19 = vpop.f32.mrb[70].mxu0  ;;  %v4276_v38 = vpop.f32.mrb[102].mxu1 }
 0x30a   : > { %v2099_v46 = vadd.f32 %v2098_v19, %v6525_v40  ;;  %v2100_v12 = vpop.f32.mrb[71].mxu0  ;;  %v6632_v6 = vadd.f32 %v4276_v38, %v6553_v42  ;;  %v2258_v20 = vpop.f32.mrb[103].mxu1 }
 0x30b   : > { %v6635_v37 = vadd.f32 %v2258_v20, %v6545_v29 }
 0x30d   : > { %v2103_v56 = vpop.f32.mrb[72].mxu0  ;;  %v4279_v3 = vpop.f32.mrb[104].mxu1 }
 0x30e   : > { %v2104_v4 = vadd.f32 %v2103_v56, %v6533_v5  ;;  %v2105_v9 = vpop.f32.mrb[73].mxu0  ;;  %v6639_v60 = vadd.f32 %v4279_v3, %v6569_v31  ;;  %v2268_v24 = vpop.f32.mrb[105].mxu1 }
 0x30f   : > { %v6642_v27 = vadd.f32 %v2268_v24, %v6561_v62 }
 0x311   : > { %v2108_v40 = vpop.f32.mrb[74].mxu0  ;;  %v4282_v43 = vpop.f32.mrb[106].mxu1 }
 0x312   : > { %v2109_v42 = vadd.f32 %v2108_v40, %v6541_v45  ;;  %v2110_v7 = vpop.f32.mrb[75].mxu0  ;;  %v6646_v29 = vadd.f32 %v4282_v43, %v6584_v55  ;;  %v2278_v13 = vpop.f32.mrb[107].mxu1 }
 0x313   : > { %v6649_v54 = vadd.f32 %v2278_v13, %v6577_v47 }
 0x315   : > { %v2113_v5 = vpop.f32.mrb[76].mxu0  ;;  %v4285_v41 = vpop.f32.mrb[108].mxu1 }
 0x316   : > { %v2114_v31 = vadd.f32 %v2113_v5, %v6549_v23  ;;  %v2115_v14 = vpop.f32.mrb[77].mxu0  ;;  %v6652_v51 = vadd.f32 %v4285_v41, %v2069_v22  ;;  %v2288_v62 = vpop.f32.mrb[109].mxu1 }
 0x317   : > { %v6655_v1 = vadd.f32 %v2288_v62, %v6590_v50 }
 0x319   : > { %v2118_v45 = vpop.f32.mrb[78].mxu0  ;;  %v4288_v10 = vpop.f32.mrb[110].mxu1 }
 0x31a   : > { %v2119_v55 = vadd.f32 %v2118_v45, %v6557_v26  ;;  %v2120_v34 = vpop.f32.mrb[79].mxu0  ;;  %v6658_v17 = vadd.f32 %v4288_v10, %v2079_v8  ;;  %v2298_v47 = vpop.f32.mrb[111].mxu1 }
 0x31b   : > { %v6661_v57 = vadd.f32 %v2298_v47, %v6600_v30 }
 0x31d   : > { %v2123_v28 = vpop.f32.mrb[80].mxu0  ;;  %v4291_v23 = vpop.f32.mrb[112].mxu1 }
 0x31e   : > { %v2124_v22 = vadd.f32 %v2123_v28, %v6565_v21  ;;  %v2125_v53 = vpop.f32.mrb[81].mxu0  ;;  %v6664_v49 = vadd.f32 %v4291_v23, %v2089_v35  ;;  %v2308_v50 = vpop.f32.mrb[113].mxu1 }
 0x31f   : > { %v6666_v32 = vadd.f32 %v2308_v50, %v2084_v58 }
 0x321   : > { %v2128_v18 = vpop.f32.mrb[82].mxu0  ;;  %v4294_v16 = vpop.f32.mrb[114].mxu1 }
 0x322   : > { %v2129_v26 = vadd.f32 %v2128_v18, %v6573_v36  ;;  %v2130_v8 = vpop.f32.mrb[83].mxu0  ;;  %v6669_v19 = vadd.f32 %v4294_v16, %v2099_v46  ;;  %v2318_v38 = vpop.f32.mrb[115].mxu1 }
 0x323   : > { %v6671_v30 = vadd.f32 %v2318_v38, %v2094_v48 }
 0x325   : > { %v2133_v12 = vpop.f32.mrb[84].mxu0  ;;  %v4297_v20 = vpop.f32.mrb[116].mxu1 }
 0x326   : > { %v2134_v21 = vadd.f32 %v2133_v12, %v6581_v61  ;;  %v2135_v56 = vpop.f32.mrb[85].mxu0  ;;  %v6674_v35 = vadd.f32 %v4297_v20, %v2109_v42  ;;  %v2328_v3 = vpop.f32.mrb[117].mxu1 }
 0x327   : > { %v6676_v58 = vadd.f32 %v2328_v3, %v2104_v4  ;;  %v6706_v3 = vld [vmem:[%s6986_s19] ss:$0 sm:$0xff] }
 0x329   : > { %v2138_v9 = vpop.f32.mrb[86].mxu0  ;;  %v4300_v24 = vpop.f32.mrb[118].mxu1 }
 0x32a   : > { %v2139_v36 = vadd.f32 %v2138_v9, %v6587_v52  ;;  %v2140_v40 = vpop.f32.mrb[87].mxu0  ;;  %v6679_v46 = vadd.f32 %v4300_v24, %v2119_v55  ;;  %v2338_v43 = vpop.f32.mrb[119].mxu1 }
 0x32b   : > { %v6681_v48 = vadd.f32 %v2338_v43, %v2114_v31 }
 0x32d   : > { %v2143_v7 = vpop.f32.mrb[88].mxu0  ;;  %v4303_v13 = vpop.f32.mrb[120].mxu1 }
 0x32e   : > { %v2144_v61 = vadd.f32 %v2143_v7, %v6593_v25  ;;  %v2145_v5 = vpop.f32.mrb[89].mxu0  ;;  %v6684_v42 = vadd.f32 %v4303_v13, %v2129_v26  ;;  %v2348_v41 = vpop.f32.mrb[121].mxu1 }
 0x32f   : > { %v6686_v4 = vadd.f32 %v2348_v41, %v2124_v22 }
 0x331   : > { %v2148_v14 = vpop.f32.mrb[90].mxu0  ;;  %v4306_v62 = vpop.f32.mrb[122].mxu1 }
 0x332   : > { %v2149_v52 = vadd.f32 %v2148_v14, %v6597_v2  ;;  %v2150_v45 = vpop.f32.mrb[91].mxu0  ;;  %v6689_v10 = vadd.f32 %v4306_v62, %v2139_v36  ;;  %v2358_v55 = vpop.f32.mrb[123].mxu1 }
 0x333   : > { %v6691_v31 = vadd.f32 %v2358_v55, %v2134_v21 }
 0x335   : > { %v2153_v34 = vpop.f32.mrb[92].mxu0  ;;  %v4309_v47 = vpop.f32.mrb[124].mxu1 }
 0x336   : > { %v2154_v25 = vadd.f32 %v2153_v34, %v6603_v33  ;;  %v2155_v28 = vpop.f32.mrb[93].mxu0  ;;  %v6694_v23 = vadd.f32 %v4309_v47, %v2149_v52  ;;  %v2368_v53 = vpop.f32.mrb[125].mxu1 }
 0x337   : > { %v6696_v22 = vadd.f32 %v2368_v53, %v2144_v61 }
 0x339   : > { %v2158_v50 = vpop.f32.mrb[94].mxu0  ;;  %v4312_v18 = vpop.f32.mrb[126].mxu1 }
 0x33a   : > { %v2159_v2 = vadd.f32 %v2158_v50, %v6607_v44  ;;  %v2160_v16 = vpop.f32.mrb[95].mxu0  ;;  %v2378_v26 = vpop.f32.mrb[127].mxu1 }
 0x33b   : > { %v6699_v8 = vadd.f32 %v2378_v26, %v2154_v25 }
 0x33c   : > { %v6701_v38 = vadd.f32 %v4312_v18, %v2159_v2 }
 0x33d   : > { %v4347_v12 = vpop.f32.mrb[96].mxu0  ;;  %v2599_v20 = vpop.f32.mrb[128].mxu1 }
 0x33e   : > { %v2824_v21 = vpop.f32.mrb[97].mxu0  ;;  %v2601_v33 = vpop.f32.mrb[129].mxu1 }
 0x33f   : > { %v2825_v56 = vadd.f32 %v2824_v21, %v2599_v20 }
 0x341   : > { %v2983_v9 = vadd.f32 %v2825_v56, %v6614_v15  ;;  %v4350_v24 = vpop.f32.mrb[98].mxu0  ;;  %v2604_v44 = vpop.f32.mrb[130].mxu1 }
 0x342   : > { %v2834_v36 = vpop.f32.mrb[99].mxu0  ;;  %v2830_v40 = vadd.f32 %v4347_v12, %v2604_v44  ;;  %v2606_v43 = vpop.f32.mrb[131].mxu1 }
 0x343   : > { %v3022_v7 = vadd.f32 %v6706_v3, %v2983_v9 }
 0x344   : > { %v2984_v13 = vadd.f32 %v2830_v40, %v6611_v39 }
 0x345   : > { %v4353_v61 = vpop.f32.mrb[100].mxu0  ;;  %v3054_v5 = vmax.f32 %v3022_v7, 0.0  ;;  %v2609_v41 = vpop.f32.mrb[132].mxu1 }
 0x346   : > { %v2844_v14 = vpop.f32.mrb[101].mxu0  ;;  %v3023_v62 = vadd.f32 %v6706_v3, %v2984_v13  ;;  %v2835_v52 = vadd.f32 %v2834_v36, %v2609_v41  ;;  %v2611_v45 = vpop.f32.mrb[133].mxu1 }
 0x347   : > { %4505 = vmatprep.mubr.f32.mxu0 %v3054_v5 }
 0x348   : > { %v3055_v55 = vmax.f32 %v3023_v62, 0.0  ;;  %v2985_v15 = vadd.f32 %v2835_v52, %v6621_v0 }
 0x349   : > { %v4356_v34 = vpop.f32.mrb[102].mxu0  ;;  %v2614_v47 = vpop.f32.mrb[134].mxu1 }
 0x34a   : > { %v2854_v25 = vpop.f32.mrb[103].mxu0  ;;  %v2840_v28 = vadd.f32 %v4350_v24, %v2614_v47  ;;  %v2616_v53 = vpop.f32.mrb[135].mxu1  ;;  %4506 = vmatmul.mubr.f32.vlgmr.msra.gmra.mrb[128].mxu0 %v3055_v55  ;;  %v3024_v39 = vadd.f32 %v6706_v3, %v2985_v15 }
 0x34c   : > { %v2986_v50 = vadd.f32 %v2840_v28, %v6618_v11  ;;  %v3056_v18 = vmax.f32 %v3024_v39, 0.0 }
 0x34d   : > { %v4359_v2 = vpop.f32.mrb[104].mxu0  ;;  %v2619_v16 = vpop.f32.mrb[136].mxu1 }
 0x34e   : > { %v2864_v26 = vpop.f32.mrb[105].mxu0  ;;  %v2845_v12 = vadd.f32 %v2844_v14, %v2619_v16  ;;  %v2621_v20 = vpop.f32.mrb[137].mxu1  ;;  %4508 = vmatprep.mubr.f32.mxu0 %v3056_v18  ;;  %v3025_v21 = vadd.f32 %v6706_v3, %v2986_v50 }
 0x350   : > { %v2987_v0 = vadd.f32 %v2845_v12, %v6628_v59  ;;  %v3057_v33 = vmax.f32 %v3025_v21, 0.0 }
 0x351   : > { %v4362_v56 = vpop.f32.mrb[106].mxu0  ;;  %v2624_v9 = vpop.f32.mrb[138].mxu1 }
 0x352   : > { %v2874_v24 = vpop.f32.mrb[107].mxu0  ;;  %v2850_v44 = vadd.f32 %v4353_v61, %v2624_v9  ;;  %v2626_v36 = vpop.f32.mrb[139].mxu1  ;;  %4509 = vmatmul.mubr.f32.gmra.mrb[130].mxu0 %v3057_v33  ;;  %v3026_v11 = vadd.f32 %v6706_v3, %v2987_v0 }
 0x354   : > { %v2988_v40 = vadd.f32 %v2850_v44, %v6625_v63  ;;  %v3058_v43 = vmax.f32 %v3026_v11, 0.0 }
 0x355   : > { %v6719_v7 = vpop.f32.mrb[108].mxu0  ;;  %v2629_v13 = vpop.f32.mrb[140].mxu1 }
 0x356   : > { %v2884_v5 = vpop.f32.mrb[109].mxu0  ;;  %v2855_v41 = vadd.f32 %v2854_v25, %v2629_v13  ;;  %v2631_v14 = vpop.f32.mrb[141].mxu1  ;;  %4511 = vmatprep.mubr.f32.mxu0 %v3058_v43  ;;  %v3027_v59 = vadd.f32 %v6706_v3, %v2988_v40 }
 0x358   : > { %v2989_v62 = vadd.f32 %v2855_v41, %v6635_v37  ;;  %v3059_v52 = vmax.f32 %v3027_v59, 0.0 }
 0x359   : > { %v6723_v61 = vpop.f32.mrb[110].mxu0  ;;  %v2634_v45 = vpop.f32.mrb[142].mxu1 }
 0x35a   : > { %v6725_v55 = vpop.f32.mrb[111].mxu0  ;;  %v2860_v15 = vadd.f32 %v4356_v34, %v2634_v45  ;;  %v2636_v63 = vpop.f32.mrb[143].mxu1  ;;  %4512 = vmatmul.mubr.f32.gmra.mrb[132].mxu0 %v3059_v52  ;;  %v3028_v47 = vadd.f32 %v6706_v3, %v2989_v62 }
 0x35c   : > { %v2990_v28 = vadd.f32 %v2860_v15, %v6632_v6  ;;  %v3060_v25 = vmax.f32 %v3028_v47, 0.0 }
 0x35d   : > { %v6729_v53 = vpop.f32.mrb[112].mxu0  ;;  %v2639_v39 = vpop.f32.mrb[144].mxu1 }
 0x35e   : > { %v6731_v50 = vpop.f32.mrb[113].mxu0  ;;  %v2865_v37 = vadd.f32 %v2864_v26, %v2639_v39  ;;  %v2641_v18 = vpop.f32.mrb[145].mxu1  ;;  %4514 = vmatprep.mubr.f32.mxu0 %v3060_v25  ;;  %v3029_v16 = vadd.f32 %v6706_v3, %v2990_v28 }
 0x360   : > { %v2991_v12 = vadd.f32 %v2865_v37, %v6642_v27  ;;  %v3061_v34 = vmax.f32 %v3029_v16, 0.0 }
 0x361   : > { %v6735_v20 = vpop.f32.mrb[114].mxu0  ;;  %v2644_v21 = vpop.f32.mrb[146].mxu1 }
 0x362   : > { %v6737_v0 = vpop.f32.mrb[115].mxu0  ;;  %v2870_v6 = vadd.f32 %v4359_v2, %v2644_v21  ;;  %v2646_v33 = vpop.f32.mrb[147].mxu1  ;;  %4515 = vmatmul.mubr.f32.gmra.mrb[134].mxu0 %v3061_v34  ;;  %v3030_v9 = vadd.f32 %v6706_v3, %v2991_v12 }
 0x364   : > { %v2992_v44 = vadd.f32 %v2870_v6, %v6639_v60  ;;  %v3062_v26 = vmax.f32 %v3030_v9, 0.0 }
 0x365   : > { %v6741_v36 = vpop.f32.mrb[116].mxu0  ;;  %v2649_v11 = vpop.f32.mrb[148].mxu1 }
 0x366   : > { %v6743_v40 = vpop.f32.mrb[117].mxu0  ;;  %v2875_v27 = vadd.f32 %v2874_v24, %v2649_v11  ;;  %v2651_v43 = vpop.f32.mrb[149].mxu1  ;;  %4517 = vmatprep.mubr.f32.mxu0 %v3062_v26  ;;  %v3031_v13 = vadd.f32 %v6706_v3, %v2992_v44 }
 0x368   : > { %v2993_v41 = vadd.f32 %v2875_v27, %v6649_v54  ;;  %v3063_v2 = vmax.f32 %v3031_v13, 0.0 }
 0x369   : > { %v6747_v14 = vpop.f32.mrb[118].mxu0  ;;  %v2654_v59 = vpop.f32.mrb[150].mxu1 }
 0x36a   : > { %v6749_v62 = vpop.f32.mrb[119].mxu0  ;;  %v2880_v60 = vadd.f32 %v4362_v56, %v2654_v59  ;;  %v2656_v52 = vpop.f32.mrb[151].mxu1  ;;  %4518 = vmatmul.mubr.f32.gmra.mrb[136].mxu0 %v3063_v2  ;;  %v3032_v45 = vadd.f32 %v6706_v3, %v2993_v41 }
 0x36c   : > { %v2994_v15 = vadd.f32 %v2880_v60, %v6646_v29  ;;  %v3064_v24 = vmax.f32 %v3032_v45, 0.0 }
 0x36d   : > { %v6753_v63 = vpop.f32.mrb[120].mxu0  ;;  %v2659_v47 = vpop.f32.mrb[152].mxu1 }
 0x36e   : > { %v6755_v28 = vpop.f32.mrb[121].mxu0  ;;  %v2885_v54 = vadd.f32 %v2884_v5, %v2659_v47  ;;  %v2661_v25 = vpop.f32.mrb[153].mxu1  ;;  %4520 = vmatprep.mubr.f32.mxu0 %v3064_v24  ;;  %v3033_v39 = vadd.f32 %v6706_v3, %v2994_v15 }
 0x370   : > { %v2995_v37 = vadd.f32 %v2885_v54, %v6655_v1  ;;  %v3065_v56 = vmax.f32 %v3033_v39, 0.0 }
 0x371   : > { %v6759_v18 = vpop.f32.mrb[122].mxu0  ;;  %v2664_v16 = vpop.f32.mrb[154].mxu1 }
 0x372   : > { %v6761_v12 = vpop.f32.mrb[123].mxu0  ;;  %v2890_v29 = vadd.f32 %v6719_v7, %v2664_v16  ;;  %v2666_v34 = vpop.f32.mrb[155].mxu1  ;;  %4521 = vmatmul.mubr.f32.gmra.mrb[138].mxu0 %v3065_v56  ;;  %v3034_v21 = vadd.f32 %v6706_v3, %v2995_v37 }
 0x374   : > { %v2996_v5 = vadd.f32 %v2890_v29, %v6652_v51  ;;  %v3066_v6 = vmax.f32 %v3034_v21, 0.0 }
 0x375   : > { %v6766_v33 = vpop.f32.mrb[124].mxu0  ;;  %v2669_v9 = vpop.f32.mrb[156].mxu1 }
 0x376   : > { %v6768_v44 = vpop.f32.mrb[125].mxu0  ;;  %v2895_v1 = vadd.f32 %v6725_v55, %v2669_v9  ;;  %v2671_v26 = vpop.f32.mrb[157].mxu1  ;;  %4523 = vmatprep.mubr.f32.mxu0 %v3066_v6  ;;  %v3035_v11 = vadd.f32 %v6706_v3, %v2996_v5 }
 0x378   : > { %v2997_v7 = vadd.f32 %v2895_v1, %v6661_v57  ;;  %v3067_v27 = vmax.f32 %v3035_v11, 0.0 }
 0x379   : > { %v6773_v43 = vpop.f32.mrb[126].mxu0  ;;  %v2674_v13 = vpop.f32.mrb[158].mxu1 }
 0x37a   : > { %v6775_v41 = vpop.f32.mrb[127].mxu0  ;;  %v2900_v51 = vadd.f32 %v6723_v61, %v2674_v13  ;;  %v2676_v2 = vpop.f32.mrb[159].mxu1  ;;  %4524 = vmatmul.mubr.f32.gmra.mrb[140].mxu0 %v3067_v27  ;;  %v3036_v59 = vadd.f32 %v6706_v3, %v2997_v7 }
 0x37c   : > { %v2998_v55 = vadd.f32 %v2900_v51, %v6658_v17  ;;  %v3068_v60 = vmax.f32 %v3036_v59, 0.0 }
 0x37d   : > { %v2679_v52 = vpop.f32.mrb[160].mxu1 }
 0x37e   : > { %v2905_v45 = vadd.f32 %v6731_v50, %v2679_v52  ;;  %v2681_v15 = vpop.f32.mrb[161].mxu1  ;;  %4526 = vmatprep.mubr.f32.mxu0 %v3068_v60  ;;  %v3037_v57 = vadd.f32 %v6706_v3, %v2998_v55 }
 0x380   : > { %v2999_v24 = vadd.f32 %v2905_v45, %v6666_v32  ;;  %v3069_v47 = vmax.f32 %v3037_v57, 0.0 }
 0x381   : > { %v2684_v54 = vpop.f32.mrb[162].mxu1 }
 0x382   : > { %v2910_v61 = vadd.f32 %v6729_v53, %v2684_v54  ;;  %v2686_v25 = vpop.f32.mrb[163].mxu1  ;;  %4527 = vmatmul.mubr.f32.gmra.mrb[142].mxu0 %v3069_v47  ;;  %v3038_v39 = vadd.f32 %v6706_v3, %v2999_v24 }
 0x384   : > { %v3000_v17 = vadd.f32 %v2910_v61, %v6664_v49  ;;  %v3070_v37 = vmax.f32 %v3038_v39, 0.0 }
 0x385   : > { %v2689_v56 = vpop.f32.mrb[164].mxu1 }
 0x386   : > { %v2915_v50 = vadd.f32 %v6737_v0, %v2689_v56  ;;  %v2691_v16 = vpop.f32.mrb[165].mxu1  ;;  %4529 = vmatprep.mubr.f32.mxu0 %v3070_v37  ;;  %v3039_v29 = vadd.f32 %v6706_v3, %v3000_v17 }
 0x388   : > { %v3001_v32 = vadd.f32 %v2915_v50, %v6671_v30  ;;  %v3071_v34 = vmax.f32 %v3039_v29, 0.0 }
 0x389   : > { %v2694_v21 = vpop.f32.mrb[166].mxu1 }
 0x38a   : > { %v2920_v53 = vadd.f32 %v6735_v20, %v2694_v21  ;;  %v2696_v5 = vpop.f32.mrb[167].mxu1  ;;  %4530 = vmatmul.mubr.f32.gmra.mrb[144].mxu0 %v3071_v34  ;;  %v3040_v6 = vadd.f32 %v6706_v3, %v3001_v32 }
 0x38c   : > { %v3002_v49 = vadd.f32 %v2920_v53, %v6669_v19  ;;  %v3072_v9 = vmax.f32 %v3040_v6, 0.0 }
 0x38d   : > { %v2699_v1 = vpop.f32.mrb[168].mxu1 }
 0x38e   : > { %v2925_v0 = vadd.f32 %v6743_v40, %v2699_v1  ;;  %v2701_v26 = vpop.f32.mrb[169].mxu1  ;;  %4532 = vmatprep.mubr.f32.mxu0 %v3072_v9  ;;  %v3041_v11 = vadd.f32 %v6706_v3, %v3002_v49 }
 0x390   : > { %v3003_v30 = vadd.f32 %v2925_v0, %v6676_v58  ;;  %v3073_v7 = vmax.f32 %v3041_v11, 0.0 }
 0x391   : > { %v2704_v27 = vpop.f32.mrb[170].mxu1 }
 0x392   : > { %v2930_v20 = vadd.f32 %v6741_v36, %v2704_v27  ;;  %v2706_v13 = vpop.f32.mrb[171].mxu1  ;;  %4533 = vmatmul.mubr.f32.gmra.mrb[146].mxu0 %v3073_v7  ;;  %v3042_v51 = vadd.f32 %v6706_v3, %v3003_v30 }
 0x394   : > { %v3004_v19 = vadd.f32 %v2930_v20, %v6674_v35  ;;  %v3074_v2 = vmax.f32 %v3042_v51, 0.0 }
 0x395   : > { %v2709_v59 = vpop.f32.mrb[172].mxu1 }
 0x396   : > { %v2935_v40 = vadd.f32 %v6749_v62, %v2709_v59  ;;  %v2711_v55 = vpop.f32.mrb[173].mxu1  ;;  %4535 = vmatprep.mubr.f32.mxu0 %v3074_v2  ;;  %v3043_v60 = vadd.f32 %v6706_v3, %v3004_v19 }
 0x398   : > { %v3005_v58 = vadd.f32 %v2935_v40, %v6681_v48  ;;  %v3075_v52 = vmax.f32 %v3043_v60, 0.0 }
 0x399   : > { %v2714_v45 = vpop.f32.mrb[174].mxu1 }
 0x39a   : > { %v2940_v36 = vadd.f32 %v6747_v14, %v2714_v45  ;;  %v2716_v15 = vpop.f32.mrb[175].mxu1  ;;  %4536 = vmatmul.mubr.f32.gmra.mrb[148].mxu0 %v3075_v52  ;;  %v3044_v57 = vadd.f32 %v6706_v3, %v3005_v58 }
 0x39c   : > { %v3006_v35 = vadd.f32 %v2940_v36, %v6679_v46  ;;  %v3076_v24 = vmax.f32 %v3044_v57, 0.0 }
 0x39d   : > { %v2719_v47 = vpop.f32.mrb[176].mxu1 }
 0x39e   : > { %v2945_v62 = vadd.f32 %v6755_v28, %v2719_v47  ;;  %v2721_v54 = vpop.f32.mrb[177].mxu1  ;;  %4538 = vmatprep.mubr.f32.mxu0 %v3076_v24  ;;  %v3045_v61 = vadd.f32 %v6706_v3, %v3006_v35 }
 0x3a0   : > { %v3007_v48 = vadd.f32 %v2945_v62, %v6686_v4  ;;  %v3077_v25 = vmax.f32 %v3045_v61, 0.0 }
 0x3a1   : > { %v2724_v39 = vpop.f32.mrb[178].mxu1 }
 0x3a2   : > { %v2950_v14 = vadd.f32 %v6753_v63, %v2724_v39  ;;  %v2726_v17 = vpop.f32.mrb[179].mxu1  ;;  %4539 = vmatmul.mubr.f32.gmra.mrb[150].mxu0 %v3077_v25  ;;  %v3046_v37 = vadd.f32 %v6706_v3, %v3007_v48 }
 0x3a4   : > { %v3008_v46 = vadd.f32 %v2950_v14, %v6684_v42  ;;  %v3078_v56 = vmax.f32 %v3046_v37, 0.0 }
 0x3a5   : > { %v2729_v50 = vpop.f32.mrb[180].mxu1 }
 0x3a6   : > { %v2955_v28 = vadd.f32 %v6761_v12, %v2729_v50  ;;  %v2731_v16 = vpop.f32.mrb[181].mxu1  ;;  %4541 = vmatprep.mubr.f32.mxu0 %v3078_v56  ;;  %v3047_v29 = vadd.f32 %v6706_v3, %v3008_v46 }
 0x3a8   : > { %v3009_v4 = vadd.f32 %v2955_v28, %v6691_v31  ;;  %v3079_v32 = vmax.f32 %v3047_v29, 0.0 }
 0x3a9   : > { %v2734_v34 = vpop.f32.mrb[182].mxu1 }
 0x3aa   : > { %v2960_v63 = vadd.f32 %v6759_v18, %v2734_v34  ;;  %v2736_v21 = vpop.f32.mrb[183].mxu1  ;;  %4542 = vmatmul.mubr.f32.gmra.mrb[152].mxu0 %v3079_v32  ;;  %v3048_v53 = vadd.f32 %v6706_v3, %v3009_v4 }
 0x3ac   : > { %v3010_v42 = vadd.f32 %v2960_v63, %v6689_v10  ;;  %v3080_v5 = vmax.f32 %v3048_v53, 0.0 }
 0x3ad   : > { %v2739_v6 = vpop.f32.mrb[184].mxu1 }
 0x3ae   : > { %v2965_v12 = vadd.f32 %v6768_v44, %v2739_v6  ;;  %v2741_v49 = vpop.f32.mrb[185].mxu1  ;;  %4544 = vmatprep.mubr.f32.mxu0 %v3080_v5  ;;  %v3049_v9 = vadd.f32 %v6706_v3, %v3010_v42 }
 0x3b0   : > { %v3011_v31 = vadd.f32 %v2965_v12, %v6696_v22  ;;  %v3081_v1 = vmax.f32 %v3049_v9, 0.0 }
 0x3b1   : > { %v2744_v0 = vpop.f32.mrb[186].mxu1 }
 0x3b2   : > { %v2970_v18 = vadd.f32 %v6766_v33, %v2744_v0  ;;  %v2746_v26 = vpop.f32.mrb[187].mxu1  ;;  %4545 = vmatmul.mubr.f32.gmra.mrb[154].mxu0 %v3081_v1  ;;  %v3050_v11 = vadd.f32 %v6706_v3, %v3011_v31 }
 0x3b4   : > { %v3012_v10 = vadd.f32 %v2970_v18, %v6694_v23  ;;  %v3082_v30 = vmax.f32 %v3050_v11, 0.0 }
 0x3b5   : > { %v2749_v7 = vpop.f32.mrb[188].mxu1 }
 0x3b6   : > { %v2975_v44 = vadd.f32 %v6775_v41, %v2749_v7  ;;  %v2751_v27 = vpop.f32.mrb[189].mxu1  ;;  %4547 = vmatprep.mubr.f32.mxu0 %v3082_v30  ;;  %v3051_v20 = vadd.f32 %v6706_v3, %v3012_v10 }
 0x3b8   : > { %v3013_v22 = vadd.f32 %v2975_v44, %v6699_v8  ;;  %v3083_v13 = vmax.f32 %v3051_v20, 0.0 }
 0x3b9   : > { %v2754_v51 = vpop.f32.mrb[190].mxu1 }
 0x3ba   : > { %v2980_v33 = vadd.f32 %v6773_v43, %v2754_v51  ;;  %v2756_v19 = vpop.f32.mrb[191].mxu1  ;;  %4548 = vmatmul.mubr.f32.gmra.mrb[156].mxu0 %v3083_v13  ;;  %v3052_v2 = vadd.f32 %v6706_v3, %v3013_v22 }
 0x3bc   : > { %v3014_v23 = vadd.f32 %v2980_v33, %v6701_v38  ;;  %v3084_v59 = vmax.f32 %v3052_v2, 0.0 }
 0x3be   : > { %4550 = vmatprep.mubr.f32.mxu0 %v3084_v59  ;;  %v3053_v41 = vadd.f32 %v6706_v3, %v3014_v23 }
 0x3c0   : > { %v3085_v40 = vmax.f32 %v3053_v41, 0.0 }
 0x3c2   : > { %4551 = vmatmul.mubr.f32.gmra.mrb[158].mxu0 %v3085_v40 }
 0x41d   : > { %v4507_v55 = vpop.f32.mrb[128].mxu0 }
 0x41e   : > { %3569 = vst [vmem:[%s6831_s21 + $0x8] sm:$0xff] %v4507_v55  ;;  %v3409_v8 = vpop.f32.mrb[129].mxu0 }
 0x41f   : > { %3568 = vst [vmem:[%s6831_s21] sm:$0xff] %v3409_v8 }
 0x425   : > { %v4510_v38 = vpop.f32.mrb[130].mxu0 }
 0x426   : > { %3571 = vst [vmem:[%s6831_s21 + $0x18] sm:$0xff] %v4510_v38  ;;  %v3419_v3 = vpop.f32.mrb[131].mxu0 }
 0x427   : > { %3570 = vst [vmem:[%s6831_s21 + $0x10] sm:$0xff] %v3419_v3 }
 0x42d   : > { %v4513_v43 = vpop.f32.mrb[132].mxu0 }
 0x42e   : > { %3573 = vst [vmem:[%s6831_s21 + $0x28] sm:$0xff] %v4513_v43  ;;  %v3429_v60 = vpop.f32.mrb[133].mxu0 }
 0x42f   : > { %3572 = vst [vmem:[%s6831_s21 + $0x20] sm:$0xff] %v3429_v60 }
 0x435   : > { %v4516_v58 = vpop.f32.mrb[134].mxu0 }
 0x436   : > { %3575 = vst [vmem:[%s6831_s21 + $0x38] sm:$0xff] %v4516_v58  ;;  %v3439_v52 = vpop.f32.mrb[135].mxu0 }
 0x437   : > { %3574 = vst [vmem:[%s6831_s21 + $0x30] sm:$0xff] %v3439_v52 }
 0x43d   : > { %v4519_v45 = vpop.f32.mrb[136].mxu0 }
 0x43e   : > { %3577 = vst [vmem:[%s6831_s21 + $0x48] sm:$0xff] %v4519_v45  ;;  %v3449_v36 = vpop.f32.mrb[137].mxu0 }
 0x43f   : > { %3576 = vst [vmem:[%s6831_s21 + $0x40] sm:$0xff] %v3449_v36 }
 0x445   : > { %v4522_v15 = vpop.f32.mrb[138].mxu0 }
 0x446   : > { %3579 = vst [vmem:[%s6831_s21 + $0x58] sm:$0xff] %v4522_v15  ;;  %v3459_v57 = vpop.f32.mrb[139].mxu0 }
 0x447   : > { %3578 = vst [vmem:[%s6831_s21 + $0x50] sm:$0xff] %v3459_v57 }
 0x44d   : > { %v4525_v35 = vpop.f32.mrb[140].mxu0 }
 0x44e   : > { %3581 = vst [vmem:[%s6831_s21 + $0x68] sm:$0xff] %v4525_v35  ;;  %v3469_v24 = vpop.f32.mrb[141].mxu0 }
 0x44f   : > { %3580 = vst [vmem:[%s6831_s21 + $0x60] sm:$0xff] %v3469_v24 }
 0x455   : > { %v4528_v47 = vpop.f32.mrb[142].mxu0 }
 0x456   : > { %3583 = vst [vmem:[%s6831_s21 + $0x78] sm:$0xff] %v4528_v47  ;;  %v3479_v62 = vpop.f32.mrb[143].mxu0 }
 0x457   : > { %3582 = vst [vmem:[%s6831_s21 + $0x70] sm:$0xff] %v3479_v62 }
 0x45d   : > { %v4531_v54 = vpop.f32.mrb[144].mxu0 }
 0x45e   : > { %3585 = vst [vmem:[%s6831_s21 + $0x88] sm:$0xff] %v4531_v54  ;;  %v3489_v61 = vpop.f32.mrb[145].mxu0 }
 0x45f   : > { %3584 = vst [vmem:[%s6831_s21 + $0x80] sm:$0xff] %v3489_v61 }
 0x465   : > { %v4534_v48 = vpop.f32.mrb[146].mxu0 }
 0x466   : > { %3587 = vst [vmem:[%s6831_s21 + $0x98] sm:$0xff] %v4534_v48  ;;  %v3499_v25 = vpop.f32.mrb[147].mxu0 }
 0x467   : > { %3586 = vst [vmem:[%s6831_s21 + $0x90] sm:$0xff] %v3499_v25 }
 0x46d   : > { %v4537_v39 = vpop.f32.mrb[148].mxu0 }
 0x46e   : > { %3589 = vst [vmem:[%s6831_s21 + $0xa8] sm:$0xff] %v4537_v39  ;;  %v3509_v14 = vpop.f32.mrb[149].mxu0 }
 0x46f   : > { %3588 = vst [vmem:[%s6831_s21 + $0xa0] sm:$0xff] %v3509_v14 }
 0x475   : > { %v4540_v17 = vpop.f32.mrb[150].mxu0 }
 0x476   : > { %3591 = vst [vmem:[%s6831_s21 + $0xb8] sm:$0xff] %v4540_v17  ;;  %v3519_v37 = vpop.f32.mrb[151].mxu0 }
 0x477   : > { %3590 = vst [vmem:[%s6831_s21 + $0xb0] sm:$0xff] %v3519_v37 }
 0x47d   : > { %v4543_v46 = vpop.f32.mrb[152].mxu0 }
 0x47e   : > { %3593 = vst [vmem:[%s6831_s21 + $0xc8] sm:$0xff] %v4543_v46  ;;  %v3529_v56 = vpop.f32.mrb[153].mxu0 }
 0x47f   : > { %3592 = vst [vmem:[%s6831_s21 + $0xc0] sm:$0xff] %v3529_v56 }
 0x485   : > { %v4546_v50 = vpop.f32.mrb[154].mxu0 }
 0x486   : > { %3595 = vst [vmem:[%s6831_s21 + $0xd8] sm:$0xff] %v4546_v50  ;;  %v3539_v28 = vpop.f32.mrb[155].mxu0 }
 0x487   : > { %3594 = vst [vmem:[%s6831_s21 + $0xd0] sm:$0xff] %v3539_v28 }
 0x48d   : > { %v4549_v16 = vpop.f32.mrb[156].mxu0 }
 0x48e   : > { %3597 = vst [vmem:[%s6831_s21 + $0xe8] sm:$0xff] %v4549_v16  ;;  %v3549_v29 = vpop.f32.mrb[157].mxu0 }
 0x48f   : > { %3596 = vst [vmem:[%s6831_s21 + $0xe0] sm:$0xff] %v3549_v29 }
 0x495   : > { %v4552_v4 = vpop.f32.mrb[158].mxu0 }
 0x496   : > { %3599 = vst [vmem:[%s6831_s21 + $0xf8] sm:$0xff] %v4552_v4  ;;  %v3559_v32 = vpop.f32.mrb[159].mxu0 }
 0x497   : > { %3598 = vst [vmem:[%s6831_s21 + $0xf0] sm:$0xff] %v3559_v32 }
 0x498   : > { %5219 = shalt.err (!%p5216_p0)
}
 0x499   : > { %s5220_s8 = scalar_lea.hbm %s6868_s24, 4096  ;;  %s5224_s21 = scalar_lea.hbm %s6988_s22, 8192 }
 0x49a   : > { %p5221_p4 = scmp.ne.s32.totalorder %s6868_s24, %s5220_s8  ;;  %p5225_p12 = scmp.lt.u32.totalorder %s6868_s24, %s6988_s22 }
 0x49b   : > { %p5226_p1 = scmp.lt.u32.totalorder %s5224_s21, %s5220_s8  ;;  %p5228_p8 = scmp.lt.u32.totalorder %s5220_s8, %s6868_s24 }
 0x49c   : > { %p5222_p13 = pnand %p5221_p4, %p5549_p5 }
 0x49d   : > { %p5227_p11 = por %p5226_p1, %p5225_p12 }
 0x49e   : > { %p5223_p2 = pneg %p5222_p13 }
 0x49f   : > { %p5229_p6 = por %p5228_p8, %p5227_p11 }
 0x4a1   : > { %p5230_p10 = pnand %p5229_p6, %p5223_p2 }
 0x4a3   : > { %5233 = shalt.err (!%p5230_p10)
}
 0x4a4   : > { %s5308_s29 = smov 128   ;;  %s5309_s28 = smov 8  }
 0x4a5   : > { %4939 = dma.vmem_to_hbm [thread:$0]  (%p5549_p5), %s6870_s25, 4096, %s6868_s24, %s3601_s20, %s5308_s29, %s5308_s29, %s5309_s28  }
 0x4a6 PF: > { %s6989_s11 = sld [smem:[#allocation19_spill]]  ;;  %s6990_s18 = sld [smem:[#allocation21_spill]] }
 0x4a7   : > { %p6992_p7 = scmp.ge.s32.totalorder %s5296_s17, 2 }
 0x4ac   : > { %s3631_s26 = sand.u32 1, %s6989_s11   ;;  %p6991_p3 = scmp.ne.s32.totalorder %s6990_s18, 0 }
 0x4ad   : > { %s3632_s30 = scalar_lea.sflag [#allocation7], %s3631_s26 }
 0x4ae   : > { %p4959_p9 = pnand %p6992_p7, %p6991_p3 }
 0x4b0   : > { %5271 = dma.done.wait (!%p4959_p9), %s3632_s30, 4096  }
 0x4b1   : > { %5273 = vsyncadd (!%p4959_p9), %s3632_s30, 4294963200  ;;  %s28_s17 = sadd.s32 1, %s5296_s17   ;;  %s6993_s9 = smov %s7000_s12 }
 0x4b2   : > { %p25_p0 = scmp.ge.s32.totalorder %s28_s17, 4   ;;  %s6994_s12 = smov %s5280_s13 }
 0x4b3   : > { %s6995_s13 = smov %s5284_s14  ;;  %s6996_s14 = smov %s5558_s1 }
 0x4b4   : > { %s6997_s15 = smov %s5292_s16  ;;  %s6998_s16 = smov %s6993_s9 }
 0x4b5   :  { %27 = sbr.rel (!%p25_p0) target bundleno = 12 (0xc), region = 127 }
 0x4bc   :  { %3637 = vsyncpa [#allocation6], 1 }
 0x4bd   :  { %3639 = vsyncpa [#allocation6 + $0x1], 1 }
 0x4be   :  { %3640 = vsyncpa [#allocation9], 1 }
 0x4bf   :  { %3641 = vsyncpa [#allocation12], 1 }
 0x4c0   :  { %3642 = vsyncpa [#allocation7], 1 }
 0x4c1   :  { %3644 = vsyncpa [#allocation7 + $0x1], 1 }
 0x4c2   :  { %3645 = vsyncmov [#allocation4] }
 0x4c5   :  { %s3646_s27 = vpop.sfrf %3645 }
 0x4c6   :  { %p3779_p5 = scmp.ne.s32.totalorder %s3646_s27, 0 }
 0x4c8   :  { %3650 = shalt.err (%p3779_p5)  }
 0x4c9   :  { %3652 = vsyncmov [#allocation4 + $0x1] }
 0x4cc   :  { %s3653_s25 = vpop.sfrf %3652 }
 0x4cd   :  { %p3780_p4 = scmp.ne.s32.totalorder %s3653_s25, 0 }
 0x4cf   :  { %3657 = shalt.err (%p3780_p4)  }

</bundles_post_ra>
